<compile_context>
chip_gen: v7x
topology: tpu7x:2x2x1
jax: 0.10.0
libtpu: 0.0.40
codegen_flags: <defaults>
</compile_context>

<pallas_src>
import functools

import jax
import jax.numpy as jnp
from jax.experimental import pallas as pl
from jax.experimental.pallas import tpu as pltpu

EPS = 1e-5
LANE = 128


def _round_up(x, m):
    return (x + m - 1) // m * m


# ----------------------------- Pallas kernel ---------------------------------

def _make_conv_bn_kernel(K, stride, tm_rows, Wo, apply_relu, has_residual):
    """Conv(KxK, stride) + BN affine (+ residual) (+ ReLU) for one (row, Cout) tile."""
    h_span = (tm_rows - 1) * stride + 1
    w_span = (Wo - 1) * stride + 1
    M = tm_rows * Wo

    def kernel(*refs):
        if has_residual:
            x_ref, w_ref, scale_ref, bias_ref, res_ref, o_ref = refs
        else:
            x_ref, w_ref, scale_ref, bias_ref, o_ref = refs

        cin_p = x_ref.shape[-1]
        tcout = o_ref.shape[-1]

        # first padded input row of this output-row block
        r0 = pl.multiple_of(pl.program_id(1) * (tm_rows * stride), tm_rows * stride)

        acc = jnp.zeros((M, tcout), jnp.float32)
        for kh in range(K):                    # static, unrolled taps
            for kw in range(K):
                patch = x_ref[:, pl.ds(r0 + kh, h_span), pl.ds(kw, w_span), :]
                if stride > 1:
                    patch = patch[:, ::stride, ::stride, :]
                acc = acc + jnp.dot(
                    patch.reshape(M, cin_p),      # bf16 (M, Cin_p)
                    w_ref[kh * K + kw],           # bf16 (Cin_p, tcout)
                    preferred_element_type=jnp.float32,
                )

        out = acc * scale_ref[...] + bias_ref[...]        # fused BN (eval mode), f32
        if has_residual:
            out = out + res_ref[...].reshape(M, tcout)
        if apply_relu:
            out = jnp.maximum(out, 0.0)
        o_ref[...] = out.reshape(1, tm_rows, Wo, tcout).astype(o_ref.dtype)

    return kernel


def _pick_row_tile(Ho, Wo):
    # keep the per-tile matmul M dim (tm_rows * Wo) around 128 rows and divide Ho evenly
    target = max(1, 128 // max(Wo, 1))
    for t in range(min(target, Ho), 0, -1):
        if Ho % t == 0:
            return t
    return Ho


def conv_bn_pallas(x_nhwc, w_kkio, scale, bias, *, stride, padding,
                   apply_relu, residual=None):
    """x_nhwc: (N,H,W,Cin_p) f32, channels already padded to a multiple of 128.
    w_kkio:  (K*K, Cin_p, Cout_p) (cast to bf16 here).
    scale/bias: (Cout_p,) f32 folded BatchNorm affine.
    residual: optional (N,Ho,Wo,Cout_p) f32.  Returns (N,Ho,Wo,Cout_p) f32."""
    N, H, W, Cin_p = x_nhwc.shape
    KK, _, Cout_p = w_kkio.shape
    K = int(round(KK ** 0.5))
    Ho = (H + 2 * padding - K) // stride + 1
    Wo = (W + 2 * padding - K) // stride + 1

    # spatial halo padding (wrapper-side, small vs the conv itself)
    x_pad = jnp.pad(x_nhwc, ((0, 0), (padding, padding), (padding, padding), (0, 0)))
    Hp, Wp = H + 2 * padding, W + 2 * padding
    x_bf16 = x_pad.astype(jnp.bfloat16)
    w_bf16 = w_kkio.astype(jnp.bfloat16)

    tm_rows = _pick_row_tile(Ho, Wo)
    n_row = Ho // tm_rows
    tcout = min(LANE, Cout_p)
    n_cout = Cout_p // tcout

    has_residual = residual is not None
    kernel = _make_conv_bn_kernel(K, stride, tm_rows, Wo, apply_relu, has_residual)

    in_specs = [
        # full padded image per batch element; resident across row/cout grid axes
        pl.BlockSpec((1, Hp, Wp, Cin_p), lambda n, r, c: (n, 0, 0, 0)),
        pl.BlockSpec((KK, Cin_p, tcout), lambda n, r, c: (0, 0, c)),
        pl.BlockSpec((1, tcout), lambda n, r, c: (0, c)),
        pl.BlockSpec((1, tcout), lambda n, r, c: (0, c)),
    ]
    inputs = [x_bf16, w_bf16,
              scale.reshape(1, Cout_p).astype(jnp.float32),
              bias.reshape(1, Cout_p).astype(jnp.float32)]
    if has_residual:
        in_specs.append(
            pl.BlockSpec((1, tm_rows, Wo, tcout), lambda n, r, c: (n, r, 0, c)))
        inputs.append(residual.astype(jnp.float32))

    flops = 2 * N * Ho * Wo * KK * Cin_p * Cout_p
    bytes_accessed = (x_bf16.size * 2 + w_bf16.size * 2
                      + N * Ho * Wo * Cout_p * 4 * (2 if has_residual else 1))

    out = pl.pallas_call(
        kernel,
        out_shape=jax.ShapeDtypeStruct((N, Ho, Wo, Cout_p), jnp.float32),
        grid=(N, n_row, n_cout),
        in_specs=in_specs,
        out_specs=pl.BlockSpec((1, tm_rows, Wo, tcout), lambda n, r, c: (n, r, 0, c)),
        compiler_params=pltpu.CompilerParams(
            dimension_semantics=("parallel", "parallel", "arbitrary"),
            vmem_limit_bytes=32 * 1024 * 1024),
        cost_estimate=pl.CostEstimate(flops=flops, transcendentals=0,
                                      bytes_accessed=bytes_accessed),
    )(*inputs)
    return out


# ------------------------- parameter init & forward --------------------------

def _init_bn(key, c):
    k1, k2, k3, k4 = jax.random.split(key, 4)
    return dict(
        gamma=1.0 + 0.1 * jax.random.normal(k1, (c,), jnp.float32),
        beta=0.1 * jax.random.normal(k2, (c,), jnp.float32),
        mean=0.1 * jax.random.normal(k3, (c,), jnp.float32),
        var=0.5 + 0.5 * jax.random.uniform(k4, (c,), jnp.float32),
    )


def init_residual_block(key, in_channels, out_channels, stride=1):
    ks = jax.random.split(key, 6)
    params = {
        "w1": 0.1 * jax.random.normal(ks[0], (out_channels, in_channels, 3, 3), jnp.float32),
        "bn1": _init_bn(ks[1], out_channels),
        "w2": 0.1 * jax.random.normal(ks[2], (out_channels, out_channels, 3, 3), jnp.float32),
        "bn2": _init_bn(ks[3], out_channels),
    }
    if stride != 1 or in_channels != out_channels:
        params["w_sc"] = 0.1 * jax.random.normal(
            ks[4], (out_channels, in_channels, 1, 1), jnp.float32)
        params["bn_sc"] = _init_bn(ks[5], out_channels)
    return params


def _to_kkio_padded(w_oikk, cin_p, cout_p):
    # (Cout, Cin, KH, KW) -> (KH*KW, Cin_p, Cout_p), zero-padded channels
    Cout, Cin, KH, KW = w_oikk.shape
    w = jnp.transpose(w_oikk, (2, 3, 1, 0)).reshape(KH * KW, Cin, Cout)
    return jnp.pad(w, ((0, 0), (0, cin_p - Cin), (0, cout_p - Cout)))


def _bn_affine_padded(bn, cout_p):
    scale = bn["gamma"] / jnp.sqrt(bn["var"] + EPS)
    bias = bn["beta"] - bn["mean"] * scale
    pad = cout_p - scale.shape[0]
    return jnp.pad(scale, (0, pad)), jnp.pad(bias, (0, pad))


def residual_block_forward(params, x_nchw, stride=1):
    N, Cin, H, W = x_nchw.shape
    Cout = params["w1"].shape[0]
    cin_p = _round_up(Cin, LANE)
    cout_p = _round_up(Cout, LANE)

    x = jnp.transpose(x_nchw, (0, 2, 3, 1)).astype(jnp.float32)     # NCHW -> NHWC
    x = jnp.pad(x, ((0, 0), (0, 0), (0, 0), (0, cin_p - Cin)))      # lane-dense channels

    s1, b1 = _bn_affine_padded(params["bn1"], cout_p)
    s2, b2 = _bn_affine_padded(params["bn2"], cout_p)

    out1 = conv_bn_pallas(x, _to_kkio_padded(params["w1"], cin_p, cout_p), s1, b1,
                          stride=stride, padding=1, apply_relu=True)

    if "w_sc" in params:
        ssc, bsc = _bn_affine_padded(params["bn_sc"], cout_p)
        shortcut = conv_bn_pallas(x, _to_kkio_padded(params["w_sc"], cin_p, cout_p),
                                  ssc, bsc, stride=stride, padding=0, apply_relu=False)
    else:
        shortcut = x   # identity shortcut: Cin == Cout and stride == 1 (padding matches)

    out = conv_bn_pallas(out1, _to_kkio_padded(params["w2"], cout_p, cout_p), s2, b2,
                         stride=1, padding=1, apply_relu=True, residual=shortcut)

    out = out[..., :Cout]                                            # drop lane padding
    return jnp.transpose(out, (0, 3, 1, 2))                          # NHWC -> NCHW


# ------------------------------ pure-JAX reference ---------------------------

def _ref_forward(params, x_nchw, stride=1, matmul_dtype=jnp.float32):
    x = jnp.transpose(x_nchw, (0, 2, 3, 1)).astype(jnp.float32)

    def conv(x, w_oikk, stride, padding):
        w = jnp.transpose(w_oikk, (2, 3, 1, 0))  # HWIO
        return jax.lax.conv_general_dilated(
            x.astype(matmul_dtype), w.astype(matmul_dtype),
            (stride, stride), [(padding, padding)] * 2,
            dimension_numbers=("NHWC", "HWIO", "NHWC"),
            preferred_element_type=jnp.float32)

    def bn(y, p):
        scale = p["gamma"] / jnp.sqrt(p["var"] + EPS)
        return y * scale + (p["beta"] - p["mean"] * scale)

    out = jax.nn.relu(bn(conv(x, params["w1"], stride, 1), params["bn1"]))
    out = bn(conv(out, params["w2"], 1, 1), params["bn2"])
    if "w_sc" in params:
        sc = bn(conv(x, params["w_sc"], stride, 0), params["bn_sc"])
    else:
        sc = x
    out = jax.nn.relu(out + sc)
    return jnp.transpose(out, (0, 3, 1, 2))


# ----------------------------------- main -------------------------------------

if __name__ == "__main__":
    key = jax.random.PRNGKey(0)
    k_param, k_x = jax.random.split(key)

    in_channels, out_channels, stride = 4, 8, 1   # channel change -> projection shortcut
    N, H, W = 2, 16, 16

    params = init_residual_block(k_param, in_channels, out_channels, stride)
    x = jax.random.normal(k_x, (N, in_channels, H, W), jnp.float32)   # NCHW, like PyTorch

    fwd = jax.jit(functools.partial(residual_block_forward, stride=stride))
    out = jax.block_until_ready(fwd(params, x))

    # Structural check vs lax.conv with matching numerics (bf16 matmul inputs, f32 accum).
    ref_bf16 = jax.block_until_ready(
        _ref_forward(params, x, stride, matmul_dtype=jnp.bfloat16))
    assert out.shape == ref_bf16.shape, (out.shape, ref_bf16.shape)
    assert jnp.allclose(out, ref_bf16, atol=5e-3, rtol=5e-3), (
        "max abs diff vs bf16 ref = %g" % float(jnp.max(jnp.abs(out - ref_bf16))))

    # Semantics check vs the full-f32 reference (loose: bf16 MXU inputs in the kernel).
    ref_f32 = jax.block_until_ready(_ref_forward(params, x, stride))
    assert jnp.allclose(out, ref_f32, atol=1e-1, rtol=1e-1), (
        "max abs diff vs f32 ref = %g" % float(jnp.max(jnp.abs(out - ref_f32))))

    print("KERNEL_OK")
</pallas_src>

<mosaic_0001>
module attributes {stable_mosaic.version = 11 : i64} {
  func.func @kernel(%arg0: i32, %arg1: i32, %arg2: i32, %arg3: memref<1x18x18x128xbf16, #tpu.memory_space<vmem>>, %arg4: memref<9x128x128xbf16, #tpu.memory_space<vmem>>, %arg5: memref<1x128xf32, #tpu.memory_space<vmem>>, %arg6: memref<1x128xf32, #tpu.memory_space<vmem>>, %arg7: memref<1x8x16x128xf32, #tpu.memory_space<vmem>>) attributes {dimension_semantics = [#tpu.dimension_semantics<parallel>, #tpu.dimension_semantics<parallel>, #tpu.dimension_semantics<arbitrary>], iteration_bounds = array<i64: 2, 2, 1>, scalar_prefetch = 0 : i64, scratch_operands = 0 : i64, tpu.core_type = #tpu.core_type<tc>, window_params = [{transform_indices = @transform_0, window_bounds = array<i64: 1, 18, 18, 128>}, {transform_indices = @transform_1, window_bounds = array<i64: 9, 128, 128>}, {transform_indices = @transform_2, window_bounds = array<i64: 1, 128>}, {transform_indices = @transform_3, window_bounds = array<i64: 1, 128>}, {transform_indices = @transform_4, window_bounds = array<i64: 1, 8, 16, 128>}]} {
    %c8_i32 = arith.constant 8 : i32
    %0 = arith.muli %arg1, %c8_i32 : i32
    %1 = tpu.assume_multiple %0, 8 : i32
    %cst = arith.constant 0.000000e+00 : f32
    %2 = vector.broadcast %cst : f32 to vector<128x128xf32>
    %c0_i32 = arith.constant 0 : i32
    %3 = arith.addi %1, %c0_i32 : i32
    %c0 = arith.constant 0 : index
    %4 = arith.index_cast %3 : i32 to index
    %c0_0 = arith.constant 0 : index
    %c0_1 = arith.constant 0 : index
    %5 = vector.load %arg3[%c0, %4, %c0_0, %c0_1] : memref<1x18x18x128xbf16, #tpu.memory_space<vmem>>, vector<1x8x16x128xbf16>
    %6 = vector.shape_cast %5 : vector<1x8x16x128xbf16> to vector<128x128xbf16>
    %c0_2 = arith.constant 0 : index
    %c0_3 = arith.constant 0 : index
    %c0_4 = arith.constant 0 : index
    %7 = vector.load %arg4[%c0_2, %c0_3, %c0_4] : memref<9x128x128xbf16, #tpu.memory_space<vmem>>, vector<1x128x128xbf16>
    %8 = vector.shape_cast %7 : vector<1x128x128xbf16> to vector<128x128xbf16>
    %cst_5 = arith.constant dense<0.000000e+00> : vector<128x128xf32>
    %9 = tpu.matmul %6, %8, %cst_5 {dimension_numbers = #tpu.dot_dimension_numbers<[1], [0], [0], [1], [0, 0, 1, 1], [], []>} : vector<128x128xbf16>, vector<128x128xbf16>, vector<128x128xf32> -> vector<128x128xf32>
    %10 = arith.addf %2, %9 : vector<128x128xf32>
    %c0_i32_6 = arith.constant 0 : i32
    %11 = arith.addi %1, %c0_i32_6 : i32
    %c0_7 = arith.constant 0 : index
    %12 = arith.index_cast %11 : i32 to index
    %c1 = arith.constant 1 : index
    %c0_8 = arith.constant 0 : index
    %13 = vector.load %arg3[%c0_7, %12, %c1, %c0_8] : memref<1x18x18x128xbf16, #tpu.memory_space<vmem>>, vector<1x8x16x128xbf16>
    %14 = vector.shape_cast %13 : vector<1x8x16x128xbf16> to vector<128x128xbf16>
    %c1_9 = arith.constant 1 : index
    %c0_10 = arith.constant 0 : index
    %c0_11 = arith.constant 0 : index
    %15 = vector.load %arg4[%c1_9, %c0_10, %c0_11] : memref<9x128x128xbf16, #tpu.memory_space<vmem>>, vector<1x128x128xbf16>
    %16 = vector.shape_cast %15 : vector<1x128x128xbf16> to vector<128x128xbf16>
    %cst_12 = arith.constant dense<0.000000e+00> : vector<128x128xf32>
    %17 = tpu.matmul %14, %16, %cst_12 {dimension_numbers = #tpu.dot_dimension_numbers<[1], [0], [0], [1], [0, 0, 1, 1], [], []>} : vector<128x128xbf16>, vector<128x128xbf16>, vector<128x128xf32> -> vector<128x128xf32>
    %18 = arith.addf %10, %17 : vector<128x128xf32>
    %c0_i32_13 = arith.constant 0 : i32
    %19 = arith.addi %1, %c0_i32_13 : i32
    %c0_14 = arith.constant 0 : index
    %20 = arith.index_cast %19 : i32 to index
    %c2 = arith.constant 2 : index
    %c0_15 = arith.constant 0 : index
    %21 = vector.load %arg3[%c0_14, %20, %c2, %c0_15] : memref<1x18x18x128xbf16, #tpu.memory_space<vmem>>, vector<1x8x16x128xbf16>
    %22 = vector.shape_cast %21 : vector<1x8x16x128xbf16> to vector<128x128xbf16>
    %c2_16 = arith.constant 2 : index
    %c0_17 = arith.constant 0 : index
    %c0_18 = arith.constant 0 : index
    %23 = vector.load %arg4[%c2_16, %c0_17, %c0_18] : memref<9x128x128xbf16, #tpu.memory_space<vmem>>, vector<1x128x128xbf16>
    %24 = vector.shape_cast %23 : vector<1x128x128xbf16> to vector<128x128xbf16>
    %cst_19 = arith.constant dense<0.000000e+00> : vector<128x128xf32>
    %25 = tpu.matmul %22, %24, %cst_19 {dimension_numbers = #tpu.dot_dimension_numbers<[1], [0], [0], [1], [0, 0, 1, 1], [], []>} : vector<128x128xbf16>, vector<128x128xbf16>, vector<128x128xf32> -> vector<128x128xf32>
    %26 = arith.addf %18, %25 : vector<128x128xf32>
    %c1_i32 = arith.constant 1 : i32
    %27 = arith.addi %1, %c1_i32 : i32
    %c0_20 = arith.constant 0 : index
    %28 = arith.index_cast %27 : i32 to index
    %c0_21 = arith.constant 0 : index
    %c0_22 = arith.constant 0 : index
    %29 = vector.load %arg3[%c0_20, %28, %c0_21, %c0_22] : memref<1x18x18x128xbf16, #tpu.memory_space<vmem>>, vector<1x8x16x128xbf16>
    %30 = vector.shape_cast %29 : vector<1x8x16x128xbf16> to vector<128x128xbf16>
    %c3 = arith.constant 3 : index
    %c0_23 = arith.constant 0 : index
    %c0_24 = arith.constant 0 : index
    %31 = vector.load %arg4[%c3, %c0_23, %c0_24] : memref<9x128x128xbf16, #tpu.memory_space<vmem>>, vector<1x128x128xbf16>
    %32 = vector.shape_cast %31 : vector<1x128x128xbf16> to vector<128x128xbf16>
    %cst_25 = arith.constant dense<0.000000e+00> : vector<128x128xf32>
    %33 = tpu.matmul %30, %32, %cst_25 {dimension_numbers = #tpu.dot_dimension_numbers<[1], [0], [0], [1], [0, 0, 1, 1], [], []>} : vector<128x128xbf16>, vector<128x128xbf16>, vector<128x128xf32> -> vector<128x128xf32>
    %34 = arith.addf %26, %33 : vector<128x128xf32>
    %c1_i32_26 = arith.constant 1 : i32
    %35 = arith.addi %1, %c1_i32_26 : i32
    %c0_27 = arith.constant 0 : index
    %36 = arith.index_cast %35 : i32 to index
    %c1_28 = arith.constant 1 : index
    %c0_29 = arith.constant 0 : index
    %37 = vector.load %arg3[%c0_27, %36, %c1_28, %c0_29] : memref<1x18x18x128xbf16, #tpu.memory_space<vmem>>, vector<1x8x16x128xbf16>
    %38 = vector.shape_cast %37 : vector<1x8x16x128xbf16> to vector<128x128xbf16>
    %c4 = arith.constant 4 : index
    %c0_30 = arith.constant 0 : index
    %c0_31 = arith.constant 0 : index
    %39 = vector.load %arg4[%c4, %c0_30, %c0_31] : memref<9x128x128xbf16, #tpu.memory_space<vmem>>, vector<1x128x128xbf16>
    %40 = vector.shape_cast %39 : vector<1x128x128xbf16> to vector<128x128xbf16>
    %cst_32 = arith.constant dense<0.000000e+00> : vector<128x128xf32>
    %41 = tpu.matmul %38, %40, %cst_32 {dimension_numbers = #tpu.dot_dimension_numbers<[1], [0], [0], [1], [0, 0, 1, 1], [], []>} : vector<128x128xbf16>, vector<128x128xbf16>, vector<128x128xf32> -> vector<128x128xf32>
    %42 = arith.addf %34, %41 : vector<128x128xf32>
    %c1_i32_33 = arith.constant 1 : i32
    %43 = arith.addi %1, %c1_i32_33 : i32
    %c0_34 = arith.constant 0 : index
    %44 = arith.index_cast %43 : i32 to index
    %c2_35 = arith.constant 2 : index
    %c0_36 = arith.constant 0 : index
    %45 = vector.load %arg3[%c0_34, %44, %c2_35, %c0_36] : memref<1x18x18x128xbf16, #tpu.memory_space<vmem>>, vector<1x8x16x128xbf16>
    %46 = vector.shape_cast %45 : vector<1x8x16x128xbf16> to vector<128x128xbf16>
    %c5 = arith.constant 5 : index
    %c0_37 = arith.constant 0 : index
    %c0_38 = arith.constant 0 : index
    %47 = vector.load %arg4[%c5, %c0_37, %c0_38] : memref<9x128x128xbf16, #tpu.memory_space<vmem>>, vector<1x128x128xbf16>
    %48 = vector.shape_cast %47 : vector<1x128x128xbf16> to vector<128x128xbf16>
    %cst_39 = arith.constant dense<0.000000e+00> : vector<128x128xf32>
    %49 = tpu.matmul %46, %48, %cst_39 {dimension_numbers = #tpu.dot_dimension_numbers<[1], [0], [0], [1], [0, 0, 1, 1], [], []>} : vector<128x128xbf16>, vector<128x128xbf16>, vector<128x128xf32> -> vector<128x128xf32>
    %50 = arith.addf %42, %49 : vector<128x128xf32>
    %c2_i32 = arith.constant 2 : i32
    %51 = arith.addi %1, %c2_i32 : i32
    %c0_40 = arith.constant 0 : index
    %52 = arith.index_cast %51 : i32 to index
    %c0_41 = arith.constant 0 : index
    %c0_42 = arith.constant 0 : index
    %53 = vector.load %arg3[%c0_40, %52, %c0_41, %c0_42] : memref<1x18x18x128xbf16, #tpu.memory_space<vmem>>, vector<1x8x16x128xbf16>
    %54 = vector.shape_cast %53 : vector<1x8x16x128xbf16> to vector<128x128xbf16>
    %c6 = arith.constant 6 : index
    %c0_43 = arith.constant 0 : index
    %c0_44 = arith.constant 0 : index
    %55 = vector.load %arg4[%c6, %c0_43, %c0_44] : memref<9x128x128xbf16, #tpu.memory_space<vmem>>, vector<1x128x128xbf16>
    %56 = vector.shape_cast %55 : vector<1x128x128xbf16> to vector<128x128xbf16>
    %cst_45 = arith.constant dense<0.000000e+00> : vector<128x128xf32>
    %57 = tpu.matmul %54, %56, %cst_45 {dimension_numbers = #tpu.dot_dimension_numbers<[1], [0], [0], [1], [0, 0, 1, 1], [], []>} : vector<128x128xbf16>, vector<128x128xbf16>, vector<128x128xf32> -> vector<128x128xf32>
    %58 = arith.addf %50, %57 : vector<128x128xf32>
    %c2_i32_46 = arith.constant 2 : i32
    %59 = arith.addi %1, %c2_i32_46 : i32
    %c0_47 = arith.constant 0 : index
    %60 = arith.index_cast %59 : i32 to index
    %c1_48 = arith.constant 1 : index
    %c0_49 = arith.constant 0 : index
    %61 = vector.load %arg3[%c0_47, %60, %c1_48, %c0_49] : memref<1x18x18x128xbf16, #tpu.memory_space<vmem>>, vector<1x8x16x128xbf16>
    %62 = vector.shape_cast %61 : vector<1x8x16x128xbf16> to vector<128x128xbf16>
    %c7 = arith.constant 7 : index
    %c0_50 = arith.constant 0 : index
    %c0_51 = arith.constant 0 : index
    %63 = vector.load %arg4[%c7, %c0_50, %c0_51] : memref<9x128x128xbf16, #tpu.memory_space<vmem>>, vector<1x128x128xbf16>
    %64 = vector.shape_cast %63 : vector<1x128x128xbf16> to vector<128x128xbf16>
    %cst_52 = arith.constant dense<0.000000e+00> : vector<128x128xf32>
    %65 = tpu.matmul %62, %64, %cst_52 {dimension_numbers = #tpu.dot_dimension_numbers<[1], [0], [0], [1], [0, 0, 1, 1], [], []>} : vector<128x128xbf16>, vector<128x128xbf16>, vector<128x128xf32> -> vector<128x128xf32>
    %66 = arith.addf %58, %65 : vector<128x128xf32>
    %c2_i32_53 = arith.constant 2 : i32
    %67 = arith.addi %1, %c2_i32_53 : i32
    %c0_54 = arith.constant 0 : index
    %68 = arith.index_cast %67 : i32 to index
    %c2_55 = arith.constant 2 : index
    %c0_56 = arith.constant 0 : index
    %69 = vector.load %arg3[%c0_54, %68, %c2_55, %c0_56] : memref<1x18x18x128xbf16, #tpu.memory_space<vmem>>, vector<1x8x16x128xbf16>
    %70 = vector.shape_cast %69 : vector<1x8x16x128xbf16> to vector<128x128xbf16>
    %c8 = arith.constant 8 : index
    %c0_57 = arith.constant 0 : index
    %c0_58 = arith.constant 0 : index
    %71 = vector.load %arg4[%c8, %c0_57, %c0_58] : memref<9x128x128xbf16, #tpu.memory_space<vmem>>, vector<1x128x128xbf16>
    %72 = vector.shape_cast %71 : vector<1x128x128xbf16> to vector<128x128xbf16>
    %cst_59 = arith.constant dense<0.000000e+00> : vector<128x128xf32>
    %73 = tpu.matmul %70, %72, %cst_59 {dimension_numbers = #tpu.dot_dimension_numbers<[1], [0], [0], [1], [0, 0, 1, 1], [], []>} : vector<128x128xbf16>, vector<128x128xbf16>, vector<128x128xf32> -> vector<128x128xf32>
    %74 = arith.addf %66, %73 : vector<128x128xf32>
    %c0_60 = arith.constant 0 : index
    %c0_61 = arith.constant 0 : index
    %75 = vector.load %arg5[%c0_60, %c0_61] : memref<1x128xf32, #tpu.memory_space<vmem>>, vector<1x128xf32>
    %76 = vector.broadcast %75 : vector<1x128xf32> to vector<128x128xf32>
    %77 = arith.mulf %74, %76 : vector<128x128xf32>
    %c0_62 = arith.constant 0 : index
    %c0_63 = arith.constant 0 : index
    %78 = vector.load %arg6[%c0_62, %c0_63] : memref<1x128xf32, #tpu.memory_space<vmem>>, vector<1x128xf32>
    %79 = vector.broadcast %78 : vector<1x128xf32> to vector<128x128xf32>
    %80 = arith.addf %77, %79 : vector<128x128xf32>
    %cst_64 = arith.constant 0.000000e+00 : f32
    %81 = vector.broadcast %cst_64 : f32 to vector<128x128xf32>
    %82 = arith.maximumf %80, %81 : vector<128x128xf32>
    %83 = vector.shape_cast %82 : vector<128x128xf32> to vector<1x8x16x128xf32>
    %c0_65 = arith.constant 0 : index
    %c0_66 = arith.constant 0 : index
    %c0_67 = arith.constant 0 : index
    %c0_68 = arith.constant 0 : index
    %84 = vector.load %arg7[%c0_65, %c0_66, %c0_67, %c0_68] : memref<1x8x16x128xf32, #tpu.memory_space<vmem>>, vector<1x8x16x128xf32>
    tpu.vector_store %arg7[%c0_65, %c0_66, %c0_67, %c0_68], %83 {strides = array<i32>} : memref<1x8x16x128xf32, #tpu.memory_space<vmem>>, vector<1x8x16x128xf32>,
    return
  }
  func.func @transform_0(%arg0: i32, %arg1: i32, %arg2: i32) -> (i32, i32, i32, i32) {
    %c0_i32 = arith.constant 0 : i32
    %c0_i32_0 = arith.constant 0 : i32
    %c0_i32_1 = arith.constant 0 : i32
    %c0_i32_2 = arith.constant 0 : i32
    return %arg0, %c0_i32, %c0_i32_0, %c0_i32_1 : i32, i32, i32, i32
  }
  func.func @transform_1(%arg0: i32, %arg1: i32, %arg2: i32) -> (i32, i32, i32) {
    %c0_i32 = arith.constant 0 : i32
    %c0_i32_0 = arith.constant 0 : i32
    %c0_i32_1 = arith.constant 0 : i32
    return %c0_i32, %c0_i32_0, %arg2 : i32, i32, i32
  }
  func.func @transform_2(%arg0: i32, %arg1: i32, %arg2: i32) -> (i32, i32) {
    %c0_i32 = arith.constant 0 : i32
    %c0_i32_0 = arith.constant 0 : i32
    return %c0_i32, %arg2 : i32, i32
  }
  func.func @transform_3(%arg0: i32, %arg1: i32, %arg2: i32) -> (i32, i32) {
    %c0_i32 = arith.constant 0 : i32
    %c0_i32_0 = arith.constant 0 : i32
    return %c0_i32, %arg2 : i32, i32
  }
  func.func @transform_4(%arg0: i32, %arg1: i32, %arg2: i32) -> (i32, i32, i32, i32) {
    %c0_i32 = arith.constant 0 : i32
    %c0_i32_0 = arith.constant 0 : i32
    return %arg0, %arg1, %c0_i32, %arg2 : i32, i32, i32, i32
  }
}

module attributes {stable_mosaic.version = 11 : i64} {
  func.func @kernel(%arg0: i32, %arg1: i32, %arg2: i32, %arg3: memref<1x16x16x128xbf16, #tpu.memory_space<vmem>>, %arg4: memref<1x128x128xbf16, #tpu.memory_space<vmem>>, %arg5: memref<1x128xf32, #tpu.memory_space<vmem>>, %arg6: memref<1x128xf32, #tpu.memory_space<vmem>>, %arg7: memref<1x8x16x128xf32, #tpu.memory_space<vmem>>) attributes {dimension_semantics = [#tpu.dimension_semantics<parallel>, #tpu.dimension_semantics<parallel>, #tpu.dimension_semantics<arbitrary>], iteration_bounds = array<i64: 2, 2, 1>, scalar_prefetch = 0 : i64, scratch_operands = 0 : i64, tpu.core_type = #tpu.core_type<tc>, window_params = [{transform_indices = @transform_0, window_bounds = array<i64: 1, 16, 16, 128>}, {transform_indices = @transform_1, window_bounds = array<i64: 1, 128, 128>}, {transform_indices = @transform_2, window_bounds = array<i64: 1, 128>}, {transform_indices = @transform_3, window_bounds = array<i64: 1, 128>}, {transform_indices = @transform_4, window_bounds = array<i64: 1, 8, 16, 128>}]} {
    %c8_i32 = arith.constant 8 : i32
    %0 = arith.muli %arg1, %c8_i32 : i32
    %1 = tpu.assume_multiple %0, 8 : i32
    %cst = arith.constant 0.000000e+00 : f32
    %2 = vector.broadcast %cst : f32 to vector<128x128xf32>
    %c0_i32 = arith.constant 0 : i32
    %3 = arith.addi %1, %c0_i32 : i32
    %c0 = arith.constant 0 : index
    %4 = arith.index_cast %3 : i32 to index
    %c0_0 = arith.constant 0 : index
    %c0_1 = arith.constant 0 : index
    %5 = vector.load %arg3[%c0, %4, %c0_0, %c0_1] : memref<1x16x16x128xbf16, #tpu.memory_space<vmem>>, vector<1x8x16x128xbf16>
    %6 = vector.shape_cast %5 : vector<1x8x16x128xbf16> to vector<128x128xbf16>
    %c0_2 = arith.constant 0 : index
    %c0_3 = arith.constant 0 : index
    %c0_4 = arith.constant 0 : index
    %7 = vector.load %arg4[%c0_2, %c0_3, %c0_4] : memref<1x128x128xbf16, #tpu.memory_space<vmem>>, vector<1x128x128xbf16>
    %8 = vector.shape_cast %7 : vector<1x128x128xbf16> to vector<128x128xbf16>
    %cst_5 = arith.constant dense<0.000000e+00> : vector<128x128xf32>
    %9 = tpu.matmul %6, %8, %cst_5 {dimension_numbers = #tpu.dot_dimension_numbers<[1], [0], [0], [1], [0, 0, 1, 1], [], []>} : vector<128x128xbf16>, vector<128x128xbf16>, vector<128x128xf32> -> vector<128x128xf32>
    %10 = arith.addf %2, %9 : vector<128x128xf32>
    %c0_6 = arith.constant 0 : index
    %c0_7 = arith.constant 0 : index
    %11 = vector.load %arg5[%c0_6, %c0_7] : memref<1x128xf32, #tpu.memory_space<vmem>>, vector<1x128xf32>
    %12 = vector.broadcast %11 : vector<1x128xf32> to vector<128x128xf32>
    %13 = arith.mulf %10, %12 : vector<128x128xf32>
    %c0_8 = arith.constant 0 : index
    %c0_9 = arith.constant 0 : index
    %14 = vector.load %arg6[%c0_8, %c0_9] : memref<1x128xf32, #tpu.memory_space<vmem>>, vector<1x128xf32>
    %15 = vector.broadcast %14 : vector<1x128xf32> to vector<128x128xf32>
    %16 = arith.addf %13, %15 : vector<128x128xf32>
    %17 = vector.shape_cast %16 : vector<128x128xf32> to vector<1x8x16x128xf32>
    %c0_10 = arith.constant 0 : index
    %c0_11 = arith.constant 0 : index
    %c0_12 = arith.constant 0 : index
    %c0_13 = arith.constant 0 : index
    %18 = vector.load %arg7[%c0_10, %c0_11, %c0_12, %c0_13] : memref<1x8x16x128xf32, #tpu.memory_space<vmem>>, vector<1x8x16x128xf32>
    tpu.vector_store %arg7[%c0_10, %c0_11, %c0_12, %c0_13], %17 {strides = array<i32>} : memref<1x8x16x128xf32, #tpu.memory_space<vmem>>, vector<1x8x16x128xf32>,
    return
  }
  func.func @transform_0(%arg0: i32, %arg1: i32, %arg2: i32) -> (i32, i32, i32, i32) {
    %c0_i32 = arith.constant 0 : i32
    %c0_i32_0 = arith.constant 0 : i32
    %c0_i32_1 = arith.constant 0 : i32
    %c0_i32_2 = arith.constant 0 : i32
    return %arg0, %c0_i32, %c0_i32_0, %c0_i32_1 : i32, i32, i32, i32
  }
  func.func @transform_1(%arg0: i32, %arg1: i32, %arg2: i32) -> (i32, i32, i32) {
    %c0_i32 = arith.constant 0 : i32
    %c0_i32_0 = arith.constant 0 : i32
    %c0_i32_1 = arith.constant 0 : i32
    return %c0_i32, %c0_i32_0, %arg2 : i32, i32, i32
  }
  func.func @transform_2(%arg0: i32, %arg1: i32, %arg2: i32) -> (i32, i32) {
    %c0_i32 = arith.constant 0 : i32
    %c0_i32_0 = arith.constant 0 : i32
    return %c0_i32, %arg2 : i32, i32
  }
  func.func @transform_3(%arg0: i32, %arg1: i32, %arg2: i32) -> (i32, i32) {
    %c0_i32 = arith.constant 0 : i32
    %c0_i32_0 = arith.constant 0 : i32
    return %c0_i32, %arg2 : i32, i32
  }
  func.func @transform_4(%arg0: i32, %arg1: i32, %arg2: i32) -> (i32, i32, i32, i32) {
    %c0_i32 = arith.constant 0 : i32
    %c0_i32_0 = arith.constant 0 : i32
    return %arg0, %arg1, %c0_i32, %arg2 : i32, i32, i32, i32
  }
}

module attributes {stable_mosaic.version = 11 : i64} {
  func.func @kernel(%arg0: i32, %arg1: i32, %arg2: i32, %arg3: memref<1x18x18x128xbf16, #tpu.memory_space<vmem>>, %arg4: memref<9x128x128xbf16, #tpu.memory_space<vmem>>, %arg5: memref<1x128xf32, #tpu.memory_space<vmem>>, %arg6: memref<1x128xf32, #tpu.memory_space<vmem>>, %arg7: memref<1x8x16x128xf32, #tpu.memory_space<vmem>>, %arg8: memref<1x8x16x128xf32, #tpu.memory_space<vmem>>) attributes {dimension_semantics = [#tpu.dimension_semantics<parallel>, #tpu.dimension_semantics<parallel>, #tpu.dimension_semantics<arbitrary>], iteration_bounds = array<i64: 2, 2, 1>, scalar_prefetch = 0 : i64, scratch_operands = 0 : i64, tpu.core_type = #tpu.core_type<tc>, window_params = [{transform_indices = @transform_0, window_bounds = array<i64: 1, 18, 18, 128>}, {transform_indices = @transform_1, window_bounds = array<i64: 9, 128, 128>}, {transform_indices = @transform_2, window_bounds = array<i64: 1, 128>}, {transform_indices = @transform_3, window_bounds = array<i64: 1, 128>}, {transform_indices = @transform_4, window_bounds = array<i64: 1, 8, 16, 128>}, {transform_indices = @transform_5, window_bounds = array<i64: 1, 8, 16, 128>}]} {
    %c8_i32 = arith.constant 8 : i32
    %0 = arith.muli %arg1, %c8_i32 : i32
    %1 = tpu.assume_multiple %0, 8 : i32
    %cst = arith.constant 0.000000e+00 : f32
    %2 = vector.broadcast %cst : f32 to vector<128x128xf32>
    %c0_i32 = arith.constant 0 : i32
    %3 = arith.addi %1, %c0_i32 : i32
    %c0 = arith.constant 0 : index
    %4 = arith.index_cast %3 : i32 to index
    %c0_0 = arith.constant 0 : index
    %c0_1 = arith.constant 0 : index
    %5 = vector.load %arg3[%c0, %4, %c0_0, %c0_1] : memref<1x18x18x128xbf16, #tpu.memory_space<vmem>>, vector<1x8x16x128xbf16>
    %6 = vector.shape_cast %5 : vector<1x8x16x128xbf16> to vector<128x128xbf16>
    %c0_2 = arith.constant 0 : index
    %c0_3 = arith.constant 0 : index
    %c0_4 = arith.constant 0 : index
    %7 = vector.load %arg4[%c0_2, %c0_3, %c0_4] : memref<9x128x128xbf16, #tpu.memory_space<vmem>>, vector<1x128x128xbf16>
    %8 = vector.shape_cast %7 : vector<1x128x128xbf16> to vector<128x128xbf16>
    %cst_5 = arith.constant dense<0.000000e+00> : vector<128x128xf32>
    %9 = tpu.matmul %6, %8, %cst_5 {dimension_numbers = #tpu.dot_dimension_numbers<[1], [0], [0], [1], [0, 0, 1, 1], [], []>} : vector<128x128xbf16>, vector<128x128xbf16>, vector<128x128xf32> -> vector<128x128xf32>
    %10 = arith.addf %2, %9 : vector<128x128xf32>
    %c0_i32_6 = arith.constant 0 : i32
    %11 = arith.addi %1, %c0_i32_6 : i32
    %c0_7 = arith.constant 0 : index
    %12 = arith.index_cast %11 : i32 to index
    %c1 = arith.constant 1 : index
    %c0_8 = arith.constant 0 : index
    %13 = vector.load %arg3[%c0_7, %12, %c1, %c0_8] : memref<1x18x18x128xbf16, #tpu.memory_space<vmem>>, vector<1x8x16x128xbf16>
    %14 = vector.shape_cast %13 : vector<1x8x16x128xbf16> to vector<128x128xbf16>
    %c1_9 = arith.constant 1 : index
    %c0_10 = arith.constant 0 : index
    %c0_11 = arith.constant 0 : index
    %15 = vector.load %arg4[%c1_9, %c0_10, %c0_11] : memref<9x128x128xbf16, #tpu.memory_space<vmem>>, vector<1x128x128xbf16>
    %16 = vector.shape_cast %15 : vector<1x128x128xbf16> to vector<128x128xbf16>
    %cst_12 = arith.constant dense<0.000000e+00> : vector<128x128xf32>
    %17 = tpu.matmul %14, %16, %cst_12 {dimension_numbers = #tpu.dot_dimension_numbers<[1], [0], [0], [1], [0, 0, 1, 1], [], []>} : vector<128x128xbf16>, vector<128x128xbf16>, vector<128x128xf32> -> vector<128x128xf32>
    %18 = arith.addf %10, %17 : vector<128x128xf32>
    %c0_i32_13 = arith.constant 0 : i32
    %19 = arith.addi %1, %c0_i32_13 : i32
    %c0_14 = arith.constant 0 : index
    %20 = arith.index_cast %19 : i32 to index
    %c2 = arith.constant 2 : index
    %c0_15 = arith.constant 0 : index
    %21 = vector.load %arg3[%c0_14, %20, %c2, %c0_15] : memref<1x18x18x128xbf16, #tpu.memory_space<vmem>>, vector<1x8x16x128xbf16>
    %22 = vector.shape_cast %21 : vector<1x8x16x128xbf16> to vector<128x128xbf16>
    %c2_16 = arith.constant 2 : index
    %c0_17 = arith.constant 0 : index
    %c0_18 = arith.constant 0 : index
    %23 = vector.load %arg4[%c2_16, %c0_17, %c0_18] : memref<9x128x128xbf16, #tpu.memory_space<vmem>>, vector<1x128x128xbf16>
    %24 = vector.shape_cast %23 : vector<1x128x128xbf16> to vector<128x128xbf16>
    %cst_19 = arith.constant dense<0.000000e+00> : vector<128x128xf32>
    %25 = tpu.matmul %22, %24, %cst_19 {dimension_numbers = #tpu.dot_dimension_numbers<[1], [0], [0], [1], [0, 0, 1, 1], [], []>} : vector<128x128xbf16>, vector<128x128xbf16>, vector<128x128xf32> -> vector<128x128xf32>
    %26 = arith.addf %18, %25 : vector<128x128xf32>
    %c1_i32 = arith.constant 1 : i32
    %27 = arith.addi %1, %c1_i32 : i32
    %c0_20 = arith.constant 0 : index
    %28 = arith.index_cast %27 : i32 to index
    %c0_21 = arith.constant 0 : index
    %c0_22 = arith.constant 0 : index
    %29 = vector.load %arg3[%c0_20, %28, %c0_21, %c0_22] : memref<1x18x18x128xbf16, #tpu.memory_space<vmem>>, vector<1x8x16x128xbf16>
    %30 = vector.shape_cast %29 : vector<1x8x16x128xbf16> to vector<128x128xbf16>
    %c3 = arith.constant 3 : index
    %c0_23 = arith.constant 0 : index
    %c0_24 = arith.constant 0 : index
    %31 = vector.load %arg4[%c3, %c0_23, %c0_24] : memref<9x128x128xbf16, #tpu.memory_space<vmem>>, vector<1x128x128xbf16>
    %32 = vector.shape_cast %31 : vector<1x128x128xbf16> to vector<128x128xbf16>
    %cst_25 = arith.constant dense<0.000000e+00> : vector<128x128xf32>
    %33 = tpu.matmul %30, %32, %cst_25 {dimension_numbers = #tpu.dot_dimension_numbers<[1], [0], [0], [1], [0, 0, 1, 1], [], []>} : vector<128x128xbf16>, vector<128x128xbf16>, vector<128x128xf32> -> vector<128x128xf32>
    %34 = arith.addf %26, %33 : vector<128x128xf32>
    %c1_i32_26 = arith.constant 1 : i32
    %35 = arith.addi %1, %c1_i32_26 : i32
    %c0_27 = arith.constant 0 : index
    %36 = arith.index_cast %35 : i32 to index
    %c1_28 = arith.constant 1 : index
    %c0_29 = arith.constant 0 : index
    %37 = vector.load %arg3[%c0_27, %36, %c1_28, %c0_29] : memref<1x18x18x128xbf16, #tpu.memory_space<vmem>>, vector<1x8x16x128xbf16>
    %38 = vector.shape_cast %37 : vector<1x8x16x128xbf16> to vector<128x128xbf16>
    %c4 = arith.constant 4 : index
    %c0_30 = arith.constant 0 : index
    %c0_31 = arith.constant 0 : index
    %39 = vector.load %arg4[%c4, %c0_30, %c0_31] : memref<9x128x128xbf16, #tpu.memory_space<vmem>>, vector<1x128x128xbf16>
    %40 = vector.shape_cast %39 : vector<1x128x128xbf16> to vector<128x128xbf16>
    %cst_32 = arith.constant dense<0.000000e+00> : vector<128x128xf32>
    %41 = tpu.matmul %38, %40, %cst_32 {dimension_numbers = #tpu.dot_dimension_numbers<[1], [0], [0], [1], [0, 0, 1, 1], [], []>} : vector<128x128xbf16>, vector<128x128xbf16>, vector<128x128xf32> -> vector<128x128xf32>
    %42 = arith.addf %34, %41 : vector<128x128xf32>
    %c1_i32_33 = arith.constant 1 : i32
    %43 = arith.addi %1, %c1_i32_33 : i32
    %c0_34 = arith.constant 0 : index
    %44 = arith.index_cast %43 : i32 to index
    %c2_35 = arith.constant 2 : index
    %c0_36 = arith.constant 0 : index
    %45 = vector.load %arg3[%c0_34, %44, %c2_35, %c0_36] : memref<1x18x18x128xbf16, #tpu.memory_space<vmem>>, vector<1x8x16x128xbf16>
    %46 = vector.shape_cast %45 : vector<1x8x16x128xbf16> to vector<128x128xbf16>
    %c5 = arith.constant 5 : index
    %c0_37 = arith.constant 0 : index
    %c0_38 = arith.constant 0 : index
    %47 = vector.load %arg4[%c5, %c0_37, %c0_38] : memref<9x128x128xbf16, #tpu.memory_space<vmem>>, vector<1x128x128xbf16>
    %48 = vector.shape_cast %47 : vector<1x128x128xbf16> to vector<128x128xbf16>
    %cst_39 = arith.constant dense<0.000000e+00> : vector<128x128xf32>
    %49 = tpu.matmul %46, %48, %cst_39 {dimension_numbers = #tpu.dot_dimension_numbers<[1], [0], [0], [1], [0, 0, 1, 1], [], []>} : vector<128x128xbf16>, vector<128x128xbf16>, vector<128x128xf32> -> vector<128x128xf32>
    %50 = arith.addf %42, %49 : vector<128x128xf32>
    %c2_i32 = arith.constant 2 : i32
    %51 = arith.addi %1, %c2_i32 : i32
    %c0_40 = arith.constant 0 : index
    %52 = arith.index_cast %51 : i32 to index
    %c0_41 = arith.constant 0 : index
    %c0_42 = arith.constant 0 : index
    %53 = vector.load %arg3[%c0_40, %52, %c0_41, %c0_42] : memref<1x18x18x128xbf16, #tpu.memory_space<vmem>>, vector<1x8x16x128xbf16>
    %54 = vector.shape_cast %53 : vector<1x8x16x128xbf16> to vector<128x128xbf16>
    %c6 = arith.constant 6 : index
    %c0_43 = arith.constant 0 : index
    %c0_44 = arith.constant 0 : index
    %55 = vector.load %arg4[%c6, %c0_43, %c0_44] : memref<9x128x128xbf16, #tpu.memory_space<vmem>>, vector<1x128x128xbf16>
    %56 = vector.shape_cast %55 : vector<1x128x128xbf16> to vector<128x128xbf16>
    %cst_45 = arith.constant dense<0.000000e+00> : vector<128x128xf32>
    %57 = tpu.matmul %54, %56, %cst_45 {dimension_numbers = #tpu.dot_dimension_numbers<[1], [0], [0], [1], [0, 0, 1, 1], [], []>} : vector<128x128xbf16>, vector<128x128xbf16>, vector<128x128xf32> -> vector<128x128xf32>
    %58 = arith.addf %50, %57 : vector<128x128xf32>
    %c2_i32_46 = arith.constant 2 : i32
    %59 = arith.addi %1, %c2_i32_46 : i32
    %c0_47 = arith.constant 0 : index
    %60 = arith.index_cast %59 : i32 to index
    %c1_48 = arith.constant 1 : index
    %c0_49 = arith.constant 0 : index
    %61 = vector.load %arg3[%c0_47, %60, %c1_48, %c0_49] : memref<1x18x18x128xbf16, #tpu.memory_space<vmem>>, vector<1x8x16x128xbf16>
    %62 = vector.shape_cast %61 : vector<1x8x16x128xbf16> to vector<128x128xbf16>
    %c7 = arith.constant 7 : index
    %c0_50 = arith.constant 0 : index
    %c0_51 = arith.constant 0 : index
    %63 = vector.load %arg4[%c7, %c0_50, %c0_51] : memref<9x128x128xbf16, #tpu.memory_space<vmem>>, vector<1x128x128xbf16>
    %64 = vector.shape_cast %63 : vector<1x128x128xbf16> to vector<128x128xbf16>
    %cst_52 = arith.constant dense<0.000000e+00> : vector<128x128xf32>
    %65 = tpu.matmul %62, %64, %cst_52 {dimension_numbers = #tpu.dot_dimension_numbers<[1], [0], [0], [1], [0, 0, 1, 1], [], []>} : vector<128x128xbf16>, vector<128x128xbf16>, vector<128x128xf32> -> vector<128x128xf32>
    %66 = arith.addf %58, %65 : vector<128x128xf32>
    %c2_i32_53 = arith.constant 2 : i32
    %67 = arith.addi %1, %c2_i32_53 : i32
    %c0_54 = arith.constant 0 : index
    %68 = arith.index_cast %67 : i32 to index
    %c2_55 = arith.constant 2 : index
    %c0_56 = arith.constant 0 : index
    %69 = vector.load %arg3[%c0_54, %68, %c2_55, %c0_56] : memref<1x18x18x128xbf16, #tpu.memory_space<vmem>>, vector<1x8x16x128xbf16>
    %70 = vector.shape_cast %69 : vector<1x8x16x128xbf16> to vector<128x128xbf16>
    %c8 = arith.constant 8 : index
    %c0_57 = arith.constant 0 : index
    %c0_58 = arith.constant 0 : index
    %71 = vector.load %arg4[%c8, %c0_57, %c0_58] : memref<9x128x128xbf16, #tpu.memory_space<vmem>>, vector<1x128x128xbf16>
    %72 = vector.shape_cast %71 : vector<1x128x128xbf16> to vector<128x128xbf16>
    %cst_59 = arith.constant dense<0.000000e+00> : vector<128x128xf32>
    %73 = tpu.matmul %70, %72, %cst_59 {dimension_numbers = #tpu.dot_dimension_numbers<[1], [0], [0], [1], [0, 0, 1, 1], [], []>} : vector<128x128xbf16>, vector<128x128xbf16>, vector<128x128xf32> -> vector<128x128xf32>
    %74 = arith.addf %66, %73 : vector<128x128xf32>
    %c0_60 = arith.constant 0 : index
    %c0_61 = arith.constant 0 : index
    %75 = vector.load %arg5[%c0_60, %c0_61] : memref<1x128xf32, #tpu.memory_space<vmem>>, vector<1x128xf32>
    %76 = vector.broadcast %75 : vector<1x128xf32> to vector<128x128xf32>
    %77 = arith.mulf %74, %76 : vector<128x128xf32>
    %c0_62 = arith.constant 0 : index
    %c0_63 = arith.constant 0 : index
    %78 = vector.load %arg6[%c0_62, %c0_63] : memref<1x128xf32, #tpu.memory_space<vmem>>, vector<1x128xf32>
    %79 = vector.broadcast %78 : vector<1x128xf32> to vector<128x128xf32>
    %80 = arith.addf %77, %79 : vector<128x128xf32>
    %c0_64 = arith.constant 0 : index
    %c0_65 = arith.constant 0 : index
    %c0_66 = arith.constant 0 : index
    %c0_67 = arith.constant 0 : index
    %81 = vector.load %arg7[%c0_64, %c0_65, %c0_66, %c0_67] : memref<1x8x16x128xf32, #tpu.memory_space<vmem>>, vector<1x8x16x128xf32>
    %82 = vector.shape_cast %81 : vector<1x8x16x128xf32> to vector<128x128xf32>
    %83 = arith.addf %80, %82 : vector<128x128xf32>
    %cst_68 = arith.constant 0.000000e+00 : f32
    %84 = vector.broadcast %cst_68 : f32 to vector<128x128xf32>
    %85 = arith.maximumf %83, %84 : vector<128x128xf32>
    %86 = vector.shape_cast %85 : vector<128x128xf32> to vector<1x8x16x128xf32>
    %c0_69 = arith.constant 0 : index
    %c0_70 = arith.constant 0 : index
    %c0_71 = arith.constant 0 : index
    %c0_72 = arith.constant 0 : index
    %87 = vector.load %arg8[%c0_69, %c0_70, %c0_71, %c0_72] : memref<1x8x16x128xf32, #tpu.memory_space<vmem>>, vector<1x8x16x128xf32>
    tpu.vector_store %arg8[%c0_69, %c0_70, %c0_71, %c0_72], %86 {strides = array<i32>} : memref<1x8x16x128xf32, #tpu.memory_space<vmem>>, vector<1x8x16x128xf32>,
    return
  }
  func.func @transform_0(%arg0: i32, %arg1: i32, %arg2: i32) -> (i32, i32, i32, i32) {
    %c0_i32 = arith.constant 0 : i32
    %c0_i32_0 = arith.constant 0 : i32
    %c0_i32_1 = arith.constant 0 : i32
    %c0_i32_2 = arith.constant 0 : i32
    return %arg0, %c0_i32, %c0_i32_0, %c0_i32_1 : i32, i32, i32, i32
  }
  func.func @transform_1(%arg0: i32, %arg1: i32, %arg2: i32) -> (i32, i32, i32) {
    %c0_i32 = arith.constant 0 : i32
    %c0_i32_0 = arith.constant 0 : i32
    %c0_i32_1 = arith.constant 0 : i32
    return %c0_i32, %c0_i32_0, %arg2 : i32, i32, i32
  }
  func.func @transform_2(%arg0: i32, %arg1: i32, %arg2: i32) -> (i32, i32) {
    %c0_i32 = arith.constant 0 : i32
    %c0_i32_0 = arith.constant 0 : i32
    return %c0_i32, %arg2 : i32, i32
  }
  func.func @transform_3(%arg0: i32, %arg1: i32, %arg2: i32) -> (i32, i32) {
    %c0_i32 = arith.constant 0 : i32
    %c0_i32_0 = arith.constant 0 : i32
    return %c0_i32, %arg2 : i32, i32
  }
  func.func @transform_4(%arg0: i32, %arg1: i32, %arg2: i32) -> (i32, i32, i32, i32) {
    %c0_i32 = arith.constant 0 : i32
    %c0_i32_0 = arith.constant 0 : i32
    return %arg0, %arg1, %c0_i32, %arg2 : i32, i32, i32, i32
  }
  func.func @transform_5(%arg0: i32, %arg1: i32, %arg2: i32) -> (i32, i32, i32, i32) {
    %c0_i32 = arith.constant 0 : i32
    %c0_i32_0 = arith.constant 0 : i32
    return %arg0, %arg1, %c0_i32, %arg2 : i32, i32, i32, i32
  }
}

</mosaic_0001>

<bundles_post_ra>
// kernel: residual_block_forward.4
= control target key start
LH: loop header
LB: loop body
LE: loop exit
PB: predicated region body
PF: predicated region fallthrough
CT: control target
= control target key end

     0   :  { %s944_s15 = smov 0   ;;  %s946_s16 = smov 0   ;;  %s1061_s0 = inlined_call_operand.vmem [shape: bf16[2,16,16,128], index: 0, kind: input, shape index: {}]   ;;  %s1062_s1 = inlined_call_operand.vmem [shape: bf16[1,128,128], index: 1, kind: input, shape index: {}]   ;;  %s1063_s2 = inlined_call_operand.vmem [shape: f32[1,128], index: 2, kind: input, shape index: {}]   ;;  %s1064_s3 = inlined_call_operand.vmem [shape: f32[1,128], index: 3, kind: input, shape index: {}]   ;;  %s1065_s4 = inlined_call_operand.vmem [shape: f32[2,16,16,128], index: 4, kind: output, shape index: {}]  }
   0x1   :  { %s948_s17 = smov 0   ;;  %s950_s18 = smov 0  }
   0x2   :  { %s952_s19 = smov 0  }
   0x3 LB: > { %s29_s20 = sadd.s32 1, %s909_s17  ;;  %s33_s21 = sadd.s32 1, %s913_s18  ;;  %s917_s19 = sphi %s952_s19, %s14_s19   ;;  %s913_s18 = sphi %s950_s18, %s1069_s18   ;;  %s909_s17 = sphi %s948_s17, %s1068_s17   ;;  %s905_s16 = sphi %s946_s16, %s1067_s16   ;;  %s901_s15 = sphi %s944_s15, %s1066_s15  }
   0x4   : > { %p31_p0 = scmp.ge.s32.totalorder %s29_s20, 2  ;;  %p726_p1 = scmp.ge.s32.totalorder %s917_s19, 1 }
   0x5   : > { %p210_p2 = scmp.lt.s32.totalorder %s917_s19, 5 }
   0x6   : > { %s1071_s20 = smov (%p31_p0, %s29_s20), 0  ;;  %s1073_s21 = smov (!%p31_p0, %s33_s21), %s913_s18 }
   0x7   : > { %p211_p3 = pnand %p726_p1, %p210_p2  ;;  %p35_p4 = scmp.ge.s32.totalorder %s1073_s21, 2 }
   0x8   : > { %v863_v0 = vld [vmem:[%s1062_s1] sm:$0xff] (!%p211_p3)   ;;  %p254_p5 = scmp.lt.s32.totalorder (!%p211_p3), %s905_s16, 1  ;;  %v864_v1 = vld [vmem:[%s1062_s1 + $0x8] sm:$0xff] (!%p211_p3)   ;;  %s758_s26 = sshll.u32 (!%p211_p3), %s901_s15, 6  ;;  %v865_v2 = vld [vmem:[%s1062_s1 + $0x10] sm:$0xff] (!%p211_p3)  }
   0x9   : > { %s1075_s21 = smov (%p35_p4, %s1073_s21), 0  ;;  %214 = sbr.rel (%p211_p3) target bundleno = 270 (0x10e), region = 36 }
   0xa   : > { %775 = vmatprep.subr.bf16.mxu0 (!%p211_p3), %v863_v0  ;;  %807 = vmatprep.subr.bf16.mxu1 (!%p211_p3), %v863_v0  ;;  %v866_v3 = vld [vmem:[%s1062_s1 + $0x18] sm:$0xff] (!%p211_p3)   ;;  %v867_v6 = vld [vmem:[%s1062_s1 + $0x20] sm:$0xff] (!%p211_p3)   ;;  %v868_v7 = vld [vmem:[%s1062_s1 + $0x28] sm:$0xff] (!%p211_p3)   ;;  %s729_s25 = sshll.u32 (!%p211_p3), %s901_s15, 3 }
   0xb   : > { %776 = vmatpush3.bf16.msra.mxu0 (!%p211_p3), %v863_v0  ;;  %815 = vmatpush3.bf16.msra.mxu1 (!%p211_p3), %v863_v0  ;;  %v869_v8 = vld [vmem:[%s1062_s1 + $0x30] sm:$0xff] (!%p211_p3)   ;;  %v870_v9 = vld [vmem:[%s1062_s1 + $0x38] sm:$0xff] (!%p211_p3)   ;;  %p272_p6 = scmp.lt.s32.totalorder (!%p211_p3), %s729_s25, 15  ;;  %v752_v16 = vld [vmem:[%s1063_s2] ss:$0 sm:$0xff] (!%p211_p3) }
   0xc   : > { %777 = vmatprep.subr.bf16.mxu0 (!%p211_p3), %v864_v1  ;;  %808 = vmatprep.subr.bf16.mxu1 (!%p211_p3), %v864_v1  ;;  %v753_v18 = vld [vmem:[%s1064_s3] ss:$0 sm:$0xff] (!%p211_p3) }
   0xf   : > { %778 = vmatpush3.bf16.msra.mxu0 (!%p211_p3), %v864_v1  ;;  %816 = vmatpush3.bf16.msra.mxu1 (!%p211_p3), %v864_v1 }
  0x10   : > { %s1077_s16 = smov (!%p254_p5, %s905_s16), 1  ;;  %779 = vmatprep.subr.bf16.mxu0 %v865_v2  ;;  %809 = vmatprep.subr.bf16.mxu1 %v865_v2  ;;  %s1079_s25 = smov (!%p272_p6, %s729_s25), 15 }
  0x11   : > { %s756_s29 = sshll.u32 %s1077_s16, 7  ;;  %s731_s27 = sshll.u32 %s1077_s16, 5 }
  0x12   : > { %s258_s6 = scalar_lea.vmem %s1061_s0, %s756_s29 }
  0x13   : > { %s992_s7 = scalar_lea.vmem %s258_s6, %s758_s26  ;;  %780 = vmatpush3.bf16.msra.mxu0 %v865_v2  ;;  %817 = vmatpush3.bf16.msra.mxu1 %v865_v2  ;;  %s730_s26 = sshll.u32 %s1079_s25, 1 }
  0x14   : > { %v871_v4 = vld [vmem:[%s992_s7] sm:$0xff]   ;;  %781 = vmatprep.subr.bf16.mxu0 %v866_v3  ;;  %810 = vmatprep.subr.bf16.mxu1 %v866_v3  ;;  %v873_v10 = vld [vmem:[%s992_s7 + $0x8] sm:$0xff]   ;;  %v875_v12 = vld [vmem:[%s992_s7 + $0x10] sm:$0xff]   ;;  %s279_s28 = sadd.s32 %s731_s27, %s730_s26 }
  0x15   : > { %v872_v5 = vld [vmem:[%s992_s7 + $0x20] sm:$0xff]   ;;  %791 = vmatprep.mubr.bf16.mxu0 %v871_v4  ;;  %v874_v11 = vld [vmem:[%s992_s7 + $0x28] sm:$0xff]   ;;  %v876_v13 = vld [vmem:[%s992_s7 + $0x30] sm:$0xff]   ;;  %s732_s5 = sshll.u32 %s279_s28, 3 }
  0x16   : > { %799 = vmatprep.mubr.bf16.mxu1 %v872_v5  ;;  %v877_v14 = vld [vmem:[%s992_s7 + $0x18] sm:$0xff]   ;;  %s1028_s16 = scalar_lea.vmem %s1065_s4, %s732_s5 }
  0x17   : > { %782 = vmatpush3.bf16.msra.mxu0 %v866_v3  ;;  %818 = vmatpush3.bf16.msra.mxu1 %v866_v3  ;;  %v878_v15 = vld [vmem:[%s992_s7 + $0x38] sm:$0xff]  }
  0x18   : > { %783 = vmatprep.subr.bf16.mxu0 %v867_v6  ;;  %811 = vmatprep.subr.bf16.mxu1 %v867_v6 }
  0x1b   : > { %784 = vmatpush3.bf16.msra.mxu0 %v867_v6  ;;  %819 = vmatpush3.bf16.msra.mxu1 %v867_v6 }
  0x1c   : > { %785 = vmatprep.subr.bf16.mxu0 %v868_v7  ;;  %812 = vmatprep.subr.bf16.mxu1 %v868_v7 }
  0x1f   : > { %786 = vmatpush3.bf16.msra.mxu0 %v868_v7  ;;  %820 = vmatpush3.bf16.msra.mxu1 %v868_v7 }
  0x20   : > { %787 = vmatprep.subr.bf16.mxu0 %v869_v8  ;;  %813 = vmatprep.subr.bf16.mxu1 %v869_v8 }
  0x23   : > { %788 = vmatpush3.bf16.msra.mxu0 %v869_v8  ;;  %821 = vmatpush3.bf16.msra.mxu1 %v869_v8 }
  0x24   : > { %789 = vmatprep.subr.bf16.mxu0 %v870_v9  ;;  %814 = vmatprep.subr.bf16.mxu1 %v870_v9 }
  0x27   : > { %790 = vmatpush3.bf16.msra.mxu0 %v870_v9  ;;  %822 = vmatpush3.bf16.msra.mxu1 %v870_v9 }
  0x2a   : > { %792 = vmatmul.mubr.bf16.vlgmr.msra.gmra.mrb[0].mxu0 %v873_v10  ;;  %800 = vmatmul.mubr.bf16.vlgmr.msra.gmra.mrb[0].mxu1 %v874_v11 }
  0x2b   : > { %795 = vmatprep.mubr.bf16.mxu0 %v875_v12  ;;  %803 = vmatprep.mubr.bf16.mxu1 %v876_v13 }
  0x32   : > { %796 = vmatmul.mubr.bf16.gmra.mrb[4].mxu0 %v877_v14  ;;  %804 = vmatmul.mubr.bf16.gmra.mrb[4].mxu1 %v878_v15 }
  0xfd   : > { %v793_v17 = vpop.f32.mrb[0].mxu0  ;;  %v801_v19 = vpop.f32.mrb[0].mxu1 }
  0xfe   : > { %v522_v20 = vmul.f32 %v793_v17, %v752_v16  ;;  %v530_v21 = vmul.f32 %v801_v19, %v752_v16  ;;  %v450_v22 = vpop.f32.mrb[1].mxu0  ;;  %v482_v23 = vpop.f32.mrb[1].mxu1 }
  0xff   : > { %v520_v24 = vmul.f32 %v752_v16, %v450_v22  ;;  %v528_v25 = vmul.f32 %v752_v16, %v482_v23  ;;  %v794_v26 = vpop.f32.mrb[2].mxu0  ;;  %v802_v27 = vpop.f32.mrb[2].mxu1 }
 0x100   : > { %v545_v28 = vadd.f32 %v753_v18, %v522_v20  ;;  %v553_v29 = vadd.f32 %v753_v18, %v530_v21  ;;  %v523_v30 = vmul.f32 %v794_v26, %v752_v16  ;;  %v531_v31 = vmul.f32 %v802_v27, %v752_v16  ;;  %v453_v32 = vpop.f32.mrb[3].mxu0  ;;  %v485_v33 = vpop.f32.mrb[3].mxu1 }
 0x101   : > { %v543_v34 = vadd.f32 %v753_v18, %v520_v24  ;;  %v551_v35 = vadd.f32 %v753_v18, %v528_v25  ;;  %v521_v36 = vmul.f32 %v752_v16, %v453_v32  ;;  %v529_v37 = vmul.f32 %v752_v16, %v485_v33 }
 0x102   : > { %561 = vst [vmem:[%s1028_s16 + $0x10] sm:$0xff] %v545_v28  ;;  %569 = vst [vmem:[%s1028_s16 + $0x50] sm:$0xff] %v553_v29  ;;  %v546_v38 = vadd.f32 %v753_v18, %v523_v30  ;;  %v554_v39 = vadd.f32 %v753_v18, %v531_v31 }
 0x103   : > { %559 = vst [vmem:[%s1028_s16] sm:$0xff] %v543_v34  ;;  %567 = vst [vmem:[%s1028_s16 + $0x40] sm:$0xff] %v551_v35  ;;  %v544_v40 = vadd.f32 %v753_v18, %v521_v36  ;;  %v552_v41 = vadd.f32 %v753_v18, %v529_v37 }
 0x104   : > { %562 = vst [vmem:[%s1028_s16 + $0x18] sm:$0xff] %v546_v38  ;;  %570 = vst [vmem:[%s1028_s16 + $0x58] sm:$0xff] %v554_v39 }
 0x105   : > { %560 = vst [vmem:[%s1028_s16 + $0x8] sm:$0xff] %v544_v40  ;;  %568 = vst [vmem:[%s1028_s16 + $0x48] sm:$0xff] %v552_v41  ;;  %v797_v42 = vpop.f32.mrb[4].mxu0  ;;  %v805_v43 = vpop.f32.mrb[4].mxu1 }
 0x106   : > { %v526_v44 = vmul.f32 %v797_v42, %v752_v16  ;;  %v534_v45 = vmul.f32 %v805_v43, %v752_v16  ;;  %v466_v46 = vpop.f32.mrb[5].mxu0  ;;  %v498_v47 = vpop.f32.mrb[5].mxu1 }
 0x107   : > { %v524_v48 = vmul.f32 %v752_v16, %v466_v46  ;;  %v532_v49 = vmul.f32 %v752_v16, %v498_v47  ;;  %v798_v50 = vpop.f32.mrb[6].mxu0  ;;  %v806_v51 = vpop.f32.mrb[6].mxu1 }
 0x108   : > { %v549_v52 = vadd.f32 %v753_v18, %v526_v44  ;;  %v557_v53 = vadd.f32 %v753_v18, %v534_v45  ;;  %v527_v54 = vmul.f32 %v798_v50, %v752_v16  ;;  %v535_v55 = vmul.f32 %v806_v51, %v752_v16  ;;  %v469_v56 = vpop.f32.mrb[7].mxu0  ;;  %v501_v57 = vpop.f32.mrb[7].mxu1 }
 0x109   : > { %v547_v58 = vadd.f32 %v753_v18, %v524_v48  ;;  %v555_v59 = vadd.f32 %v753_v18, %v532_v49  ;;  %v525_v60 = vmul.f32 %v752_v16, %v469_v56  ;;  %v533_v61 = vmul.f32 %v752_v16, %v501_v57 }
 0x10a   : > { %565 = vst [vmem:[%s1028_s16 + $0x30] sm:$0xff] %v549_v52  ;;  %573 = vst [vmem:[%s1028_s16 + $0x70] sm:$0xff] %v557_v53  ;;  %v550_v62 = vadd.f32 %v753_v18, %v527_v54  ;;  %v558_v63 = vadd.f32 %v753_v18, %v535_v55 }
 0x10b   : > { %563 = vst [vmem:[%s1028_s16 + $0x20] sm:$0xff] %v547_v58  ;;  %571 = vst [vmem:[%s1028_s16 + $0x60] sm:$0xff] %v555_v59  ;;  %v548_v0 = vadd.f32 %v753_v18, %v525_v60  ;;  %v556_v1 = vadd.f32 %v753_v18, %v533_v61 }
 0x10c   : > { %566 = vst [vmem:[%s1028_s16 + $0x38] sm:$0xff] %v550_v62  ;;  %574 = vst [vmem:[%s1028_s16 + $0x78] sm:$0xff] %v558_v63 }
 0x10d   : > { %564 = vst [vmem:[%s1028_s16 + $0x28] sm:$0xff] %v548_v0  ;;  %572 = vst [vmem:[%s1028_s16 + $0x68] sm:$0xff] %v556_v1 }
 0x10e PF: > { %s14_s19 = sadd.s32 1, %s917_s19   ;;  %s1066_s15 = smov %s909_s17 }
 0x10f   : > { %p11_p7 = scmp.ge.s32.totalorder %s14_s19, 6   ;;  %s1067_s16 = smov %s913_s18 }
 0x110   : > { %s1068_s17 = smov %s1071_s20  ;;  %s1069_s18 = smov %s1075_s21 }
 0x111   :  { %13 = sbr.rel (!%p11_p7) target bundleno = 3 (0x3), region = 76 }

// kernel: residual_block_forward.3
= control target key start
LH: loop header
LB: loop body
LE: loop exit
PB: predicated region body
PF: predicated region fallthrough
CT: control target
= control target key end

     0   :  { %s4572_s15 = smov 0   ;;  %s4574_s16 = smov 0   ;;  %s5695_s0 = inlined_call_operand.vmem [shape: bf16[2,18,18,128], index: 0, kind: input, shape index: {}]   ;;  %s5696_s1 = inlined_call_operand.vmem [shape: bf16[9,128,128], index: 1, kind: input, shape index: {}]   ;;  %s5697_s2 = inlined_call_operand.vmem [shape: f32[1,128], index: 2, kind: input, shape index: {}]   ;;  %s5698_s3 = inlined_call_operand.vmem [shape: f32[1,128], index: 3, kind: input, shape index: {}]   ;;  %s5699_s4 = inlined_call_operand.vmem [shape: f32[2,16,16,128], index: 4, kind: output, shape index: {}]  }
   0x1   :  { %s4576_s17 = smov 0   ;;  %s4578_s18 = smov 0  }
   0x2   :  { %s4580_s19 = smov 0  }
   0x3 LB: > { %s29_s20 = sadd.s32 1, %s4537_s17  ;;  %s33_s21 = sadd.s32 1, %s4541_s18  ;;  %s4545_s19 = sphi %s4580_s19, %s14_s19   ;;  %s4541_s18 = sphi %s4578_s18, %s5716_s18   ;;  %s4537_s17 = sphi %s4576_s17, %s5715_s17   ;;  %s4533_s16 = sphi %s4574_s16, %s5714_s16   ;;  %s4529_s15 = sphi %s4572_s15, %s5713_s15  }
   0x4   : > { %p31_p0 = scmp.ge.s32.totalorder %s29_s20, 2  ;;  %p3380_p1 = scmp.ge.s32.totalorder %s4545_s19, 1 }
   0x5   : > { %p210_p2 = scmp.lt.s32.totalorder %s4545_s19, 5 }
   0x6   : > { %s5718_s20 = smov (%p31_p0, %s29_s20), 0  ;;  %s5720_s21 = smov (!%p31_p0, %s33_s21), %s4541_s18 }
   0x7   : > { %p211_p3 = pnand %p3380_p1, %p210_p2  ;;  %p35_p4 = scmp.ge.s32.totalorder %s5720_s21, 2 }
   0x9   : > { %s5722_s21 = smov (%p35_p4, %s5720_s21), 0  ;;  %214 = sbr.rel (%p211_p3) target bundleno = 437 (0x1b5), region = 36 }
  0x10   : > { %v4407_v0 = vld [vmem:[%s5696_s1 + $0x40] sm:$0xff]   ;;  %p254_p5 = scmp.lt.s32.totalorder %s4533_s16, 1  ;;  %v4409_v2 = vld [vmem:[%s5696_s1 + $0x48] sm:$0xff]   ;;  %v4411_v4 = vld [vmem:[%s5696_s1 + $0x50] sm:$0xff]   ;;  %s3789_s13 = smul.u32 96, %s4529_s15  ;;  %vm934_vm3 = vcmask 1042432  }
  0x11   : > { %v4408_v1 = vld [vmem:[%s5696_s1 + $0x100] sm:$0xff]   ;;  %3934 = vmatprep.subr.bf16.mxu1 %v4407_v0  ;;  %v4410_v3 = vld [vmem:[%s5696_s1 + $0x108] sm:$0xff]   ;;  %v4412_v5 = vld [vmem:[%s5696_s1 + $0x110] sm:$0xff]   ;;  %vm328_vm0 = vsmask.f32 3328  ;;  %vm935_vm4 = vcmask 1046532  }
  0x12   : > { %s5724_s16 = smov (!%p254_p5, %s4533_s16), 1  ;;  %4062 = vmatprep.subr.bf16.mxu0 %v4408_v1  ;;  %3935 = vmatpush3.bf16.msra.mxu1 %v4407_v0  ;;  %v4413_v6 = vld [vmem:[%s5696_s1 + $0x58] sm:$0xff]   ;;  %v4415_v8 = vld [vmem:[%s5696_s1 + $0x60] sm:$0xff]   ;;  %v4417_v10 = vld [vmem:[%s5696_s1 + $0x68] sm:$0xff]   ;;  %vm329_vm1 = vsmask.f32 7440 }
  0x13   : > { %4063 = vmatpush3.bf16.msra.mxu0 %v4408_v1  ;;  %3936 = vmatprep.subr.bf16.mxu1 %v4409_v2  ;;  %s4366_s8 = smul.u32 216, %s5724_s16  ;;  %v4414_v7 = vld [vmem:[%s5696_s1 + $0x118] sm:$0xff]   ;;  %v4416_v9 = vld [vmem:[%s5696_s1 + $0x120] sm:$0xff]   ;;  %v4418_v11 = vld [vmem:[%s5696_s1 + $0x128] sm:$0xff]   ;;  %s3384_s27 = sshll.u32 %s5724_s16, 5 }
  0x14   : > { %4064 = vmatprep.subr.bf16.mxu0 %v4410_v3  ;;  %v4419_v25 = vld [vmem:[%s5696_s1 + $0x70] sm:$0xff]   ;;  %v4421_v35 = vld [vmem:[%s5696_s1 + $0x78] sm:$0xff]   ;;  %vm4686_vm2 = vmor %vm328_vm0, %vm329_vm1 }
  0x15   : > { %s258_s23 = scalar_lea.vmem %s5695_s0, %s4366_s8  ;;  %v4420_v29 = vld [vmem:[%s5696_s1 + $0x130] sm:$0xff]   ;;  %v4422_v50 = vld [vmem:[%s5696_s1 + $0x138] sm:$0xff]   ;;  %vm4983_vm5 = vmor %vm934_vm3, %vm935_vm4 }
  0x16   : > { %3937 = vmatpush3.bf16.msra.mxu1 %v4409_v2  ;;  %s4641_s28 = scalar_lea.vmem %s258_s23, %s3789_s13  ;;  %v4423_v2 = vld [vmem:[%s5696_s1] sm:$0xff]  }
  0x17   : > { %4065 = vmatpush3.bf16.msra.mxu0 %v4410_v3  ;;  %3938 = vmatprep.subr.bf16.mxu1 %v4411_v4  ;;  %v4650_v12 = vld [vmem:[%s4641_s28] sm:$0xf]  ;;  %v4653_v13 = vld [vmem:[%s4641_s28 + $0x4] sm:$0xf]  ;;  %v4656_v14 = vld [vmem:[%s4641_s28 + $0x8] sm:$0x1] }
  0x18   : > { %4066 = vmatprep.subr.bf16.mxu0 %v4412_v5  ;;  %v332_v15 = vshrl.u32 %v4650_v12, 16  ;;  %v335_v16 = vshll.u32 %v4650_v12, 16  ;;  %v341_v17 = vshll.u32 %v4653_v13, 16  ;;  %v345_v18 = vshrl.u32 %v4653_v13, 16  ;;  %v3527_v20 = vld [vmem:[%s4641_s28 + $0xc] sm:$0xf] }
  0x19   : > { %v351_v19 = vshll.u32 %v4656_v14, 16  ;;  %v4665_v23 = vld [vmem:[%s4641_s28 + $0x10] sm:$0xf]  ;;  %v4668_v24 = vld [vmem:[%s4641_s28 + $0x14] sm:$0x1]  ;;  %v1474_v28 = vshrl.u32 %v3527_v20, 16 }
  0x1a   : > { %3939 = vmatpush3.bf16.msra.mxu1 %v4411_v4  ;;  %v334_v21 = vrot.slane %v332_v15, 4  ;;  %v337_v22 = vrot.slane %v335_v16, 5  ;;  %v343_v26 = vrot.slane %v341_v17, 5  ;;  %v347_v27 = vrot.slane %v345_v18, 4  ;;  %v4679_v34 = vld [vmem:[%s4641_s28 + $0xc] sm:$0xf] }
  0x1b   : > { %4067 = vmatpush3.bf16.msra.mxu0 %v4412_v5  ;;  %3940 = vmatprep.subr.bf16.mxu1 %v4413_v6  ;;  %v1477_v31 = vshll.u32 %v3527_v20, 16  ;;  %v1483_v32 = vshll.u32 %v4665_v23, 16  ;;  %v1487_v33 = vshrl.u32 %v4665_v23, 16  ;;  %v353_v38 = vrot.slane %v351_v19, 5  ;;  %v4692_v41 = vld [vmem:[%s4641_s28 + $0x10] sm:$0xf] }
  0x1c   : > { %4068 = vmatprep.subr.bf16.mxu0 %v4414_v7  ;;  %v338_v30 = vor.u32 %v337_v22, %v334_v21  ;;  %v348_v37 = vor.u32 %v347_v27, %v343_v26  ;;  %v1476_v39 = vrot.slane %v1474_v28, 4  ;;  %v1493_v40 = vshll.u32 %v4668_v24, 16  ;;  %v4702_v54 = vld [vmem:[%s4641_s28 + $0x14] sm:$0x1]  ;;  %v3530_v56 = vld [vmem:[%s4641_s28 + $0x18] sm:$0xf] }
  0x1d   : > { %v1479_v43 = vrot.slane %v1477_v31, 5  ;;  %v1485_v44 = vrot.slane %v1483_v32, 5  ;;  %v1489_v45 = vrot.slane %v1487_v33, 4  ;;  %v356_v48 = vshrl.u32 %v4679_v34, 16  ;;  %v4710_v61 = vld [vmem:[%s4641_s28 + $0x1c] sm:$0xf] }
  0x1e   : > { %3941 = vmatpush3.bf16.msra.mxu1 %v4413_v6  ;;  %v339_v42 = vrot.slane %v338_v30, 4  ;;  %v349_v46 = vrot.slane %v348_v37, 4  ;;  %v1495_v47 = vrot.slane %v1493_v40, 5  ;;  %v359_v49 = vshll.u32 %v4679_v34, 16  ;;  %v4718_v3 = vld [vmem:[%s5696_s1 + $0x140] sm:$0xff]  }
  0x1f   : > { %4069 = vmatpush3.bf16.msra.mxu0 %v4414_v7  ;;  %3942 = vmatprep.subr.bf16.mxu1 %v4415_v8  ;;  %v1480_v52 = vor.u32 %v1479_v43, %v1476_v39  ;;  %v1490_v53 = vor.u32 %v1489_v45, %v1485_v44  ;;  %v365_v55 = vshll.u32 %v4692_v41, 16  ;;  %v358_v58 = vrot.slane %v356_v48, 4  ;;  %v4722_v7 = vld [vmem:[%s4641_s28 + $0x20] sm:$0x1]  ;;  %v4739_v33 = vld [vmem:[%s4641_s28 + $0x1c] sm:$0xf] }
  0x20   : > { %4070 = vmatprep.subr.bf16.mxu0 %v4416_v9  ;;  %v344_v51 = vsel %vm4686_vm2, %v339_v42, %v343_v26  ;;  %v354_v57 = vsel %vm4686_vm2, %v349_v46, %v353_v38  ;;  %v361_v59 = vrot.slane %v359_v49, 5  ;;  %v369_v60 = vshrl.u32 %v4692_v41, 16  ;;  %v3533_v42 = vld [vmem:[%s4641_s28 + $0x24] sm:$0xf]  ;;  %v4425_v46 = vld [vmem:[%s5696_s1 + $0x8] sm:$0xff]  }
  0x21   : > { %v3405_v62 = vcombine.low %v344_v51, %v354_v57  ;;  %v1481_v63 = vrot.slane %v1480_v52, 4  ;;  %v1491_v0 = vrot.slane %v1490_v53, 4  ;;  %v367_v1 = vrot.slane %v365_v55, 5  ;;  %v4754_v52 = vld [vmem:[%s4641_s28 + $0x28] sm:$0xf] }
  0x22   : > { %3943 = vmatpush3.bf16.msra.mxu1 %v4415_v8  ;;  %v362_v4 = vor.u32 %v361_v59, %v358_v58  ;;  %v371_v5 = vrot.slane %v369_v60, 4  ;;  %v375_v6 = vshll.u32 %v4702_v54, 16  ;;  %v1507_v21 = vshll.u32 %v4710_v61, 16  ;;  %v4759_v57 = vld [vmem:[%s4641_s28 + $0x2c] sm:$0x1]  ;;  %v4427_v59 = vld [vmem:[%s5696_s1 + $0x10] sm:$0xff]  }
  0x23   : > { %4071 = vmatpush3.bf16.msra.mxu0 %v4416_v9  ;;  %3944 = vmatprep.subr.bf16.mxu1 %v4417_v10  ;;  %v1486_v8 = vsel %vm4686_vm2, %v1481_v63, %v1485_v44  ;;  %v1496_v9 = vsel %vm4686_vm2, %v1491_v0, %v1495_v47  ;;  %v1511_v22 = vshrl.u32 %v4710_v61, 16  ;;  %v389_v49 = vshll.u32 %v4739_v33, 16  ;;  %v4426_v60 = vld [vmem:[%s5696_s1 + $0x148] sm:$0xff]  }
  0x24   : > { %4072 = vmatprep.subr.bf16.mxu0 %v4418_v11  ;;  %3950 = vmatprep.mubr.bf16.mxu1 %v3405_v62  ;;  %v3567_v15 = vcombine.low %v1486_v8, %v1496_v9  ;;  %v363_v16 = vrot.slane %v362_v4, 4  ;;  %v372_v17 = vor.u32 %v371_v5, %v367_v1  ;;  %v377_v18 = vrot.slane %v375_v6, 5  ;;  %v4768_v4 = vld [vmem:[%s4641_s28 + $0x24] sm:$0xf] }
  0x25   : > { %v1509_v31 = vrot.slane %v1507_v21, 5  ;;  %v1513_v32 = vrot.slane %v1511_v22, 4  ;;  %v1522_v58 = vshrl.u32 %v3533_v42, 16  ;;  %v391_v62 = vrot.slane %v389_v49, 5  ;;  %v3536_v22 = vld [vmem:[%s4641_s28 + $0x30] sm:$0xf] }
  0x26   : > { %3945 = vmatpush3.bf16.msra.mxu1 %v4417_v10  ;;  %v1498_v10 = vshrl.u32 %v3530_v56, 16  ;;  %4078 = vmatprep.mubr.bf16.mxu0 %v3567_v15  ;;  %v368_v27 = vsel %vm4686_vm2, %v363_v16, %v367_v1  ;;  %v373_v28 = vrot.slane %v372_v17, 4  ;;  %v1525_v1 = vshll.u32 %v3533_v42, 16  ;;  %v4775_v16 = vld [vmem:[%s4641_s28 + $0x28] sm:$0xf]  ;;  %v4429_v42 = vld [vmem:[%s5696_s1 + $0x18] sm:$0xff]  }
  0x27   : > { %4073 = vmatpush3.bf16.msra.mxu0 %v4418_v11  ;;  %3946 = vmatprep.subr.bf16.mxu1 %v4419_v25  ;;  %v1501_v11 = vshll.u32 %v3530_v56, 16  ;;  %v1514_v45 = vor.u32 %v1513_v32, %v1509_v31  ;;  %v1524_v8 = vrot.slane %v1522_v58, 4  ;;  %v1535_v15 = vshrl.u32 %v4754_v52, 16  ;;  %v4778_v17 = vld [vmem:[%s4641_s28 + $0x2c] sm:$0x1]  ;;  %v4428_v32 = vld [vmem:[%s5696_s1 + $0x150] sm:$0xff]  }
  0x28   : > { %4074 = vmatprep.subr.bf16.mxu0 %v4420_v29  ;;  %v1500_v19 = vrot.slane %v1498_v10, 4  ;;  %v378_v37 = vsel %vm4686_vm2, %v373_v28, %v377_v18  ;;  %v404_v21 = vshrl.u32 %v4768_v4, 16  ;;  %v423_v49 = vshll.u32 %v4778_v17, 16  ;;  %v4430_v58 = vld [vmem:[%s5696_s1 + $0x158] sm:$0xff]  }
  0x29   : > { %v1503_v20 = vrot.slane %v1501_v11, 5  ;;  %v3406_v43 = vcombine.low %v368_v27, %v378_v37  ;;  %v1515_v55 = vrot.slane %v1514_v45, 4  ;;  %v1527_v11 = vrot.slane %v1525_v1, 5 }
  0x2a   : > { %3947 = vmatpush3.bf16.msra.mxu1 %v4419_v25  ;;  %v4731_v25 = vld [vmem:[%s4641_s28 + $0x18] sm:$0xf] }
  0x2b   : > { %4075 = vmatpush3.bf16.msra.mxu0 %v4420_v29  ;;  %3948 = vmatprep.subr.bf16.mxu1 %v4421_v35  ;;  %v1517_v29 = vshll.u32 %v4722_v7, 16  ;;  %v1504_v30 = vor.u32 %v1503_v20, %v1500_v19  ;;  %v380_v40 = vshrl.u32 %v4731_v25, 16  ;;  %v383_v47 = vshll.u32 %v4731_v25, 16 }
  0x2c   : > { %4076 = vmatprep.subr.bf16.mxu0 %v4422_v50  ;;  %v1541_v20 = vshll.u32 %v4759_v57, 16  ;;  %v1528_v28 = vor.u32 %v1527_v11, %v1524_v8 }
  0x2d   : > { %v1519_v38 = vrot.slane %v1517_v29, 5  ;;  %v1505_v44 = vrot.slane %v1504_v30, 4  ;;  %v382_v48 = vrot.slane %v380_v40, 4  ;;  %v385_v56 = vrot.slane %v383_v47, 5 }
  0x2e   : > { %3949 = vmatpush3.bf16.msra.mxu1 %v4421_v35  ;;  %v322_v35 = vld [vmem:[%s4641_s28 + $0x20] sm:$0x1]  ;;  %v1537_v29 = vrot.slane %v1535_v15, 4  ;;  %v407_v30 = vshll.u32 %v4768_v4, 16  ;;  %v1543_v37 = vrot.slane %v1541_v20, 5  ;;  %v413_v40 = vshll.u32 %v4775_v16, 16 }
  0x2f   : > { %4077 = vmatpush3.bf16.msra.mxu0 %v4422_v50  ;;  %3966 = vmatprep.subr.bf16.mxu1 %v4423_v2  ;;  %v393_v50 = vshrl.u32 %v4739_v33, 16  ;;  %v399_v51 = vshll.u32 %v322_v35, 16  ;;  %v1510_v53 = vsel %vm4686_vm2, %v1505_v44, %v1509_v31  ;;  %v1520_v5 = vsel %vm4686_vm2, %v1515_v55, %v1519_v38  ;;  %v4785_v31 = vld [vmem:[%s4641_s28 + $0x34] sm:$0xf]  ;;  %v4804_v55 = vld [vmem:[%s4641_s28 + $0x38] sm:$0x1] }
  0x30   : > { %4094 = vmatprep.subr.bf16.mxu0 %v4718_v3  ;;  %v386_v6 = vor.u32 %v385_v56, %v382_v48  ;;  %v3568_v9 = vcombine.low %v1510_v53, %v1520_v5  ;;  %v406_v38 = vrot.slane %v404_v21, 4  ;;  %v1529_v44 = vrot.slane %v1528_v28, 4  ;;  %v4811_v5 = vld [vmem:[%s4641_s28 + $0x30] sm:$0xf] }
  0x31   : > { %3951 = vmatmul.mubr.bf16.vlgmr.msra.gmra.mrb[0].mxu1 %v3406_v43  ;;  %v395_v63 = vrot.slane %v393_v50, 4  ;;  %v401_v0 = vrot.slane %v399_v51, 5  ;;  %v415_v47 = vrot.slane %v413_v40, 5  ;;  %v417_v48 = vshrl.u32 %v4775_v16, 16 }
  0x32   : > { %3967 = vmatpush3.bf16.msra.mxu1 %v4423_v2  ;;  %v1531_v2 = vshll.u32 %v4754_v52, 16  ;;  %v387_v18 = vrot.slane %v386_v6, 4  ;;  %4079 = vmatmul.mubr.bf16.vlgmr.msra.gmra.mrb[0].mxu0 %v3568_v9  ;;  %v1546_v56 = vshrl.u32 %v3536_v22, 16  ;;  %v1555_v1 = vshll.u32 %v4785_v31, 16  ;;  %v4817_v9 = vld [vmem:[%s4641_s28 + $0x34] sm:$0xf] }
  0x33   : > { %3968 = vmatprep.subr.bf16.mxu1 %v4425_v46  ;;  %v396_v10 = vor.u32 %v395_v63, %v391_v62  ;;  %4095 = vmatpush3.bf16.msra.mxu0 %v4718_v3  ;;  %v409_v3 = vrot.slane %v407_v30, 5  ;;  %v425_v63 = vrot.slane %v423_v49, 5  ;;  %v1565_v21 = vshll.u32 %v4804_v55, 16 }
  0x34   : > { %v1533_v19 = vrot.slane %v1531_v2, 5  ;;  %v392_v35 = vsel %vm4686_vm2, %v387_v18, %v391_v62  ;;  %4096 = vmatprep.subr.bf16.mxu0 %v4426_v60  ;;  %v419_v62 = vrot.slane %v417_v48, 4  ;;  %v1548_v2 = vrot.slane %v1546_v56, 4  ;;  %v4842_v48 = vld [vmem:[%s4641_s28 + $0x40] sm:$0xf]  ;;  %v4435_v56 = vld [vmem:[%s5696_s1 + $0x30] sm:$0xff]  }
  0x35   : > { %v397_v27 = vrot.slane %v396_v10, 4  ;;  %v410_v53 = vor.u32 %v409_v3, %v406_v38  ;;  %v1557_v18 = vrot.slane %v1555_v1, 5  ;;  %v431_v30 = vshll.u32 %v4811_v5, 16 }
  0x36   : > { %3969 = vmatpush3.bf16.msra.mxu1 %v4425_v46  ;;  %v1538_v45 = vor.u32 %v1537_v29, %v1533_v19  ;;  %v1534_v50 = vsel %vm4686_vm2, %v1529_v44, %v1533_v19  ;;  %v420_v11 = vor.u32 %v419_v62, %v415_v47  ;;  %v4827_v29 = vld [vmem:[%s4641_s28 + $0x38] sm:$0x1]  ;;  %v1567_v40 = vrot.slane %v1565_v21, 5  ;;  %v3539_v44 = vld [vmem:[%s4641_s28 + $0x3c] sm:$0xf] }
  0x37   : > { %3970 = vmatprep.subr.bf16.mxu1 %v4427_v59  ;;  %v402_v43 = vsel %vm4686_vm2, %v397_v27, %v401_v0  ;;  %4097 = vmatpush3.bf16.msra.mxu0 %v4426_v60  ;;  %v1549_v0 = vshll.u32 %v3536_v22, 16  ;;  %v411_v8 = vrot.slane %v410_v53, 4  ;;  %v4431_v60 = vld [vmem:[%s5696_s1 + $0x20] sm:$0xff]   ;;  %v428_v22 = vshrl.u32 %v4811_v5, 16 }
  0x38   : > { %v3407_v46 = vcombine.low %v392_v35, %v402_v43  ;;  %v1539_v51 = vrot.slane %v1538_v45, 4  ;;  %4098 = vmatprep.subr.bf16.mxu0 %v4428_v32  ;;  %v421_v27 = vrot.slane %v420_v11, 4  ;;  %v437_v35 = vshll.u32 %v4817_v9, 16  ;;  %v4863_v11 = vld [vmem:[%s4641_s28 + $0x40] sm:$0xf] }
  0x39   : > { %v1551_v15 = vrot.slane %v1549_v0, 5  ;;  %v416_v19 = vsel %vm4686_vm2, %v411_v8, %v415_v47  ;;  %v441_v43 = vshrl.u32 %v4817_v9, 16  ;;  %v447_v53 = vshll.u32 %v4827_v29, 16  ;;  %v4851_v0 = vld [vmem:[%s4641_s28 + $0x44] sm:$0x1]  ;;  %v4434_v8 = vld [vmem:[%s5696_s1 + $0x168] sm:$0xff]  }
  0x3a   : > { %3971 = vmatpush3.bf16.msra.mxu1 %v4427_v59  ;;  %3954 = vmatprep.mubr.bf16.mxu1 %v3407_v46  ;;  %v1544_v6 = vsel %vm4686_vm2, %v1539_v51, %v1543_v37  ;;  %v1559_v59 = vshrl.u32 %v4785_v31, 16  ;;  %v4433_v37 = vld [vmem:[%s5696_s1 + $0x28] sm:$0xff]   ;;  %v426_v45 = vsel %vm4686_vm2, %v421_v27, %v425_v63  ;;  %v433_v46 = vrot.slane %v431_v30, 5  ;;  %v4866_v21 = vld [vmem:[%s4641_s28 + $0x44] sm:$0x1] }
  0x3b   : > { %3972 = vmatprep.subr.bf16.mxu1 %v4429_v42  ;;  %v3569_v10 = vcombine.low %v1534_v50, %v1544_v6  ;;  %v1552_v28 = vor.u32 %v1551_v15, %v1548_v2  ;;  %4099 = vmatpush3.bf16.msra.mxu0 %v4428_v32  ;;  %v4432_v32 = vld [vmem:[%s5696_s1 + $0x160] sm:$0xff]   ;;  %v439_v47 = vrot.slane %v437_v35, 5  ;;  %v3408_v49 = vcombine.low %v416_v19, %v426_v45  ;;  %v4879_v45 = vld [vmem:[%s4641_s28 + $0x4c] sm:$0xf] }
  0x3c   : > { %v1561_v20 = vrot.slane %v1559_v59, 4  ;;  %4100 = vmatprep.subr.bf16.mxu0 %v4430_v58  ;;  %v443_v51 = vrot.slane %v441_v43, 4  ;;  %v1570_v1 = vshrl.u32 %v3539_v44, 16  ;;  %v1573_v6 = vshll.u32 %v3539_v44, 16  ;;  %5704 = vst [vmem:[#allocation2_spill] sm:$0xff] %v4866_v21 }
  0x3d   : > { %4082 = vmatprep.mubr.bf16.mxu0 %v3569_v10  ;;  %v1553_v3 = vrot.slane %v1552_v28, 4  ;;  %3955 = vmatmul.mubr.bf16.gmra.mrb[4].mxu1 %v3408_v49  ;;  %v4860_v10 = vld [vmem:[%s4641_s28 + $0x3c] sm:$0xf]  ;;  %v1583_v30 = vshrl.u32 %v4842_v48, 16  ;;  %v1589_v35 = vshll.u32 %v4851_v0, 16 }
  0x3e   : > { %3973 = vmatpush3.bf16.msra.mxu1 %v4429_v42  ;;  %v1562_v38 = vor.u32 %v1561_v20, %v1557_v18  ;;  %v430_v42 = vrot.slane %v428_v22, 4  ;;  %v444_v59 = vor.u32 %v443_v51, %v439_v47  ;;  %v1572_v19 = vrot.slane %v1570_v1, 4  ;;  %v4437_v22 = vld [vmem:[%s5696_s1 + $0x38] sm:$0xff]  }
  0x3f   : > { %3974 = vmatprep.subr.bf16.mxu1 %v4431_v60  ;;  %v1558_v62 = vsel %vm4686_vm2, %v1553_v3, %v1557_v18  ;;  %4101 = vmatpush3.bf16.msra.mxu0 %v4430_v58  ;;  %v1579_v58 = vshll.u32 %v4842_v48, 16  ;;  %v1575_v20 = vrot.slane %v1573_v6, 5  ;;  %v452_v43 = vshrl.u32 %v4860_v10, 16 }
  0x40   : > { %v1563_v50 = vrot.slane %v1562_v38, 4  ;;  %v434_v63 = vor.u32 %v433_v46, %v430_v42  ;;  %4102 = vmatprep.subr.bf16.mxu0 %v4432_v32  ;;  %v445_v27 = vrot.slane %v444_v59, 4  ;;  %v3542_v38 = vld [vmem:[%s4641_s28 + $0x48] sm:$0xf]  ;;  %v455_v44 = vshll.u32 %v4860_v10, 16 }
  0x41   : > { %v1581_v28 = vrot.slane %v1579_v58, 5  ;;  %v1576_v42 = vor.u32 %v1575_v20, %v1572_v19  ;;  %v1585_v46 = vrot.slane %v1583_v30, 4  ;;  %v1591_v49 = vrot.slane %v1589_v35, 5 }
  0x42   : > { %3975 = vmatpush3.bf16.msra.mxu1 %v4431_v60  ;;  %v1568_v2 = vsel %vm4686_vm2, %v1563_v50, %v1567_v40  ;;  %v449_v60 = vrot.slane %v447_v53, 5  ;;  %v435_v18 = vrot.slane %v434_v63, 4  ;;  %v461_v50 = vshll.u32 %v4863_v11, 16 }
  0x43   : > { %3976 = vmatprep.subr.bf16.mxu1 %v4433_v37  ;;  %v3570_v15 = vcombine.low %v1558_v62, %v1568_v2  ;;  %4103 = vmatpush3.bf16.msra.mxu0 %v4432_v32  ;;  %v1577_v51 = vrot.slane %v1576_v42, 4  ;;  %v457_v53 = vrot.slane %v455_v44, 5  ;;  %v4436_v62 = vld [vmem:[%s5696_s1 + $0x170] sm:$0xff]   ;;  %v1586_v63 = vor.u32 %v1585_v46, %v1581_v28  ;;  %v4905_v42 = vld [vmem:[%s4641_s28 + $0x48] sm:$0xf] }
  0x44   : > { %v440_v40 = vsel %vm4686_vm2, %v435_v18, %v439_v47  ;;  %v450_v3 = vsel %vm4686_vm2, %v445_v27, %v449_v60  ;;  %v454_v47 = vrot.slane %v452_v43, 4  ;;  %4104 = vmatprep.subr.bf16.mxu0 %v4434_v8  ;;  %v463_v1 = vrot.slane %v461_v50, 5  ;;  %v4892_v60 = vld [vmem:[%s4641_s28 + $0x50] sm:$0x1]  ;;  %v4897_v18 = vld [vmem:[%s5696_s1 + $0x80] sm:$0xff]  }
  0x45   : > { %4083 = vmatmul.mubr.bf16.gmra.mrb[4].mxu0 %v3570_v15  ;;  %v465_v6 = vshrl.u32 %v4863_v11, 16  ;;  %v471_v2 = vshll.u32 %v4866_v21, 16  ;;  %v1582_v32 = vsel %vm4686_vm2, %v1577_v51, %v1581_v28  ;;  %v1594_v58 = vshrl.u32 %v3542_v38, 16  ;;  %v4438_v28 = vld [vmem:[%s5696_s1 + $0x178] sm:$0xff]   ;;  %v4911_v46 = vld [vmem:[%s4641_s28 + $0x4c] sm:$0xf] }
  0x46   : > { %3977 = vmatpush3.bf16.msra.mxu1 %v4433_v37  ;;  %v3409_v37 = vcombine.low %v440_v40, %v450_v3  ;;  %v458_v59 = vor.u32 %v457_v53, %v454_v47  ;;  %v1597_v15 = vshll.u32 %v3542_v38, 16  ;;  %v1587_v19 = vrot.slane %v1586_v63, 4  ;;  %v4916_v53 = vld [vmem:[%s4641_s28 + $0x50] sm:$0x1]  ;;  %v3545_v63 = vld [vmem:[%s4641_s28 + $0x54] sm:$0xf] }
  0x47   : > { %3978 = vmatprep.subr.bf16.mxu1 %v4435_v56  ;;  %v467_v20 = vrot.slane %v465_v6, 4  ;;  %v1603_v27 = vshll.u32 %v4879_v45, 16  ;;  %4105 = vmatpush3.bf16.msra.mxu0 %v4434_v8  ;;  %v1596_v35 = vrot.slane %v1594_v58, 4  ;;  %v1607_v40 = vshrl.u32 %v4879_v45, 16  ;;  %5705 = vst [vmem:[#allocation3_spill] sm:$0xff] %v4916_v53 }
  0x48   : > { %3958 = vmatprep.mubr.bf16.mxu1 %v3409_v37  ;;  %v459_v30 = vrot.slane %v458_v59, 4  ;;  %v1599_v38 = vrot.slane %v1597_v15, 5  ;;  %4106 = vmatprep.subr.bf16.mxu0 %v4436_v62  ;;  %v1592_v43 = vsel %vm4686_vm2, %v1587_v19, %v1591_v49  ;;  %v1613_v8 = vshll.u32 %v4892_v60, 16  ;;  %v4927_v15 = vld [vmem:[%s5696_s1 + $0x180] sm:$0xff]  }
  0x49   : > { %v468_v44 = vor.u32 %v467_v20, %v463_v1  ;;  %v1605_v3 = vrot.slane %v1603_v27, 5  ;;  %v3571_v50 = vcombine.low %v1582_v32, %v1592_v43  ;;  %v1609_v47 = vrot.slane %v1607_v40, 4 }
  0x4a   : > { %3979 = vmatpush3.bf16.msra.mxu1 %v4435_v56  ;;  %v473_v56 = vrot.slane %v471_v2, 5  ;;  %v464_v37 = vsel %vm4686_vm2, %v459_v30, %v463_v1  ;;  %v1600_v51 = vor.u32 %v1599_v38, %v1596_v35  ;;  %v1615_v49 = vrot.slane %v1613_v8, 5  ;;  %v4933_v30 = vld [vmem:[%s4641_s28 + $0x58] sm:$0xf]  ;;  %v4941_v8 = vld [vmem:[%s4641_s28 + $0x54] sm:$0xf] }
  0x4b   : > { %3980 = vmatprep.subr.bf16.mxu1 %v4437_v22  ;;  %v469_v6 = vrot.slane %v468_v44, 4  ;;  %v476_v2 = vshrl.u32 %v4905_v42, 16  ;;  %v479_v59 = vshll.u32 %v4905_v42, 16  ;;  %4107 = vmatpush3.bf16.msra.mxu0 %v4436_v62  ;;  %v1610_v1 = vor.u32 %v1609_v47, %v1605_v3  ;;  %v4938_v44 = vld [vmem:[%s4641_s28 + $0x5c] sm:$0x1] }
  0x4c   : > { %4086 = vmatprep.mubr.bf16.mxu0 %v3571_v50  ;;  %v485_v32 = vshll.u32 %v4911_v46, 16  ;;  %v489_v58 = vshrl.u32 %v4911_v46, 16  ;;  %4108 = vmatprep.subr.bf16.mxu0 %v4438_v28  ;;  %v495_v27 = vshll.u32 %v4916_v53, 16  ;;  %v4968_v53 = vld [vmem:[%s4641_s28 + $0x68] sm:$0x1] }
  0x4d   : > { %v474_v19 = vsel %vm4686_vm2, %v469_v6, %v473_v56  ;;  %v478_v62 = vrot.slane %v476_v2, 4  ;;  %v481_v20 = vrot.slane %v479_v59, 5  ;;  %v1611_v40 = vrot.slane %v1610_v1, 4  ;;  %v4944_v6 = vld [vmem:[%s4641_s28 + $0x58] sm:$0xf] }
  0x4e   : > { %3981 = vmatpush3.bf16.msra.mxu1 %v4437_v22  ;;  %v1601_v22 = vrot.slane %v1600_v51, 4  ;;  %v3410_v35 = vcombine.low %v464_v37, %v474_v19  ;;  %v487_v43 = vrot.slane %v485_v32, 5  ;;  %v491_v51 = vrot.slane %v489_v58, 4 }
  0x4f   : > { %3998 = vmatprep.subr.bf16.mxu1 %v4897_v18  ;;  %v482_v50 = vor.u32 %v481_v20, %v478_v62  ;;  %v497_v47 = vrot.slane %v495_v27, 5  ;;  %v1618_v56 = vshrl.u32 %v3545_v63, 16  ;;  %4109 = vmatpush3.bf16.msra.mxu0 %v4438_v28  ;;  %v1616_v37 = vsel %vm4686_vm2, %v1611_v40, %v1615_v49  ;;  %v4953_v20 = vld [vmem:[%s4641_s28 + $0x5c] sm:$0x1] }
  0x50   : > { %v1606_v38 = vsel %vm4686_vm2, %v1601_v22, %v1605_v3  ;;  %3959 = vmatmul.mubr.bf16.gmra.mrb[8].mxu1 %v3410_v35  ;;  %v1621_v3 = vshll.u32 %v3545_v63, 16  ;;  %v1627_v2 = vshll.u32 %v4933_v30, 16  ;;  %v1631_v59 = vshrl.u32 %v4933_v30, 16  ;;  %4126 = vmatprep.subr.bf16.mxu0 %v4927_v15  ;;  %v3548_v63 = vld [vmem:[%s4641_s28 + $0x60] sm:$0xf] }
  0x51   : > { %v3572_v22 = vcombine.low %v1606_v38, %v1616_v37  ;;  %v483_v1 = vrot.slane %v482_v50, 4  ;;  %v492_v32 = vor.u32 %v491_v51, %v487_v43  ;;  %v1620_v58 = vrot.slane %v1618_v56, 4 }
  0x52   : > { %v1623_v28 = vrot.slane %v1621_v3, 5  ;;  %v1629_v19 = vrot.slane %v1627_v2, 5  ;;  %v1633_v62 = vrot.slane %v1631_v59, 4  ;;  %v1637_v49 = vshll.u32 %v4938_v44, 16  ;;  %v4962_v3 = vld [vmem:[%s4641_s28 + $0x64] sm:$0xf] }
  0x53   : > { %4087 = vmatmul.mubr.bf16.gmra.mrb[8].mxu0 %v3572_v22  ;;  %v488_v27 = vsel %vm4686_vm2, %v483_v1, %v487_v43  ;;  %v493_v35 = vrot.slane %v492_v32, 4  ;;  %v500_v38 = vshrl.u32 %v4941_v8, 16  ;;  %v503_v40 = vshll.u32 %v4941_v8, 16 }
  0x54   : > { %v1624_v50 = vor.u32 %v1623_v28, %v1620_v58  ;;  %v1634_v51 = vor.u32 %v1633_v62, %v1629_v19  ;;  %v1639_v56 = vrot.slane %v1637_v49, 5  ;;  %v509_v37 = vshll.u32 %v4944_v6, 16  ;;  %v3583_v58 = vld [vmem:[%s4641_s28 + $0xc] sm:$0xe] }
  0x55   : > { %v498_v2 = vsel %vm4686_vm2, %v493_v35, %v497_v47  ;;  %v502_v59 = vrot.slane %v500_v38, 4  ;;  %v505_v22 = vrot.slane %v503_v40, 5  ;;  %v513_v43 = vshrl.u32 %v4944_v6, 16 }
  0x56   : > { %v3411_v1 = vcombine.low %v488_v27, %v498_v2  ;;  %v1625_v32 = vrot.slane %v1624_v50, 4  ;;  %v1635_v26 = vrot.slane %v1634_v51, 4  ;;  %v511_v39 = vrot.slane %v509_v37, 5 }
  0x57   : > { %v506_v28 = vor.u32 %v505_v22, %v502_v59  ;;  %v515_v62 = vrot.slane %v513_v43, 4  ;;  %v519_v49 = vshll.u32 %v4953_v20, 16  ;;  %v1642_v21 = vshrl.u32 %v3548_v63, 16 }
  0x58   : > { %3962 = vmatprep.mubr.bf16.mxu1 %v3411_v1  ;;  %v1630_v47 = vsel %vm4686_vm2, %v1625_v32, %v1629_v19  ;;  %v1640_v35 = vsel %vm4686_vm2, %v1635_v26, %v1639_v56  ;;  %v1645_v38 = vshll.u32 %v3548_v63, 16  ;;  %v1651_v27 = vshll.u32 %v4962_v3, 16 }
  0x59   : > { %v3573_v40 = vcombine.low %v1630_v47, %v1640_v35  ;;  %v507_v50 = vrot.slane %v506_v28, 4  ;;  %v516_v51 = vor.u32 %v515_v62, %v511_v39  ;;  %v521_v37 = vrot.slane %v519_v49, 5  ;;  %v3584_v49 = vld [vmem:[%s4641_s28 + $0x18] sm:$0xe]  ;;  %v3585_v47 = vld [vmem:[%s4641_s28 + $0x24] sm:$0xe] }
  0x5a   : > { %v1644_v2 = vrot.slane %v1642_v21, 4  ;;  %v1647_v59 = vrot.slane %v1645_v38, 5  ;;  %v1653_v22 = vrot.slane %v1651_v27, 5  ;;  %v1655_v43 = vshrl.u32 %v4962_v3, 16 }
  0x5b   : > { %4090 = vmatprep.mubr.bf16.mxu0 %v3573_v40  ;;  %v512_v19 = vsel %vm4686_vm2, %v507_v50, %v511_v39  ;;  %v517_v1 = vrot.slane %v516_v51, 4  ;;  %v1661_v26 = vshll.u32 %v4968_v53, 16  ;;  %v3591_v63 = vrot.slane %v3583_v58, 9 }
  0x5c   : > { %v1648_v56 = vor.u32 %v1647_v59, %v1644_v2  ;;  %v1657_v32 = vrot.slane %v1655_v43, 4  ;;  %v1909_v21 = vrot.slane %v4665_v23, 5  ;;  %v3421_v39 = vcombine.low %v4650_v12, %v4653_v13 }
  0x5d   : > { %v522_v62 = vsel %vm4686_vm2, %v517_v1, %v521_v37  ;;  %v1663_v27 = vrot.slane %v1661_v26, 5  ;;  %v1923_v37 = vrot.slane %v4754_v52, 5  ;;  %v5708_v12 = vrot.slane %v4710_v61, 5  ;;  %v5033_v61 = vld [vmem:[%s4641_s28 + $0x48] sm:$0xe] }
  0x5e   : > { %v3412_v35 = vcombine.low %v512_v19, %v522_v62  ;;  %v1649_v58 = vrot.slane %v1648_v56, 4  ;;  %v1658_v38 = vor.u32 %v1657_v32, %v1653_v22  ;;  %v1910_v40 = vsel %vm4983_vm5, %v3591_v63, %v1909_v21  ;;  %v3586_v63 = vld [vmem:[%s4641_s28 + $0x30] sm:$0xe] }
  0x5f   : > { %v1911_v50 = vrot.slane %v1909_v21, 4  ;;  %v1918_v13 = vrot.slane %v5708_v12, 4  ;;  %v1919_v2 = vrot.slane %v4722_v7, 5  ;;  %v5709_v59 = vrot.slane %v4668_v24, 5 }
  0x60   : > { %3963 = vmatmul.mubr.bf16.gmra.mrb[12].mxu1 %v3412_v35  ;;  %v1654_v23 = vsel %vm4686_vm2, %v1649_v58, %v1653_v22  ;;  %v1659_v51 = vrot.slane %v1658_v38, 4  ;;  %v3592_v22 = vrot.slane %v3584_v49, 9  ;;  %v3593_v26 = vrot.slane %v3585_v47, 9  ;;  %v3587_v49 = vld [vmem:[%s4641_s28 + $0x3c] sm:$0xe]  ;;  %v4443_v35 = vld [vmem:[%s5696_s1 + $0x88] sm:$0xff]  }
  0x61   : > { %3982 = vmatprep.mubr.bf16.mxu1 %v3421_v39  ;;  %v1913_v43 = vsel %vm4983_vm5, %v1911_v50, %v5709_v59  ;;  %v1925_v56 = vrot.slane %v1923_v37, 4  ;;  %v1926_v32 = vrot.slane %v4759_v57, 5  ;;  %v942_v7 = vrot.slane %v4656_v14, 5 }
  0x62   : > { %v1664_v19 = vsel %vm4686_vm2, %v1659_v51, %v1663_v27  ;;  %v3615_v1 = vcombine.low %v1910_v40, %v1913_v43  ;;  %v949_v24 = vrot.slane %v4702_v54, 5  ;;  %v3422_v21 = vcombine.low %v4679_v34, %v4692_v41  ;;  %v4449_v43 = vld [vmem:[%s5696_s1 + $0x98] sm:$0xff]  }
  0x63   : > { %v3574_v52 = vcombine.low %v1654_v23, %v1664_v19  ;;  %v1920_v62 = vsel %vm4983_vm5, %v1918_v13, %v1919_v2  ;;  %v3423_v39 = vcombine.low %v4731_v25, %v4739_v33  ;;  %v5710_v47 = vmov %v5708_v12  ;;  %v5043_v23 = vld [vmem:[%s4641_s28 + $0x54] sm:$0xe] }
  0x64   : > { %v1917_v57 = vsel %vm4983_vm5, %v3592_v22, %v5710_v47  ;;  %v3594_v34 = vrot.slane %v3586_v63, 9  ;;  %v1930_v41 = vrot.slane %v4785_v31, 5  ;;  %v1937_v58 = vrot.slane %v4842_v48, 5  ;;  %v4444_v48 = vld [vmem:[%s5696_s1 + $0x188] sm:$0xff]  }
  0x65   : > { %4091 = vmatmul.mubr.bf16.gmra.mrb[12].mxu0 %v3574_v52  ;;  %v1924_v25 = vsel %vm4983_vm5, %v3593_v26, %v1923_v37  ;;  %v1927_v33 = vsel %vm4983_vm5, %v1925_v56, %v1926_v32  ;;  %v1933_v38 = vrot.slane %v4804_v55, 5  ;;  %v3595_v27 = vrot.slane %v3587_v49, 9  ;;  %v5046_v55 = vld [vmem:[%s4641_s28 + $0x60] sm:$0xe]  ;;  %v5073_v56 = vld [vmem:[%s4641_s28 + $0x4] sm:$0xf] }
  0x66   : > { %4110 = vmatprep.mubr.bf16.mxu0 %v3615_v1  ;;  %v1940_v40 = vrot.slane %v4851_v0, 5  ;;  %v1944_v50 = vrot.slane %v4879_v45, 5  ;;  %v3616_v31 = vcombine.low %v1917_v57, %v1920_v62  ;;  %v3617_v51 = vcombine.low %v1924_v25, %v1927_v33  ;;  %v4453_v49 = vld [vmem:[%s5696_s1 + $0xa0] sm:$0xff]   ;;  %v5128_v45 = vld [vmem:[%s4641_s28 + $0x18] sm:$0xe] }
  0x67   : > { %v1932_v37 = vrot.slane %v1930_v41, 4  ;;  %v1939_v12 = vrot.slane %v1937_v58, 4  ;;  %v3424_v0 = vcombine.low %v4768_v4, %v4775_v16  ;;  %v1931_v13 = vsel %vm4983_vm5, %v3594_v34, %v1930_v41  ;;  %v5096_v41 = vld [vmem:[%s4641_s28 + $0x10] sm:$0xf] }
  0x68   : > { %3983 = vmatmul.mubr.bf16.vlgmr.msra.gmra.mrb[0].mxu1 %v3422_v21  ;;  %v3425_v2 = vcombine.low %v4811_v5, %v4817_v9  ;;  %v3596_v59 = vrot.slane %v5033_v61, 9  ;;  %v1946_v4 = vrot.slane %v1944_v50, 4  ;;  %v1947_v19 = vrot.slane %v4892_v60, 5  ;;  %v4448_v5 = vld [vmem:[%s5696_s1 + $0x190] sm:$0xff]   ;;  %v910_v21 = vld [vmem:[%s4641_s28] sm:$0xe] }
  0x69   : > { %3999 = vmatpush3.bf16.msra.mxu1 %v4897_v18  ;;  %3986 = vmatprep.mubr.bf16.mxu1 %v3423_v39  ;;  %v4447_v18 = vld [vmem:[%s5696_s1 + $0x90] sm:$0xff]   ;;  %v3597_v1 = vrot.slane %v5043_v23, 9  ;;  %v1951_v22 = vrot.slane %v4933_v30, 5  ;;  %v1954_v26 = vrot.slane %v4938_v44, 5  ;;  %v3598_v63 = vrot.slane %v5046_v55, 9 }
  0x6a   : > { %4000 = vmatprep.subr.bf16.mxu1 %v4443_v35  ;;  %v1958_v52 = vrot.slane %v4962_v3, 5  ;;  %v939_v60 = vrot.slane %v5073_v56, 5  ;;  %v1934_v30 = vsel %vm4983_vm5, %v1932_v37, %v1933_v38  ;;  %v1938_v32 = vsel %vm4983_vm5, %v3595_v27, %v1937_v58  ;;  %v913_v61 = vld [vmem:[%s4641_s28 + $0x24] sm:$0xe]  ;;  %v915_v56 = vld [vmem:[%s4641_s28 + $0x3c] sm:$0xe] }
  0x6b   : > { %v1941_v44 = vsel %vm4983_vm5, %v1939_v12, %v1940_v40  ;;  %v3618_v62 = vcombine.low %v1931_v13, %v1934_v30  ;;  %v1953_v47 = vrot.slane %v1951_v22, 4  ;;  %v1961_v57 = vrot.slane %v4968_v53, 5  ;;  %v4455_v40 = vld [vmem:[%s5696_s1 + $0xa8] sm:$0xff]   ;;  %v4505_v30 = vld [vmem:[%s4641_s28 + $0x1c] sm:$0xf]  ;;  %v4460_v53 = vld [vmem:[%s5696_s1 + $0x1b0] sm:$0xff]  }
  0x6c   : > { %v3619_v39 = vcombine.low %v1938_v32, %v1941_v44  ;;  %v3437_v34 = vrot.slane %v910_v21, 9  ;;  %v946_v58 = vrot.slane %v5096_v41, 5  ;;  %v960_v25 = vrot.slane %v4775_v16, 5  ;;  %v917_v41 = vld [vmem:[%s4641_s28 + $0x54] sm:$0xe] }
  0x6d   : > { %4111 = vmatmul.mubr.bf16.vlgmr.msra.gmra.mrb[0].mxu0 %v3616_v31  ;;  %4001 = vmatpush3.bf16.msra.mxu1 %v4443_v35  ;;  %v5093_v35 = vrot.slane %v1958_v52, 4  ;;  %v941_v33 = vrot.slane %v939_v60, 4  ;;  %v963_v38 = vrot.slane %v4778_v17, 5  ;;  %v3426_v27 = vcombine.low %v4860_v10, %v4863_v11 }
  0x6e   : > { %4127 = vmatpush3.bf16.msra.mxu0 %v4927_v15  ;;  %4114 = vmatprep.mubr.bf16.mxu0 %v3617_v51  ;;  %v4450_v15 = vld [vmem:[%s5696_s1 + $0x198] sm:$0xff]   ;;  %v3427_v31 = vcombine.low %v4905_v42, %v4911_v46  ;;  %v3440_v16 = vrot.slane %v913_v61, 9  ;;  %v962_v23 = vrot.slane %v960_v25, 4  ;;  %v1945_v17 = vsel %vm4983_vm5, %v3596_v59, %v1944_v50  ;;  %v4454_v51 = vld [vmem:[%s5696_s1 + $0x1a0] sm:$0xff]  }
  0x6f   : > { %4128 = vmatprep.subr.bf16.mxu0 %v4444_v48  ;;  %4002 = vmatprep.subr.bf16.mxu1 %v4447_v18  ;;  %v1948_v10 = vsel %vm4983_vm5, %v1946_v4, %v1947_v19  ;;  %v1952_v42 = vsel %vm4983_vm5, %v3597_v1, %v1951_v22  ;;  %v1955_v37 = vsel %vm4983_vm5, %v1953_v47, %v1954_v26  ;;  %v967_v13 = vrot.slane %v4817_v9, 5  ;;  %v914_v4 = vld [vmem:[%s4641_s28 + $0x30] sm:$0xe]  ;;  %v4456_v1 = vld [vmem:[%s5696_s1 + $0x1a8] sm:$0xff]  }
  0x70   : > { %3987 = vmatmul.mubr.bf16.gmra.mrb[4].mxu1 %v3424_v0  ;;  %v5132_v50 = vsel %vm4983_vm5, %v3440_v16, %v960_v25  ;;  %v5136_v12 = vsel %vm4983_vm5, %v962_v23, %v963_v38  ;;  %v3428_v59 = vcombine.low %v4941_v8, %v4944_v6  ;;  %v970_v19 = vrot.slane %v4827_v29, 5  ;;  %v4459_v29 = vld [vmem:[%s5696_s1 + $0xb0] sm:$0xff]   ;;  %v5712_v38 = vld [vmem:[#allocation3_spill] sm:$0xff]  ;;  %v4462_v16 = vld [vmem:[%s5696_s1 + $0x1b8] sm:$0xff]  }
  0x71   : > { %4003 = vmatpush3.bf16.msra.mxu1 %v4447_v18  ;;  %3990 = vmatprep.mubr.bf16.mxu1 %v3425_v2  ;;  %v3464_v18 = vcombine.low %v5132_v50, %v5136_v12  ;;  %v3620_v2 = vcombine.low %v1945_v17, %v1948_v10  ;;  %v3621_v9 = vcombine.low %v1952_v42, %v1955_v37  ;;  %v3441_v8 = vrot.slane %v914_v4, 9  ;;  %v4475_v50 = vld [vmem:[%s4641_s28 + $0x48] sm:$0xff]   ;;  %v4476_v12 = vld [vmem:[%s5696_s1 + $0xe0] sm:$0xff]  }
  0x72   : > { %4129 = vmatpush3.bf16.msra.mxu0 %v4444_v48  ;;  %4004 = vmatprep.subr.bf16.mxu1 %v4449_v43  ;;  %v5112_v48 = vld [vmem:[%s4641_s28 + $0xc] sm:$0xe]  ;;  %v940_v22 = vsel %vm4983_vm5, %v3437_v34, %v939_v60  ;;  %v943_v26 = vsel %vm4983_vm5, %v941_v33, %v942_v7  ;;  %v953_v32 = vrot.slane %v4505_v30, 5  ;;  %v974_v44 = vrot.slane %v4863_v11, 5  ;;  %v5711_v60 = vld [vmem:[#allocation2_spill] sm:$0xff]  ;;  %v4461_v7 = vld [vmem:[%s5696_s1 + $0xb8] sm:$0xff]  }
  0x73   : > { %4130 = vmatprep.subr.bf16.mxu0 %v4448_v5  ;;  %v3438_v0 = vrot.slane %v5112_v48, 9  ;;  %v977_v21 = vrot.slane %v5711_v60, 5  ;;  %v1959_v11 = vsel %vm4983_vm5, %v3598_v63, %v1958_v52  ;;  %v1962_v3 = vsel %vm4983_vm5, %v5093_v35, %v1961_v57  ;;  %v916_v35 = vld [vmem:[%s4641_s28 + $0x48] sm:$0xe] }
  0x74   : > { %v976_v25 = vrot.slane %v974_v44, 4  ;;  %v3461_v55 = vcombine.low %v940_v22, %v943_v26  ;;  %v955_v52 = vrot.slane %v953_v32, 4  ;;  %v981_v61 = vrot.slane %v4911_v46, 5  ;;  %v5263_v26 = vld [vmem:[%s4641_s28 + $0x20] sm:$0x1] }
  0x75   : > { %4115 = vmatmul.mubr.bf16.gmra.mrb[4].mxu0 %v3618_v62  ;;  %4005 = vmatpush3.bf16.msra.mxu1 %v4449_v43  ;;  %v948_v43 = vrot.slane %v946_v58, 4  ;;  %v3439_v62 = vrot.slane %v5128_v45, 9  ;;  %v947_v46 = vsel %vm4983_vm5, %v3438_v0, %v946_v58  ;;  %v988_v10 = vrot.slane %v4944_v6, 5  ;;  %v4464_v6 = vld [vmem:[%s5696_s1 + $0xc0] sm:$0xff]  }
  0x76   : > { %4131 = vmatpush3.bf16.msra.mxu0 %v4448_v5  ;;  %4118 = vmatprep.mubr.bf16.mxu0 %v3619_v39  ;;  %v969_v5 = vrot.slane %v967_v13, 4  ;;  %v3442_v39 = vrot.slane %v915_v56, 9  ;;  %v5198_v33 = vsel %vm4983_vm5, %v976_v25, %v977_v21  ;;  %v983_v48 = vrot.slane %v981_v61, 4  ;;  %v4468_v56 = vld [vmem:[%s5696_s1 + $0x1c8] sm:$0xff]  }
  0x77   : > { %4132 = vmatprep.subr.bf16.mxu0 %v4450_v15  ;;  %4006 = vmatprep.subr.bf16.mxu1 %v4453_v49  ;;  %v950_v23 = vsel %vm4983_vm5, %v948_v43, %v949_v24  ;;  %v954_v17 = vsel %vm4983_vm5, %v3439_v62, %v953_v32  ;;  %v991_v58 = vrot.slane %v4953_v20, 5  ;;  %v3444_v37 = vrot.slane %v917_v41, 9  ;;  %v4467_v43 = vld [vmem:[%s5696_s1 + $0xc8] sm:$0xff]   ;;  %v3684_v62 = vld [vmem:[%s4641_s28 + $0x24] sm:$0xf] }
  0x78   : > { %3991 = vmatmul.mubr.bf16.gmra.mrb[8].mxu1 %v3426_v27  ;;  %v5173_v14 = vsel %vm4983_vm5, %v969_v5, %v970_v19  ;;  %v5194_v63 = vsel %vm4983_vm5, %v3442_v39, %v974_v44  ;;  %v984_v27 = vrot.slane %v5712_v38, 5  ;;  %v990_v45 = vrot.slane %v988_v10, 4  ;;  %v4466_v19 = vld [vmem:[%s5696_s1 + $0x1c0] sm:$0xff]   ;;  %v4470_v44 = vld [vmem:[%s5696_s1 + $0xd0] sm:$0xff]   ;;  %v5284_v25 = vld [vmem:[%s4641_s28 + $0x28] sm:$0xf] }
  0x79   : > { %4007 = vmatpush3.bf16.msra.mxu1 %v4453_v49  ;;  %3994 = vmatprep.mubr.bf16.mxu1 %v3427_v31  ;;  %v4506_v49 = vld [vmem:[%s4641_s28 + $0x20] sm:$0x1]  ;;  %v3466_v57 = vcombine.low %v5194_v63, %v5198_v33  ;;  %v3443_v31 = vrot.slane %v916_v35, 9  ;;  %v3462_v0 = vcombine.low %v947_v46, %v950_v23  ;;  %v4465_v5 = vld [vmem:[%s4641_s28 + $0x24] sm:$0xff]   ;;  %v4472_v39 = vld [vmem:[%s5696_s1 + $0x1d0] sm:$0xff]  }
  0x7a   : > { %4133 = vmatpush3.bf16.msra.mxu0 %v4450_v15  ;;  %4008 = vmatprep.subr.bf16.mxu1 %v4455_v40  ;;  %v5169_v15 = vsel %vm4983_vm5, %v3441_v8, %v967_v13  ;;  %v956_v47 = vrot.slane %v4506_v49, 5  ;;  %v5233_v24 = vsel %vm4983_vm5, %v983_v48, %v984_v27  ;;  %v5242_v13 = vsel %vm4983_vm5, %v3444_v37, %v988_v10  ;;  %v4471_v35 = vld [vmem:[%s4641_s28 + $0x3c] sm:$0xff]   ;;  %v5303_v46 = vld [vmem:[%s4641_s28 + $0x34] sm:$0xf]  ;;  %v5326_v37 = vld [vmem:[%s4641_s28 + $0x38] sm:$0x1] }
  0x7b   : > { %4134 = vmatprep.subr.bf16.mxu0 %v4454_v51  ;;  %v3465_v34 = vcombine.low %v5169_v15, %v5173_v14  ;;  %v5229_v54 = vsel %vm4983_vm5, %v3443_v31, %v981_v61  ;;  %v4474_v38 = vld [vmem:[%s5696_s1 + $0x1d8] sm:$0xff]   ;;  %v2477_v27 = vshll.u32 %v5284_v25, 16  ;;  %v2501_v41 = vshll.u32 %v5303_v46, 16 }
  0x7c   : > { %v957_v42 = vsel %vm4983_vm5, %v955_v52, %v956_v47  ;;  %v3467_v20 = vcombine.low %v5229_v54, %v5233_v24  ;;  %v2471_v52 = vshll.u32 %v3684_v62, 16  ;;  %v2505_v10 = vshrl.u32 %v5303_v46, 16  ;;  %v4480_v54 = vld [vmem:[%s5696_s1 + $0x1e8] sm:$0xff]   ;;  %v4482_v24 = vld [vmem:[%s5696_s1 + $0xf0] sm:$0xff]  }
  0x7d   : > { %4119 = vmatmul.mubr.bf16.gmra.mrb[8].mxu0 %v3620_v2  ;;  %4009 = vmatpush3.bf16.msra.mxu1 %v4455_v40  ;;  %v3622_v40 = vcombine.low %v1959_v11, %v1962_v3  ;;  %v3463_v2 = vcombine.low %v954_v17, %v957_v42  ;;  %v4473_v11 = vld [vmem:[%s5696_s1 + $0xd8] sm:$0xff]   ;;  %v5287_v3 = vld [vmem:[%s4641_s28 + $0x2c] sm:$0x1]  ;;  %v2893_v36 = vrot.slane %v5303_v46, 5 }
  0x7e   : > { %4135 = vmatpush3.bf16.msra.mxu0 %v4454_v51  ;;  %4122 = vmatprep.mubr.bf16.mxu0 %v3621_v9  ;;  %v4463_v51 = vld [vmem:[%s4641_s28 + $0x18] sm:$0xff]   ;;  %v2487_v48 = vshll.u32 %v5287_v3, 16  ;;  %v2889_v46 = vrot.slane %v5287_v3, 5 }
  0x7f   : > { %4136 = vmatprep.subr.bf16.mxu0 %v4456_v1  ;;  %4010 = vmatprep.subr.bf16.mxu1 %v4459_v29  ;;  %v5258_v9 = vld [vmem:[%s4641_s28 + $0x1c] sm:$0xf] }
  0x80   : > { %3995 = vmatmul.mubr.bf16.gmra.mrb[12].mxu1 %v3428_v59  ;;  %v5246_v59 = vsel %vm4983_vm5, %v990_v45, %v991_v58  ;;  %v2453_v30 = vshll.u32 %v5258_v9, 16  ;;  %v2457_v32 = vshrl.u32 %v5258_v9, 16  ;;  %v4478_v58 = vld [vmem:[%s5696_s1 + $0x1e0] sm:$0xff]  }
  0x81   : > { %4011 = vmatpush3.bf16.msra.mxu1 %v4459_v29  ;;  %4014 = vmatprep.mubr.bf16.mxu1 %v3461_v55  ;;  %v3468_v4 = vcombine.low %v5242_v13, %v5246_v59  ;;  %v4469_v29 = vld [vmem:[%s4641_s28 + $0x30] sm:$0xff]   ;;  %v2468_v55 = vshrl.u32 %v3684_v62, 16  ;;  %v5370_v62 = vrot.slane %v2487_v48, 5 }
  0x82   : > { %4137 = vmatpush3.bf16.msra.mxu0 %v4456_v1  ;;  %4012 = vmatprep.subr.bf16.mxu1 %v4461_v7  ;;  %v3681_v1 = vld [vmem:[%s4641_s28 + $0x18] sm:$0xf]  ;;  %v5281_v49 = vrot.slane %v2453_v30, 5  ;;  %v2459_v47 = vrot.slane %v2457_v32, 4 }
  0x83   : > { %4138 = vmatprep.subr.bf16.mxu0 %v4460_v53  ;;  %v2444_v22 = vshrl.u32 %v3681_v1, 16  ;;  %v2447_v8 = vshll.u32 %v3681_v1, 16  ;;  %v2470_v14 = vrot.slane %v2468_v55, 4  ;;  %v4481_v1 = vld [vmem:[%s4641_s28 + $0x60] sm:$0xff]   ;;  %v4485_v55 = vld [vmem:[%s5696_s1 + $0xf8] sm:$0xff]  }
  0x85   : > { %4123 = vmatmul.mubr.bf16.gmra.mrb[12].mxu0 %v3622_v40  ;;  %4013 = vmatpush3.bf16.msra.mxu1 %v4461_v7  ;;  %v2446_v60 = vrot.slane %v2444_v22, 4  ;;  %v2449_v21 = vrot.slane %v2447_v8, 5  ;;  %v2463_v7 = vshll.u32 %v5263_v26, 16  ;;  %v2481_v40 = vshrl.u32 %v5284_v25, 16 }
  0x86   : > { %4139 = vmatpush3.bf16.msra.mxu0 %v4460_v53  ;;  %4142 = vmatprep.mubr.bf16.mxu0 %v4463_v51  ;;  %v3687_v53 = vld [vmem:[%s4641_s28 + $0x30] sm:$0xf]  ;;  %v5323_v51 = vrot.slane %v2477_v27, 5  ;;  %v5341_v8 = vrot.slane %v2501_v41, 5  ;;  %v5388_v27 = vld [vmem:[%s4641_s28 + $0x44] sm:$0x1] }
  0x87   : > { %4140 = vmatprep.subr.bf16.mxu0 %v4462_v16  ;;  %4030 = vmatprep.subr.bf16.mxu1 %v4464_v6  ;;  %v2450_v61 = vor.u32 %v2449_v21, %v2446_v60  ;;  %v2492_v31 = vshrl.u32 %v3687_v53, 16  ;;  %v5310_v15 = vrot.slane %v2463_v7, 5  ;;  %v2495_v17 = vshll.u32 %v3687_v53, 16 }
  0x88   : > { %4015 = vmatmul.mubr.bf16.vlgmr.msra.gmra.mrb[0].mxu1 %v3462_v0  ;;  %v2483_v42 = vrot.slane %v2481_v40, 4  ;;  %v3690_v0 = vld [vmem:[%s4641_s28 + $0x3c] sm:$0xf] }
  0x89   : > { %4031 = vmatpush3.bf16.msra.mxu1 %v4464_v6  ;;  %4018 = vmatprep.mubr.bf16.mxu1 %v3463_v2  ;;  %v5316_v23 = vrot.slane %v2450_v61, 4  ;;  %v5330_v45 = vrot.slane %v2492_v31, 4  ;;  %v2497_v22 = vrot.slane %v2495_v17, 5  ;;  %v2516_v32 = vshrl.u32 %v3690_v0, 16  ;;  %v4483_v31 = vld [vmem:[%s4641_s28 + $0x6c] sm:$0xff]  }
  0x8a   : > { %4141 = vmatpush3.bf16.msra.mxu0 %v4462_v16  ;;  %4032 = vmatprep.subr.bf16.mxu1 %v4467_v43  ;;  %v4479_v16 = vld [vmem:[%s5696_s1 + $0xe8] sm:$0xff]   ;;  %v2484_v30 = vor.u32 %v2483_v42, %v5323_v51  ;;  %v2519_v63 = vshll.u32 %v3690_v0, 16 }
  0x8b   : > { %4158 = vmatprep.subr.bf16.mxu0 %v4466_v19  ;;  %v2498_v53 = vor.u32 %v2497_v22, %v5330_v45  ;;  %v2518_v40 = vrot.slane %v2516_v32, 4  ;;  %v4488_v45 = vld [vmem:[%s4641_s28 + $0x18] sm:$0xff]   ;;  %v5426_v32 = vld [vmem:[%s4641_s28 + $0x64] sm:$0xf] }
  0x8c   : > { %v5381_v61 = vrot.slane %v2484_v30, 4  ;;  %v3699_v30 = vld [vmem:[%s4641_s28 + $0x60] sm:$0xf] }
  0x8d   : > { %4143 = vmatmul.mubr.bf16.vlgmr.msra.gmra.mrb[0].mxu0 %v4465_v5  ;;  %4033 = vmatpush3.bf16.msra.mxu1 %v4467_v43  ;;  %v5334_v43 = vld [vmem:[%s4641_s28 + $0x40] sm:$0xf]  ;;  %v2507_v5 = vrot.slane %v2505_v10, 4  ;;  %v2499_v41 = vrot.slane %v2498_v53, 4  ;;  %v2535_v10 = vshll.u32 %v5388_v27, 16 }
  0x8e   : > { %4159 = vmatpush3.bf16.msra.mxu0 %v4466_v19  ;;  %4146 = vmatprep.mubr.bf16.mxu0 %v4469_v29  ;;  %v4477_v19 = vld [vmem:[%s4641_s28 + $0x54] sm:$0xff]   ;;  %v2511_v29 = vshll.u32 %v5326_v37, 16  ;;  %v2525_v33 = vshll.u32 %v5334_v43, 16  ;;  %v5454_v53 = vld [vmem:[%s4641_s28 + $0x5c] sm:$0x1] }
  0x8f   : > { %4160 = vmatprep.subr.bf16.mxu0 %v4468_v56  ;;  %4034 = vmatprep.subr.bf16.mxu1 %v4470_v44 }
  0x90   : > { %4019 = vmatmul.mubr.bf16.gmra.mrb[4].mxu1 %v3464_v18  ;;  %v2460_v18 = vor.u32 %v2459_v47, %v5281_v49 }
  0x91   : > { %4035 = vmatpush3.bf16.msra.mxu1 %v4470_v44  ;;  %4022 = vmatprep.mubr.bf16.mxu1 %v3465_v34  ;;  %v2473_v34 = vrot.slane %v2471_v52, 5  ;;  %v5352_v44 = vld [vmem:[%s4641_s28 + $0x4c] sm:$0xf] }
  0x92   : > { %4161 = vmatpush3.bf16.msra.mxu0 %v4468_v56  ;;  %4036 = vmatprep.subr.bf16.mxu1 %v4473_v11  ;;  %v5328_v6 = vrot.slane %v2460_v18, 4  ;;  %v3693_v56 = vld [vmem:[%s4641_s28 + $0x48] sm:$0xf]  ;;  %v2549_v7 = vshll.u32 %v5352_v44, 16  ;;  %v2553_v47 = vshrl.u32 %v5352_v44, 16  ;;  %v4487_v52 = vld [vmem:[%s4641_s28 + $0xc] sm:$0xff]  }
  0x93   : > { %4162 = vmatprep.subr.bf16.mxu0 %v4472_v39  ;;  %v2474_v2 = vor.u32 %v2473_v34, %v2470_v14 }
  0x94   : > { %v2466_v60 = vsel %vm4686_vm2, %v5328_v6, %v5310_v15  ;;  %v5394_v15 = vld [vmem:[%s4641_s28 + $0x50] sm:$0x1]  ;;  %v5399_v48 = vrot.slane %v2549_v7, 5  ;;  %v5409_v6 = vld [vmem:[%s4641_s28 + $0x58] sm:$0xf] }
  0x95   : > { %4147 = vmatmul.mubr.bf16.gmra.mrb[4].mxu0 %v4471_v35  ;;  %4037 = vmatpush3.bf16.msra.mxu1 %v4473_v11  ;;  %v5368_v21 = vrot.slane %v2474_v2, 4  ;;  %v2543_v11 = vshll.u32 %v3693_v56, 16  ;;  %v2508_v35 = vor.u32 %v2507_v5, %v5341_v8  ;;  %v2559_v42 = vshll.u32 %v5394_v15, 16 }
  0x96   : > { %4163 = vmatpush3.bf16.msra.mxu0 %v4472_v39  ;;  %4150 = vmatprep.mubr.bf16.mxu0 %v4475_v50  ;;  %v2540_v39 = vshrl.u32 %v3693_v56, 16  ;;  %v2521_v50 = vrot.slane %v2519_v63, 5  ;;  %v2490_v2 = vsel %vm4686_vm2, %v5381_v61, %v5370_v62  ;;  %v2504_v63 = vsel %vm4686_vm2, %v2499_v41, %v5341_v8  ;;  %v5451_v61 = vld [vmem:[%s5696_s1 + $0x210] sm:$0xff]  }
  0x97   : > { %4164 = vmatprep.subr.bf16.mxu0 %v4474_v38  ;;  %4038 = vmatprep.subr.bf16.mxu1 %v4476_v12  ;;  %v2545_v34 = vrot.slane %v2543_v11, 5  ;;  %v2509_v13 = vrot.slane %v2508_v35, 4  ;;  %v2480_v0 = vsel %vm4686_vm2, %v5368_v21, %v5323_v51  ;;  %v4491_v51 = vld [vmem:[%s4641_s28 + $0x24] sm:$0xff]   ;;  %v2577_v56 = vshrl.u32 %v5409_v6, 16 }
  0x98   : > { %4023 = vmatmul.mubr.bf16.gmra.mrb[8].mxu1 %v3466_v57  ;;  %v2529_v57 = vshrl.u32 %v5334_v43, 16  ;;  %v2542_v14 = vrot.slane %v2540_v39, 4  ;;  %v2522_v59 = vor.u32 %v2521_v50, %v2518_v40  ;;  %v5444_v8 = vrot.slane %v2559_v42, 5  ;;  %v3702_v50 = vld [vmem:[%s4641_s28 + $0x6c] sm:$0xf] }
  0x99   : > { %4039 = vmatpush3.bf16.msra.mxu1 %v4476_v12  ;;  %4026 = vmatprep.mubr.bf16.mxu1 %v3467_v20  ;;  %v2456_v20 = vsel %vm4686_vm2, %v5316_v23, %v5281_v49  ;;  %v4484_v49 = vld [vmem:[%s5696_s1 + $0x1f0] sm:$0xff]   ;;  %v5390_v12 = vrot.slane %v2525_v33, 5  ;;  %v4486_v23 = vld [vmem:[%s5696_s1 + $0x1f8] sm:$0xff]   ;;  %v5432_v33 = vrot.slane %v2535_v10, 5  ;;  %v2588_v21 = vshrl.u32 %v3699_v30, 16 }
  0x9a   : > { %4165 = vmatpush3.bf16.msra.mxu0 %v4474_v38  ;;  %4040 = vmatprep.subr.bf16.mxu1 %v4479_v16  ;;  %v5385_v38 = vrot.slane %v2511_v29, 5  ;;  %v2531_v18 = vrot.slane %v2529_v57, 4  ;;  %v3721_v17 = vcombine.low %v2456_v20, %v2466_v60  ;;  %v2573_v57 = vshll.u32 %v5409_v6, 16 }
  0x9b   : > { %4166 = vmatprep.subr.bf16.mxu0 %v4478_v58  ;;  %v2523_v20 = vrot.slane %v2522_v59, 4  ;;  %v2591_v62 = vshll.u32 %v3699_v30, 16  ;;  %v2597_v39 = vshll.u32 %v5426_v32, 16  ;;  %v2601_v11 = vshrl.u32 %v5426_v32, 16 }
  0x9c   : > { %v5456_v35 = vrot.slane %v2573_v57, 5  ;;  %v2612_v59 = vshrl.u32 %v3702_v50, 16 }
  0x9d   : > { %4151 = vmatmul.mubr.bf16.gmra.mrb[8].mxu0 %v4477_v19  ;;  %4041 = vmatpush3.bf16.msra.mxu1 %v4479_v16  ;;  %v2555_v16 = vrot.slane %v2553_v47, 4  ;;  %v4489_v19 = vld [vmem:[%s5696_s1 + $0x200] sm:$0xff]   ;;  %v2528_v41 = vsel %vm4686_vm2, %v2523_v20, %v5390_v12 }
  0x9e   : > { %4167 = vmatpush3.bf16.msra.mxu0 %v4478_v58  ;;  %4154 = vmatprep.mubr.bf16.mxu0 %v4481_v1  ;;  %v3696_v58 = vld [vmem:[%s4641_s28 + $0x54] sm:$0xf]  ;;  %v2546_v1 = vor.u32 %v2545_v34, %v2542_v14  ;;  %v2593_v14 = vrot.slane %v2591_v62, 5  ;;  %v5463_v34 = vrot.slane %v2597_v39, 5 }
  0x9f   : > { %4168 = vmatprep.subr.bf16.mxu0 %v4480_v54  ;;  %4042 = vmatprep.subr.bf16.mxu1 %v4482_v24  ;;  %v2556_v22 = vor.u32 %v2555_v16, %v5399_v48  ;;  %v2564_v5 = vshrl.u32 %v3696_v58, 16  ;;  %v2567_v29 = vshll.u32 %v3696_v58, 16  ;;  %v2603_v16 = vrot.slane %v2601_v11, 4  ;;  %v5473_v58 = vld [vmem:[%s4641_s28 + $0x68] sm:$0x1] }
  0xa0   : > { %4027 = vmatmul.mubr.bf16.gmra.mrb[12].mxu1 %v3468_v4  ;;  %v2532_v4 = vor.u32 %v2531_v18, %v5390_v12  ;;  %v2547_v7 = vrot.slane %v2546_v1, 4  ;;  %v5461_v18 = vld [vmem:[%s4641_s28 + $0x70] sm:$0xf]  ;;  %v5482_v12 = vld [vmem:[%s5696_s1 + $0x218] sm:$0xff]   ;;  %v2583_v1 = vshll.u32 %v5454_v53, 16 }
  0xa1   : > { %4043 = vmatpush3.bf16.msra.mxu1 %v4482_v24  ;;  %4046 = vmatprep.mubr.bf16.mxu1 %v4487_v52  ;;  %v2514_v24 = vsel %vm4686_vm2, %v2509_v13, %v5385_v38  ;;  %v2557_v47 = vrot.slane %v2556_v22, 4  ;;  %v3722_v52 = vcombine.low %v2480_v0, %v2490_v2  ;;  %v2579_v38 = vrot.slane %v2577_v56, 4  ;;  %v4495_v13 = vld [vmem:[%s4641_s28 + $0x3c] sm:$0xff]   ;;  %v3741_v11 = vld [vmem:[%s4641_s28 + $0x48] sm:$0xe] }
  0xa2   : > { %4169 = vmatpush3.bf16.msra.mxu0 %v4480_v54  ;;  %4044 = vmatprep.subr.bf16.mxu1 %v4485_v55  ;;  %v5439_v54 = vld [vmem:[%s5696_s1 + $0x208] sm:$0xff]   ;;  %v2533_v60 = vrot.slane %v2532_v4, 4  ;;  %v3723_v40 = vcombine.low %v2504_v63, %v2514_v24  ;;  %v2615_v4 = vshll.u32 %v3702_v50, 16  ;;  %v2621_v42 = vshll.u32 %v5461_v18, 16 }
  0xa3   : > { %4170 = vmatprep.subr.bf16.mxu0 %v4484_v49  ;;  %v2552_v0 = vsel %vm4686_vm2, %v2547_v7, %v5399_v48  ;;  %v2580_v2 = vor.u32 %v2579_v38, %v5456_v35  ;;  %v2585_v20 = vrot.slane %v2583_v1, 5  ;;  %v4496_v7 = vld [vmem:[%s4641_s28 + $0x48] sm:$0xff]  }
  0xa4   : > { %v2617_v63 = vrot.slane %v2615_v4, 5  ;;  %v4498_v50 = vld [vmem:[%s5696_s1 + $0x228] sm:$0xff]  }
  0xa5   : > { %4155 = vmatmul.mubr.bf16.gmra.mrb[12].mxu0 %v4483_v31  ;;  %4045 = vmatpush3.bf16.msra.mxu1 %v4485_v55  ;;  %v2569_v55 = vrot.slane %v2567_v29, 5  ;;  %v2590_v31 = vrot.slane %v2588_v21, 4  ;;  %v2607_v29 = vshll.u32 %v5473_v58, 16  ;;  %v2581_v24 = vrot.slane %v2580_v2, 4  ;;  %v4497_v21 = vld [vmem:[%s5696_s1 + $0x220] sm:$0xff]  }
  0xa6   : > { %4171 = vmatpush3.bf16.msra.mxu0 %v4484_v49  ;;  %4174 = vmatprep.mubr.bf16.mxu0 %v3721_v17  ;;  %v2566_v49 = vrot.slane %v2564_v5, 4  ;;  %v4492_v17 = vld [vmem:[%s4641_s28 + $0x30] sm:$0xff]   ;;  %v2604_v5 = vor.u32 %v2603_v16, %v5463_v34  ;;  %v3743_v2 = vld [vmem:[%s4641_s28 + $0x60] sm:$0xe] }
  0xa7   : > { %4172 = vmatprep.subr.bf16.mxu0 %v4486_v23  ;;  %4222 = vmatprep.subr.bf16.mxu1 %v4489_v19  ;;  %v2594_v22 = vor.u32 %v2593_v14, %v2590_v31  ;;  %v3749_v31 = vrot.slane %v3741_v11, 9 }
  0xa8   : > { %4047 = vmatmul.mubr.bf16.vlgmr.msra.gmra.mrb[0].mxu1 %v4488_v45  ;;  %v2570_v10 = vor.u32 %v2569_v55, %v2566_v49  ;;  %v2625_v45 = vshrl.u32 %v5461_v18, 16  ;;  %v2605_v39 = vrot.slane %v2604_v5, 4  ;;  %v4499_v49 = vld [vmem:[%s4641_s28 + $0x54] sm:$0xff]  }
  0xa9   : > { %4230 = vmatpush3.bf16.msra.mxu1 %v4489_v19  ;;  %4050 = vmatprep.mubr.bf16.mxu1 %v4491_v51  ;;  %v2614_v51 = vrot.slane %v2612_v59, 4  ;;  %v2595_v62 = vrot.slane %v2594_v22, 4 }
  0xaa   : > { %4173 = vmatpush3.bf16.msra.mxu0 %v4486_v23  ;;  %4223 = vmatprep.subr.bf16.mxu1 %v5439_v54  ;;  %v2538_v23 = vsel %vm4686_vm2, %v2533_v60, %v5432_v33  ;;  %v2571_v30 = vrot.slane %v2570_v10, 4  ;;  %v5497_v33 = vrot.slane %v2621_v42, 5  ;;  %v2627_v57 = vrot.slane %v2625_v45, 4  ;;  %v5502_v60 = vld [vmem:[%s4641_s28 + $0x74] sm:$0x1] }
  0xab   : > { %4190 = vmatprep.subr.bf16.mxu0 %v4489_v19  ;;  %v3724_v48 = vcombine.low %v2528_v41, %v2538_v23  ;;  %v2618_v55 = vor.u32 %v2617_v63, %v2614_v51  ;;  %v2631_v38 = vshll.u32 %v5502_v60, 16  ;;  %v2600_v16 = vsel %vm4686_vm2, %v2595_v62, %v5463_v34  ;;  %v4502_v51 = vld [vmem:[%s5696_s1 + $0x238] sm:$0xff]  }
  0xac   : > { %v2882_v10 = vrot.slane %v5263_v26, 5  ;;  %v3742_v26 = vld [vmem:[%s4641_s28 + $0x54] sm:$0xe]  ;;  %v2921_v45 = vrot.slane %v5426_v32, 5  ;;  %v2886_v63 = vrot.slane %v5284_v25, 5  ;;  %v2931_v3 = vrot.slane %v5502_v60, 5 }
  0xad   : > { %4175 = vmatmul.mubr.bf16.vlgmr.msra.gmra.mrb[0].mxu0 %v3722_v52  ;;  %4231 = vmatpush3.bf16.msra.mxu1 %v5439_v54  ;;  %v2628_v52 = vor.u32 %v2627_v57, %v5497_v33  ;;  %v2633_v4 = vrot.slane %v2631_v38, 5  ;;  %v3751_v57 = vrot.slane %v3743_v2, 9 }
  0xae   : > { %4191 = vmatpush3.bf16.msra.mxu0 %v4489_v19  ;;  %4178 = vmatprep.mubr.bf16.mxu0 %v3723_v40  ;;  %v2562_v19 = vsel %vm4686_vm2, %v2557_v47, %v5444_v8  ;;  %v2907_v8 = vrot.slane %v5352_v44, 5  ;;  %v2879_v47 = vrot.slane %v5258_v9, 5  ;;  %v2576_v44 = vsel %vm4686_vm2, %v2571_v30, %v5456_v35  ;;  %v3737_v40 = vld [vmem:[%s4641_s28 + $0x18] sm:$0xe]  ;;  %v3738_v30 = vld [vmem:[%s4641_s28 + $0x24] sm:$0xe] }
  0xaf   : > { %4192 = vmatprep.subr.bf16.mxu0 %v5439_v54  ;;  %4224 = vmatprep.subr.bf16.mxu1 %v5451_v61  ;;  %v3725_v56 = vcombine.low %v2552_v0, %v2562_v19  ;;  %v2586_v9 = vsel %vm4686_vm2, %v2581_v24, %v2585_v20  ;;  %v2910_v35 = vrot.slane %v5394_v15, 5  ;;  %v3745_v41 = vrot.slane %v3737_v40, 9  ;;  %v4501_v0 = vld [vmem:[%s5696_s1 + $0x230] sm:$0xff]   ;;  %v4500_v19 = vld [vmem:[%s4641_s28 + $0x60] sm:$0xff]  }
  0xb0   : > { %4051 = vmatmul.mubr.bf16.gmra.mrb[4].mxu1 %v4492_v17  ;;  %v2909_v14 = vrot.slane %v2907_v8, 4  ;;  %v2914_v17 = vrot.slane %v5409_v6, 5  ;;  %v2881_v23 = vrot.slane %v2879_v47, 4  ;;  %v3726_v15 = vcombine.low %v2576_v44, %v2586_v9 }
  0xb1   : > { %4232 = vmatpush3.bf16.msra.mxu1 %v5451_v61  ;;  %4054 = vmatprep.mubr.bf16.mxu1 %v4495_v13  ;;  %v2619_v13 = vrot.slane %v2618_v55, 4  ;;  %v2629_v59 = vrot.slane %v2628_v52, 4  ;;  %v2908_v42 = vsel %vm4983_vm5, %v3749_v31, %v2907_v8  ;;  %v2880_v22 = vsel %vm4983_vm5, %v3745_v41, %v2879_v47  ;;  %v3739_v8 = vld [vmem:[%s4641_s28 + $0x30] sm:$0xe] }
  0xb2   : > { %4193 = vmatpush3.bf16.msra.mxu0 %v5439_v54  ;;  %4225 = vmatprep.subr.bf16.mxu1 %v5482_v12  ;;  %v2609_v54 = vrot.slane %v2607_v29, 5  ;;  %v2911_v6 = vsel %vm4983_vm5, %v2909_v14, %v2910_v35  ;;  %v2916_v1 = vrot.slane %v2914_v17, 4  ;;  %v2883_v5 = vsel %vm4983_vm5, %v2881_v23, %v2882_v10  ;;  %v3740_v14 = vld [vmem:[%s4641_s28 + $0x3c] sm:$0xe] }
  0xb3   : > { %4194 = vmatprep.subr.bf16.mxu0 %v5451_v61  ;;  %v2624_v32 = vsel %vm4686_vm2, %v2619_v13, %v5497_v33  ;;  %v2634_v29 = vsel %vm4686_vm2, %v2629_v59, %v2633_v4  ;;  %v2924_v24 = vrot.slane %v5473_v58, 5  ;;  %v3746_v33 = vrot.slane %v3738_v30, 9 }
  0xb4   : > { %v3769_v62 = vcombine.low %v2880_v22, %v2883_v5  ;;  %v2928_v58 = vrot.slane %v5461_v18, 5  ;;  %v3747_v47 = vrot.slane %v3739_v8, 9  ;;  %v2895_v44 = vrot.slane %v2893_v36, 4 }
  0xb5   : > { %4179 = vmatmul.mubr.bf16.gmra.mrb[4].mxu0 %v3724_v48  ;;  %4233 = vmatpush3.bf16.msra.mxu1 %v5482_v12  ;;  %v3773_v48 = vcombine.low %v2908_v42, %v2911_v6  ;;  %v2887_v40 = vsel %vm4983_vm5, %v3746_v33, %v2886_v63  ;;  %v2903_v41 = vrot.slane %v5388_v27, 5 }
  0xb6   : > { %4195 = vmatpush3.bf16.msra.mxu0 %v5451_v61  ;;  %4182 = vmatprep.mubr.bf16.mxu0 %v3725_v56  ;;  %v2610_v61 = vsel %vm4686_vm2, %v2605_v39, %v2609_v54  ;;  %v2923_v56 = vrot.slane %v2921_v45, 4  ;;  %v2888_v39 = vrot.slane %v2886_v63, 4  ;;  %v2922_v54 = vsel %vm4983_vm5, %v3751_v57, %v2921_v45 }
  0xb7   : > { %4196 = vmatprep.subr.bf16.mxu0 %v5482_v12  ;;  %4226 = vmatprep.subr.bf16.mxu1 %v4497_v21  ;;  %v3727_v34 = vcombine.low %v2600_v16, %v2610_v61  ;;  %v2930_v38 = vrot.slane %v2928_v58, 4 }
  0xb8   : > { %4055 = vmatmul.mubr.bf16.gmra.mrb[8].mxu1 %v4496_v7  ;;  %v2925_v11 = vsel %vm4983_vm5, %v2923_v56, %v2924_v24  ;;  %v3744_v7 = vld [vmem:[%s4641_s28 + $0x6c] sm:$0xe]  ;;  %v2890_v9 = vsel %vm4983_vm5, %v2888_v39, %v2889_v46  ;;  %s3382_s28 = sshll.u32 %s4529_s15, 3 }
  0xb9   : > { %4234 = vmatpush3.bf16.msra.mxu1 %v4497_v21  ;;  %4058 = vmatprep.mubr.bf16.mxu1 %v4499_v49  ;;  %v2896_v49 = vrot.slane %v5326_v37, 5  ;;  %v3775_v18 = vcombine.low %v2922_v54, %v2925_v11  ;;  %v3752_v52 = vrot.slane %v3744_v7, 9  ;;  %v2894_v37 = vsel %vm4983_vm5, %v3747_v47, %v2893_v36  ;;  %p272_p6 = scmp.lt.s32.totalorder %s3382_s28, 15  ;;  %v5619_v54 = vld [vmem:[%s5698_s3] ss:$0 sm:$0xff] }
  0xba   : > { %4197 = vmatpush3.bf16.msra.mxu0 %v5482_v12  ;;  %4227 = vmatprep.subr.bf16.mxu1 %v4498_v50  ;;  %v2917_v12 = vrot.slane %v5454_v53, 5  ;;  %v3750_v53 = vrot.slane %v3742_v26, 9  ;;  %v3770_v60 = vcombine.low %v2887_v40, %v2890_v9  ;;  %v2932_v16 = vsel %vm4983_vm5, %v2930_v38, %v2931_v3 }
  0xbb   : > { %4198 = vmatprep.subr.bf16.mxu0 %v4497_v21  ;;  %v2897_v31 = vsel %vm4983_vm5, %v2895_v44, %v2896_v49  ;;  %v2929_v35 = vsel %vm4983_vm5, %v3752_v52, %v2928_v58  ;;  %s5726_s28 = smov (!%p272_p6, %s3382_s28), 15 }
  0xbc   : > { %v2918_v20 = vsel %vm4983_vm5, %v2916_v1, %v2917_v12  ;;  %v2915_v25 = vsel %vm4983_vm5, %v3750_v53, %v2914_v17  ;;  %v3771_v61 = vcombine.low %v2894_v37, %v2897_v31  ;;  %v3776_v23 = vcombine.low %v2929_v35, %v2932_v16  ;;  %s3383_s26 = sshll.u32 %s5726_s28, 1 }
  0xbd   : > { %4183 = vmatmul.mubr.bf16.gmra.mrb[8].mxu0 %v3726_v15  ;;  %4235 = vmatpush3.bf16.msra.mxu1 %v4498_v50  ;;  %v3774_v55 = vcombine.low %v2915_v25, %v2918_v20  ;;  %s279_s15 = sadd.s32 %s3384_s27, %s3383_s26 }
  0xbe   : > { %4199 = vmatpush3.bf16.msra.mxu0 %v4497_v21  ;;  %4186 = vmatprep.mubr.bf16.mxu0 %v3727_v34  ;;  %v3728_v21 = vcombine.low %v2624_v32, %v2634_v29  ;;  %s3385_s16 = sshll.u32 %s279_s15, 3 }
  0xbf   : > { %4200 = vmatprep.subr.bf16.mxu0 %v4498_v50  ;;  %4228 = vmatprep.subr.bf16.mxu1 %v4501_v0  ;;  %s5628_s9 = scalar_lea.vmem %s5699_s4, %s3385_s16 }
  0xc0   : > { %4059 = vmatmul.mubr.bf16.gmra.mrb[12].mxu1 %v4500_v19 }
  0xc1   : > { %4236 = vmatpush3.bf16.msra.mxu1 %v4501_v0  ;;  %4214 = vmatprep.mubr.bf16.mxu1 %v3773_v48 }
  0xc2   : > { %4201 = vmatpush3.bf16.msra.mxu0 %v4498_v50  ;;  %4229 = vmatprep.subr.bf16.mxu1 %v4502_v51  ;;  %v2900_v50 = vrot.slane %v5334_v43, 5  ;;  %v3748_v43 = vrot.slane %v3740_v14, 9 }
  0xc3   : > { %4202 = vmatprep.subr.bf16.mxu0 %v4501_v0 }
  0xc4   : > { %v2902_v17 = vrot.slane %v2900_v50, 4  ;;  %v2901_v10 = vsel %vm4983_vm5, %v3748_v43, %v2900_v50 }
  0xc5   : > { %4187 = vmatmul.mubr.bf16.gmra.mrb[12].mxu0 %v3728_v21  ;;  %4237 = vmatpush3.bf16.msra.mxu1 %v4502_v51 }
  0xc6   : > { %4203 = vmatpush3.bf16.msra.mxu0 %v4501_v0  ;;  %4206 = vmatprep.mubr.bf16.mxu0 %v3769_v62  ;;  %v2904_v15 = vsel %vm4983_vm5, %v2902_v17, %v2903_v41  ;;  %v5614_v62 = vld [vmem:[%s5697_s2] ss:$0 sm:$0xff] }
  0xc7   : > { %4204 = vmatprep.subr.bf16.mxu0 %v4502_v51  ;;  %v3772_v13 = vcombine.low %v2901_v10, %v2904_v15 }
  0xc8   : > { %4215 = vmatmul.mubr.bf16.vlgmr.msra.gmra.mrb[16].mxu1 %v3774_v55 }
  0xc9   : > { %4218 = vmatprep.mubr.bf16.mxu1 %v3775_v18 }
  0xca   : > { %4205 = vmatpush3.bf16.msra.mxu0 %v4502_v51 }
  0xcd   : > { %4207 = vmatmul.mubr.bf16.vlgmr.msra.gmra.mrb[0].mxu0 %v3770_v60 }
  0xce   : > { %4210 = vmatprep.mubr.bf16.mxu0 %v3771_v61 }
  0xd0   : > { %4219 = vmatmul.mubr.bf16.gmra.mrb[20].mxu1 %v3776_v23 }
  0xd5   : > { %4211 = vmatmul.mubr.bf16.gmra.mrb[4].mxu0 %v3772_v13 }
 0x17b   : > { %v4048_v59 = vpop.f32.mrb[0].mxu1 }
 0x17c   : > { %v1370_v4 = vpop.f32.mrb[1].mxu1 }
 0x17d   : > { %v5597_v34 = vpop.f32.mrb[2].mxu1 }
 0x17e   : > { %v5599_v42 = vpop.f32.mrb[3].mxu1 }
 0x183   : > { %v5601_v27 = vpop.f32.mrb[4].mxu1 }
 0x184   : > { %v5603_v6 = vpop.f32.mrb[5].mxu1 }
 0x185   : > { %v5605_v26 = vpop.f32.mrb[6].mxu1 }
 0x186   : > { %v5607_v45 = vpop.f32.mrb[7].mxu1 }
 0x18b   : > { %v4056_v28 = vpop.f32.mrb[8].mxu1 }
 0x18c   : > { %v1402_v0 = vpop.f32.mrb[9].mxu1 }
 0x18d   : > { %v4057_v2 = vpop.f32.mrb[10].mxu1 }
 0x18e   : > { %v1405_v1 = vpop.f32.mrb[11].mxu1 }
 0x190   : > { %v4184_v12 = vpop.f32.mrb[8].mxu0 }
 0x191   : > { %v4246_v19 = vadd.f32 %v4184_v12, %v4056_v28  ;;  %v2798_v22 = vpop.f32.mrb[9].mxu0 }
 0x192   : > { %v4248_v5 = vadd.f32 %v2798_v22, %v1402_v0  ;;  %v4185_v32 = vpop.f32.mrb[10].mxu0 }
 0x193   : > { %v4250_v29 = vadd.f32 %v4185_v32, %v4057_v2  ;;  %v2801_v48 = vpop.f32.mrb[11].mxu0  ;;  %v4060_v30 = vpop.f32.mrb[12].mxu1 }
 0x194   : > { %v4252_v53 = vadd.f32 %v2801_v48, %v1405_v1  ;;  %v1418_v51 = vpop.f32.mrb[13].mxu1 }
 0x195   : > { %v4061_v63 = vpop.f32.mrb[14].mxu1 }
 0x196   : > { %v1421_v57 = vpop.f32.mrb[15].mxu1 }
 0x198   : > { %v4188_v56 = vpop.f32.mrb[12].mxu0 }
 0x199   : > { %v4254_v24 = vadd.f32 %v4188_v56, %v4060_v30  ;;  %v2814_v36 = vpop.f32.mrb[13].mxu0 }
 0x19a   : > { %v4256_v33 = vadd.f32 %v2814_v36, %v1418_v51  ;;  %v4189_v20 = vpop.f32.mrb[14].mxu0 }
 0x19b   : > { %v4258_v8 = vadd.f32 %v4189_v20, %v4061_v63  ;;  %v2817_v21 = vpop.f32.mrb[15].mxu0  ;;  %v4216_v25 = vpop.f32.mrb[16].mxu1 }
 0x19c   : > { %v4260_v58 = vadd.f32 %v2817_v21, %v1421_v57  ;;  %v4247_v39 = vadd.f32 %v4246_v19, %v4216_v25  ;;  %v3096_v46 = vpop.f32.mrb[17].mxu1 }
 0x19d   : > { %v4249_v11 = vadd.f32 %v4248_v5, %v3096_v46  ;;  %v4217_v7 = vpop.f32.mrb[18].mxu1 }
 0x19e   : > { %v3160_v47 = vmul.f32 %v4247_v39, %v5614_v62  ;;  %v4251_v44 = vadd.f32 %v4250_v29, %v4217_v7  ;;  %v3099_v49 = vpop.f32.mrb[19].mxu1 }
 0x19f   : > { %v3158_v55 = vmul.f32 %v4249_v11, %v5614_v62  ;;  %v4253_v18 = vadd.f32 %v4252_v53, %v3099_v49 }
 0x1a0   : > { %v4208_v52 = vpop.f32.mrb[0].mxu0  ;;  %v3183_v38 = vadd.f32 %v5619_v54, %v3160_v47  ;;  %v3161_v3 = vmul.f32 %v4251_v44, %v5614_v62 }
 0x1a1   : > { %v4238_v40 = vadd.f32 %v4208_v52, %v4048_v59  ;;  %v3064_v9 = vpop.f32.mrb[1].mxu0  ;;  %v3181_v50 = vadd.f32 %v5619_v54, %v3158_v55  ;;  %v3159_v37 = vmul.f32 %v4253_v18, %v5614_v62 }
 0x1a2   : > { %v3199_v31 = vmax.f32 %v3183_v38, 0.0  ;;  %v4239_v14 = vadd.f32 %v3064_v9, %v1370_v4  ;;  %v4209_v60 = vpop.f32.mrb[2].mxu0  ;;  %v3184_v35 = vadd.f32 %v5619_v54, %v3161_v3 }
 0x1a3   : > { %v3152_v16 = vmul.f32 %v4238_v40, %v5614_v62  ;;  %v3197_v61 = vmax.f32 %v3181_v50, 0.0  ;;  %v4240_v43 = vadd.f32 %v4209_v60, %v5597_v34  ;;  %v3067_v17 = vpop.f32.mrb[3].mxu0  ;;  %v3182_v41 = vadd.f32 %v5619_v54, %v3159_v37  ;;  %v4220_v23 = vpop.f32.mrb[20].mxu1 }
 0x1a4   : > { %3215 = vst [vmem:[%s5628_s9 + $0x50] sm:$0xff] %v3199_v31  ;;  %v3150_v10 = vmul.f32 %v4239_v14, %v5614_v62  ;;  %v3200_v15 = vmax.f32 %v3184_v35, 0.0  ;;  %v4241_v13 = vadd.f32 %v3067_v17, %v5599_v42  ;;  %v4255_v59 = vadd.f32 %v4254_v24, %v4220_v23  ;;  %v3112_v4 = vpop.f32.mrb[21].mxu1 }
 0x1a5   : > { %v3175_v28 = vadd.f32 %v5619_v54, %v3152_v16  ;;  %3213 = vst [vmem:[%s5628_s9 + $0x40] sm:$0xff] %v3197_v61  ;;  %v3153_v0 = vmul.f32 %v4240_v43, %v5614_v62  ;;  %v3198_v34 = vmax.f32 %v3182_v41, 0.0  ;;  %v4257_v2 = vadd.f32 %v4256_v33, %v3112_v4  ;;  %v4221_v1 = vpop.f32.mrb[22].mxu1 }
 0x1a6   : > { %v3173_v12 = vadd.f32 %v5619_v54, %v3150_v10  ;;  %3216 = vst [vmem:[%s5628_s9 + $0x58] sm:$0xff] %v3200_v15  ;;  %v3151_v19 = vmul.f32 %v4241_v13, %v5614_v62  ;;  %v3164_v22 = vmul.f32 %v4255_v59, %v5614_v62  ;;  %v4259_v42 = vadd.f32 %v4258_v8, %v4221_v1  ;;  %v3115_v5 = vpop.f32.mrb[23].mxu1 }
 0x1a7   : > { %v3191_v32 = vmax.f32 %v3175_v28, 0.0  ;;  %v3176_v29 = vadd.f32 %v5619_v54, %v3153_v0  ;;  %3214 = vst [vmem:[%s5628_s9 + $0x48] sm:$0xff] %v3198_v34  ;;  %v3162_v48 = vmul.f32 %v4257_v2, %v5614_v62  ;;  %v4261_v30 = vadd.f32 %v4260_v58, %v3115_v5 }
 0x1a8   : > { %v3189_v53 = vmax.f32 %v3173_v12, 0.0  ;;  %v3174_v51 = vadd.f32 %v5619_v54, %v3151_v19  ;;  %v4212_v63 = vpop.f32.mrb[4].mxu0  ;;  %v3187_v57 = vadd.f32 %v5619_v54, %v3164_v22  ;;  %v3165_v56 = vmul.f32 %v4259_v42, %v5614_v62 }
 0x1a9   : > { %3207 = vst [vmem:[%s5628_s9 + $0x10] sm:$0xff] %v3191_v32  ;;  %v3192_v24 = vmax.f32 %v3176_v29, 0.0  ;;  %v4242_v36 = vadd.f32 %v4212_v63, %v5601_v27  ;;  %v3080_v33 = vpop.f32.mrb[5].mxu0  ;;  %v3185_v20 = vadd.f32 %v5619_v54, %v3162_v48  ;;  %v3163_v8 = vmul.f32 %v4261_v30, %v5614_v62 }
 0x1aa   : > { %3205 = vst [vmem:[%s5628_s9] sm:$0xff] %v3189_v53  ;;  %v3190_v21 = vmax.f32 %v3174_v51, 0.0  ;;  %v3203_v25 = vmax.f32 %v3187_v57, 0.0  ;;  %v4243_v58 = vadd.f32 %v3080_v33, %v5603_v6  ;;  %v4213_v39 = vpop.f32.mrb[6].mxu0  ;;  %v3188_v46 = vadd.f32 %v5619_v54, %v3165_v56 }
 0x1ab   : > { %3208 = vst [vmem:[%s5628_s9 + $0x18] sm:$0xff] %v3192_v24  ;;  %v3156_v27 = vmul.f32 %v4242_v36, %v5614_v62  ;;  %v3201_v11 = vmax.f32 %v3185_v20, 0.0  ;;  %v4244_v7 = vadd.f32 %v4213_v39, %v5605_v26  ;;  %v3083_v47 = vpop.f32.mrb[7].mxu0  ;;  %v3186_v44 = vadd.f32 %v5619_v54, %v3163_v8 }
 0x1ac   : > { %3206 = vst [vmem:[%s5628_s9 + $0x8] sm:$0xff] %v3190_v21  ;;  %3219 = vst [vmem:[%s5628_s9 + $0x70] sm:$0xff] %v3203_v25  ;;  %v3154_v49 = vmul.f32 %v4243_v58, %v5614_v62  ;;  %v3204_v6 = vmax.f32 %v3188_v46, 0.0  ;;  %v4245_v55 = vadd.f32 %v3083_v47, %v5607_v45 }
 0x1ad   : > { %v3179_v18 = vadd.f32 %v5619_v54, %v3156_v27  ;;  %3217 = vst [vmem:[%s5628_s9 + $0x60] sm:$0xff] %v3201_v11  ;;  %v3157_v26 = vmul.f32 %v4244_v7, %v5614_v62  ;;  %v3202_v52 = vmax.f32 %v3186_v44, 0.0 }
 0x1ae   : > { %v3177_v38 = vadd.f32 %v5619_v54, %v3154_v49  ;;  %3220 = vst [vmem:[%s5628_s9 + $0x78] sm:$0xff] %v3204_v6  ;;  %v3155_v3 = vmul.f32 %v4245_v55, %v5614_v62 }
 0x1af   : > { %v3195_v40 = vmax.f32 %v3179_v18, 0.0  ;;  %v3180_v9 = vadd.f32 %v5619_v54, %v3157_v26  ;;  %3218 = vst [vmem:[%s5628_s9 + $0x68] sm:$0xff] %v3202_v52 }
 0x1b0   : > { %v3193_v50 = vmax.f32 %v3177_v38, 0.0  ;;  %v3178_v45 = vadd.f32 %v5619_v54, %v3155_v3 }
 0x1b1   : > { %3211 = vst [vmem:[%s5628_s9 + $0x30] sm:$0xff] %v3195_v40  ;;  %v3196_v37 = vmax.f32 %v3180_v9, 0.0 }
 0x1b2   : > { %3209 = vst [vmem:[%s5628_s9 + $0x20] sm:$0xff] %v3193_v50  ;;  %v3194_v31 = vmax.f32 %v3178_v45, 0.0 }
 0x1b3   : > { %3212 = vst [vmem:[%s5628_s9 + $0x38] sm:$0xff] %v3196_v37 }
 0x1b4   : > { %3210 = vst [vmem:[%s5628_s9 + $0x28] sm:$0xff] %v3194_v31 }
 0x1b5 PF: > { %s14_s19 = sadd.s32 1, %s4545_s19   ;;  %s5713_s15 = smov %s4537_s17 }
 0x1b6   : > { %p11_p7 = scmp.ge.s32.totalorder %s14_s19, 6   ;;  %s5714_s16 = smov %s4541_s18 }
 0x1b7   : > { %s5715_s17 = smov %s5718_s20  ;;  %s5716_s18 = smov %s5722_s21 }
 0x1b8   :  { %13 = sbr.rel (!%p11_p7) target bundleno = 3 (0x3), region = 86 }

// kernel: residual_block_forward.5
= control target key start
LH: loop header
LB: loop body
LE: loop exit
PB: predicated region body
PF: predicated region fallthrough
CT: control target
= control target key end

     0   :  { %s4714_s18 = smov 0   ;;  %s4716_s19 = smov 0   ;;  %s5874_s0 = inlined_call_operand.vmem [shape: bf16[2,18,18,128], index: 0, kind: input, shape index: {}]   ;;  %s5875_s1 = inlined_call_operand.vmem [shape: bf16[9,128,128], index: 1, kind: input, shape index: {}]   ;;  %s5876_s2 = inlined_call_operand.vmem [shape: f32[1,128], index: 2, kind: input, shape index: {}]   ;;  %s5877_s3 = inlined_call_operand.vmem [shape: f32[1,128], index: 3, kind: input, shape index: {}]   ;;  %s5878_s4 = inlined_call_operand.vmem [shape: f32[2,16,16,128], index: 4, kind: input, shape index: {}]   ;;  %s5879_s5 = inlined_call_operand.vmem [shape: f32[2,16,16,128], index: 5, kind: output, shape index: {}]  }
   0x1   :  { %s4718_s20 = smov 0   ;;  %s4720_s21 = smov 0  }
   0x2   :  { %s4722_s22 = smov 0  }
   0x3 LB: > { %s30_s23 = sadd.s32 1, %s4674_s20  ;;  %s34_s24 = sadd.s32 1, %s4678_s21  ;;  %s4682_s22 = sphi %s4722_s22, %s15_s22   ;;  %s4678_s21 = sphi %s4720_s21, %s5896_s21   ;;  %s4674_s20 = sphi %s4718_s20, %s5895_s20   ;;  %s4670_s19 = sphi %s4716_s19, %s5894_s19   ;;  %s4666_s18 = sphi %s4714_s18, %s5893_s18  }
   0x4   : > { %p32_p0 = scmp.ge.s32.totalorder %s30_s23, 2  ;;  %p3513_p1 = scmp.ge.s32.totalorder %s4682_s22, 1 }
   0x5   : > { %p258_p2 = scmp.lt.s32.totalorder %s4682_s22, 5 }
   0x6   : > { %s5898_s23 = smov (%p32_p0, %s30_s23), 0  ;;  %s5900_s24 = smov (!%p32_p0, %s34_s24), %s4678_s21 }
   0x7   : > { %p259_p3 = pnand %p3513_p1, %p258_p2  ;;  %p36_p4 = scmp.ge.s32.totalorder %s5900_s24, 2 }
   0x9   : > { %s5902_s24 = smov (%p36_p4, %s5900_s24), 0  ;;  %262 = sbr.rel (%p259_p3) target bundleno = 441 (0x1b9), region = 40 }
  0x10   : > { %v4544_v0 = vld [vmem:[%s5875_s1 + $0x40] sm:$0xff]   ;;  %p317_p5 = scmp.lt.s32.totalorder %s4670_s19, 1  ;;  %v4546_v2 = vld [vmem:[%s5875_s1 + $0x48] sm:$0xff]   ;;  %v4548_v4 = vld [vmem:[%s5875_s1 + $0x50] sm:$0xff]   ;;  %s3926_s17 = smul.u32 96, %s4666_s18  ;;  %vm1011_vm3 = vcmask 1042432  }
  0x11   : > { %v4545_v1 = vld [vmem:[%s5875_s1 + $0x100] sm:$0xff]   ;;  %4071 = vmatprep.subr.bf16.mxu1 %v4544_v0  ;;  %v4547_v3 = vld [vmem:[%s5875_s1 + $0x108] sm:$0xff]   ;;  %v4549_v5 = vld [vmem:[%s5875_s1 + $0x110] sm:$0xff]   ;;  %vm405_vm0 = vsmask.f32 3328  ;;  %vm1012_vm4 = vcmask 1046532  }
  0x12   : > { %s5904_s19 = smov (!%p317_p5, %s4670_s19), 1  ;;  %4199 = vmatprep.subr.bf16.mxu0 %v4545_v1  ;;  %4072 = vmatpush3.bf16.msra.mxu1 %v4544_v0  ;;  %v4550_v6 = vld [vmem:[%s5875_s1 + $0x58] sm:$0xff]   ;;  %v4552_v8 = vld [vmem:[%s5875_s1 + $0x60] sm:$0xff]   ;;  %v4554_v10 = vld [vmem:[%s5875_s1 + $0x68] sm:$0xff]   ;;  %vm406_vm1 = vsmask.f32 7440 }
  0x13   : > { %4200 = vmatpush3.bf16.msra.mxu0 %v4545_v1  ;;  %4073 = vmatprep.subr.bf16.mxu1 %v4546_v2  ;;  %s4503_s12 = smul.u32 216, %s5904_s19  ;;  %v4551_v7 = vld [vmem:[%s5875_s1 + $0x118] sm:$0xff]   ;;  %v4553_v9 = vld [vmem:[%s5875_s1 + $0x120] sm:$0xff]   ;;  %v4555_v11 = vld [vmem:[%s5875_s1 + $0x128] sm:$0xff]   ;;  %s3517_s14 = sshll.u32 %s5904_s19, 5 }
  0x14   : > { %4201 = vmatprep.subr.bf16.mxu0 %v4547_v3  ;;  %v4556_v25 = vld [vmem:[%s5875_s1 + $0x70] sm:$0xff]   ;;  %v4558_v35 = vld [vmem:[%s5875_s1 + $0x78] sm:$0xff]   ;;  %vm4828_vm2 = vmor %vm405_vm0, %vm406_vm1 }
  0x15   : > { %s321_s27 = scalar_lea.vmem %s5874_s0, %s4503_s12  ;;  %v4557_v29 = vld [vmem:[%s5875_s1 + $0x130] sm:$0xff]   ;;  %v4559_v50 = vld [vmem:[%s5875_s1 + $0x138] sm:$0xff]   ;;  %vm5125_vm5 = vmor %vm1011_vm3, %vm1012_vm4 }
  0x16   : > { %4074 = vmatpush3.bf16.msra.mxu1 %v4546_v2  ;;  %s4783_s7 = scalar_lea.vmem %s321_s27, %s3926_s17  ;;  %v4560_v2 = vld [vmem:[%s5875_s1] sm:$0xff]  }
  0x17   : > { %4202 = vmatpush3.bf16.msra.mxu0 %v4547_v3  ;;  %4075 = vmatprep.subr.bf16.mxu1 %v4548_v4  ;;  %v4792_v12 = vld [vmem:[%s4783_s7] sm:$0xf]  ;;  %v4795_v13 = vld [vmem:[%s4783_s7 + $0x4] sm:$0xf]  ;;  %v4798_v14 = vld [vmem:[%s4783_s7 + $0x8] sm:$0x1] }
  0x18   : > { %4203 = vmatprep.subr.bf16.mxu0 %v4549_v5  ;;  %v409_v15 = vshrl.u32 %v4792_v12, 16  ;;  %v412_v16 = vshll.u32 %v4792_v12, 16  ;;  %v418_v17 = vshll.u32 %v4795_v13, 16  ;;  %v422_v18 = vshrl.u32 %v4795_v13, 16  ;;  %v3664_v20 = vld [vmem:[%s4783_s7 + $0xc] sm:$0xf] }
  0x19   : > { %v428_v19 = vshll.u32 %v4798_v14, 16  ;;  %v4807_v23 = vld [vmem:[%s4783_s7 + $0x10] sm:$0xf]  ;;  %v4810_v24 = vld [vmem:[%s4783_s7 + $0x14] sm:$0x1]  ;;  %v1551_v28 = vshrl.u32 %v3664_v20, 16 }
  0x1a   : > { %4076 = vmatpush3.bf16.msra.mxu1 %v4548_v4  ;;  %v411_v21 = vrot.slane %v409_v15, 4  ;;  %v414_v22 = vrot.slane %v412_v16, 5  ;;  %v420_v26 = vrot.slane %v418_v17, 5  ;;  %v424_v27 = vrot.slane %v422_v18, 4  ;;  %v4821_v34 = vld [vmem:[%s4783_s7 + $0xc] sm:$0xf] }
  0x1b   : > { %4204 = vmatpush3.bf16.msra.mxu0 %v4549_v5  ;;  %4077 = vmatprep.subr.bf16.mxu1 %v4550_v6  ;;  %v1554_v31 = vshll.u32 %v3664_v20, 16  ;;  %v1560_v32 = vshll.u32 %v4807_v23, 16  ;;  %v1564_v33 = vshrl.u32 %v4807_v23, 16  ;;  %v430_v38 = vrot.slane %v428_v19, 5  ;;  %v4834_v41 = vld [vmem:[%s4783_s7 + $0x10] sm:$0xf] }
  0x1c   : > { %4205 = vmatprep.subr.bf16.mxu0 %v4551_v7  ;;  %v415_v30 = vor.u32 %v414_v22, %v411_v21  ;;  %v425_v37 = vor.u32 %v424_v27, %v420_v26  ;;  %v1553_v39 = vrot.slane %v1551_v28, 4  ;;  %v1570_v40 = vshll.u32 %v4810_v24, 16  ;;  %v4844_v54 = vld [vmem:[%s4783_s7 + $0x14] sm:$0x1]  ;;  %v3667_v56 = vld [vmem:[%s4783_s7 + $0x18] sm:$0xf] }
  0x1d   : > { %v1556_v43 = vrot.slane %v1554_v31, 5  ;;  %v1562_v44 = vrot.slane %v1560_v32, 5  ;;  %v1566_v45 = vrot.slane %v1564_v33, 4  ;;  %v433_v48 = vshrl.u32 %v4821_v34, 16  ;;  %v4852_v61 = vld [vmem:[%s4783_s7 + $0x1c] sm:$0xf] }
  0x1e   : > { %4078 = vmatpush3.bf16.msra.mxu1 %v4550_v6  ;;  %v416_v42 = vrot.slane %v415_v30, 4  ;;  %v426_v46 = vrot.slane %v425_v37, 4  ;;  %v1572_v47 = vrot.slane %v1570_v40, 5  ;;  %v436_v49 = vshll.u32 %v4821_v34, 16  ;;  %v4860_v3 = vld [vmem:[%s5875_s1 + $0x140] sm:$0xff]  }
  0x1f   : > { %4206 = vmatpush3.bf16.msra.mxu0 %v4551_v7  ;;  %4079 = vmatprep.subr.bf16.mxu1 %v4552_v8  ;;  %v1557_v52 = vor.u32 %v1556_v43, %v1553_v39  ;;  %v1567_v53 = vor.u32 %v1566_v45, %v1562_v44  ;;  %v442_v55 = vshll.u32 %v4834_v41, 16  ;;  %v435_v58 = vrot.slane %v433_v48, 4  ;;  %v4864_v7 = vld [vmem:[%s4783_s7 + $0x20] sm:$0x1]  ;;  %v4881_v33 = vld [vmem:[%s4783_s7 + $0x1c] sm:$0xf] }
  0x20   : > { %4207 = vmatprep.subr.bf16.mxu0 %v4553_v9  ;;  %v421_v51 = vsel %vm4828_vm2, %v416_v42, %v420_v26  ;;  %v431_v57 = vsel %vm4828_vm2, %v426_v46, %v430_v38  ;;  %v438_v59 = vrot.slane %v436_v49, 5  ;;  %v446_v60 = vshrl.u32 %v4834_v41, 16  ;;  %v3670_v42 = vld [vmem:[%s4783_s7 + $0x24] sm:$0xf]  ;;  %v4562_v46 = vld [vmem:[%s5875_s1 + $0x8] sm:$0xff]  }
  0x21   : > { %v3542_v62 = vcombine.low %v421_v51, %v431_v57  ;;  %v1558_v63 = vrot.slane %v1557_v52, 4  ;;  %v1568_v0 = vrot.slane %v1567_v53, 4  ;;  %v444_v1 = vrot.slane %v442_v55, 5  ;;  %v4896_v52 = vld [vmem:[%s4783_s7 + $0x28] sm:$0xf] }
  0x22   : > { %4080 = vmatpush3.bf16.msra.mxu1 %v4552_v8  ;;  %v439_v4 = vor.u32 %v438_v59, %v435_v58  ;;  %v448_v5 = vrot.slane %v446_v60, 4  ;;  %v452_v6 = vshll.u32 %v4844_v54, 16  ;;  %v1584_v21 = vshll.u32 %v4852_v61, 16  ;;  %v4901_v57 = vld [vmem:[%s4783_s7 + $0x2c] sm:$0x1]  ;;  %v4564_v59 = vld [vmem:[%s5875_s1 + $0x10] sm:$0xff]  }
  0x23   : > { %4208 = vmatpush3.bf16.msra.mxu0 %v4553_v9  ;;  %4081 = vmatprep.subr.bf16.mxu1 %v4554_v10  ;;  %v1563_v8 = vsel %vm4828_vm2, %v1558_v63, %v1562_v44  ;;  %v1573_v9 = vsel %vm4828_vm2, %v1568_v0, %v1572_v47  ;;  %v1588_v22 = vshrl.u32 %v4852_v61, 16  ;;  %v466_v49 = vshll.u32 %v4881_v33, 16  ;;  %v4563_v60 = vld [vmem:[%s5875_s1 + $0x148] sm:$0xff]  }
  0x24   : > { %4209 = vmatprep.subr.bf16.mxu0 %v4555_v11  ;;  %4087 = vmatprep.mubr.bf16.mxu1 %v3542_v62  ;;  %v3704_v15 = vcombine.low %v1563_v8, %v1573_v9  ;;  %v440_v16 = vrot.slane %v439_v4, 4  ;;  %v449_v17 = vor.u32 %v448_v5, %v444_v1  ;;  %v454_v18 = vrot.slane %v452_v6, 5  ;;  %v4910_v4 = vld [vmem:[%s4783_s7 + $0x24] sm:$0xf] }
  0x25   : > { %v1586_v31 = vrot.slane %v1584_v21, 5  ;;  %v1590_v32 = vrot.slane %v1588_v22, 4  ;;  %v1599_v58 = vshrl.u32 %v3670_v42, 16  ;;  %v468_v62 = vrot.slane %v466_v49, 5  ;;  %v3673_v22 = vld [vmem:[%s4783_s7 + $0x30] sm:$0xf] }
  0x26   : > { %4082 = vmatpush3.bf16.msra.mxu1 %v4554_v10  ;;  %v1575_v10 = vshrl.u32 %v3667_v56, 16  ;;  %4215 = vmatprep.mubr.bf16.mxu0 %v3704_v15  ;;  %v445_v27 = vsel %vm4828_vm2, %v440_v16, %v444_v1  ;;  %v450_v28 = vrot.slane %v449_v17, 4  ;;  %v1602_v1 = vshll.u32 %v3670_v42, 16  ;;  %v4917_v16 = vld [vmem:[%s4783_s7 + $0x28] sm:$0xf]  ;;  %v4566_v42 = vld [vmem:[%s5875_s1 + $0x18] sm:$0xff]  }
  0x27   : > { %4210 = vmatpush3.bf16.msra.mxu0 %v4555_v11  ;;  %4083 = vmatprep.subr.bf16.mxu1 %v4556_v25  ;;  %v1578_v11 = vshll.u32 %v3667_v56, 16  ;;  %v1591_v45 = vor.u32 %v1590_v32, %v1586_v31  ;;  %v1601_v8 = vrot.slane %v1599_v58, 4  ;;  %v1612_v15 = vshrl.u32 %v4896_v52, 16  ;;  %v4920_v17 = vld [vmem:[%s4783_s7 + $0x2c] sm:$0x1]  ;;  %v4565_v32 = vld [vmem:[%s5875_s1 + $0x150] sm:$0xff]  }
  0x28   : > { %4211 = vmatprep.subr.bf16.mxu0 %v4557_v29  ;;  %v1577_v19 = vrot.slane %v1575_v10, 4  ;;  %v455_v37 = vsel %vm4828_vm2, %v450_v28, %v454_v18  ;;  %v481_v21 = vshrl.u32 %v4910_v4, 16  ;;  %v500_v49 = vshll.u32 %v4920_v17, 16  ;;  %v4567_v58 = vld [vmem:[%s5875_s1 + $0x158] sm:$0xff]  }
  0x29   : > { %v1580_v20 = vrot.slane %v1578_v11, 5  ;;  %v3543_v43 = vcombine.low %v445_v27, %v455_v37  ;;  %v1592_v55 = vrot.slane %v1591_v45, 4  ;;  %v1604_v11 = vrot.slane %v1602_v1, 5 }
  0x2a   : > { %4084 = vmatpush3.bf16.msra.mxu1 %v4556_v25  ;;  %v4873_v25 = vld [vmem:[%s4783_s7 + $0x18] sm:$0xf] }
  0x2b   : > { %4212 = vmatpush3.bf16.msra.mxu0 %v4557_v29  ;;  %4085 = vmatprep.subr.bf16.mxu1 %v4558_v35  ;;  %v1594_v29 = vshll.u32 %v4864_v7, 16  ;;  %v1581_v30 = vor.u32 %v1580_v20, %v1577_v19  ;;  %v457_v40 = vshrl.u32 %v4873_v25, 16  ;;  %v460_v47 = vshll.u32 %v4873_v25, 16 }
  0x2c   : > { %4213 = vmatprep.subr.bf16.mxu0 %v4559_v50  ;;  %v1618_v20 = vshll.u32 %v4901_v57, 16  ;;  %v1605_v28 = vor.u32 %v1604_v11, %v1601_v8 }
  0x2d   : > { %v1596_v38 = vrot.slane %v1594_v29, 5  ;;  %v1582_v44 = vrot.slane %v1581_v30, 4  ;;  %v459_v48 = vrot.slane %v457_v40, 4  ;;  %v462_v56 = vrot.slane %v460_v47, 5 }
  0x2e   : > { %4086 = vmatpush3.bf16.msra.mxu1 %v4558_v35  ;;  %v399_v35 = vld [vmem:[%s4783_s7 + $0x20] sm:$0x1]  ;;  %v1614_v29 = vrot.slane %v1612_v15, 4  ;;  %v484_v30 = vshll.u32 %v4910_v4, 16  ;;  %v1620_v37 = vrot.slane %v1618_v20, 5  ;;  %v490_v40 = vshll.u32 %v4917_v16, 16 }
  0x2f   : > { %4214 = vmatpush3.bf16.msra.mxu0 %v4559_v50  ;;  %4103 = vmatprep.subr.bf16.mxu1 %v4560_v2  ;;  %v470_v50 = vshrl.u32 %v4881_v33, 16  ;;  %v476_v51 = vshll.u32 %v399_v35, 16  ;;  %v1587_v53 = vsel %vm4828_vm2, %v1582_v44, %v1586_v31  ;;  %v1597_v5 = vsel %vm4828_vm2, %v1592_v55, %v1596_v38  ;;  %v4927_v31 = vld [vmem:[%s4783_s7 + $0x34] sm:$0xf]  ;;  %v4946_v55 = vld [vmem:[%s4783_s7 + $0x38] sm:$0x1] }
  0x30   : > { %4231 = vmatprep.subr.bf16.mxu0 %v4860_v3  ;;  %v463_v6 = vor.u32 %v462_v56, %v459_v48  ;;  %v3705_v9 = vcombine.low %v1587_v53, %v1597_v5  ;;  %v483_v38 = vrot.slane %v481_v21, 4  ;;  %v1606_v44 = vrot.slane %v1605_v28, 4  ;;  %v4953_v5 = vld [vmem:[%s4783_s7 + $0x30] sm:$0xf] }
  0x31   : > { %4088 = vmatmul.mubr.bf16.vlgmr.msra.gmra.mrb[0].mxu1 %v3543_v43  ;;  %v472_v63 = vrot.slane %v470_v50, 4  ;;  %v478_v0 = vrot.slane %v476_v51, 5  ;;  %v492_v47 = vrot.slane %v490_v40, 5  ;;  %v494_v48 = vshrl.u32 %v4917_v16, 16 }
  0x32   : > { %4104 = vmatpush3.bf16.msra.mxu1 %v4560_v2  ;;  %v1608_v2 = vshll.u32 %v4896_v52, 16  ;;  %v464_v18 = vrot.slane %v463_v6, 4  ;;  %4216 = vmatmul.mubr.bf16.vlgmr.msra.gmra.mrb[0].mxu0 %v3705_v9  ;;  %v1623_v56 = vshrl.u32 %v3673_v22, 16  ;;  %v1632_v1 = vshll.u32 %v4927_v31, 16  ;;  %v4959_v9 = vld [vmem:[%s4783_s7 + $0x34] sm:$0xf] }
  0x33   : > { %4105 = vmatprep.subr.bf16.mxu1 %v4562_v46  ;;  %v473_v10 = vor.u32 %v472_v63, %v468_v62  ;;  %4232 = vmatpush3.bf16.msra.mxu0 %v4860_v3  ;;  %v486_v3 = vrot.slane %v484_v30, 5  ;;  %v502_v63 = vrot.slane %v500_v49, 5  ;;  %v1642_v21 = vshll.u32 %v4946_v55, 16 }
  0x34   : > { %v1610_v19 = vrot.slane %v1608_v2, 5  ;;  %v469_v35 = vsel %vm4828_vm2, %v464_v18, %v468_v62  ;;  %4233 = vmatprep.subr.bf16.mxu0 %v4563_v60  ;;  %v496_v62 = vrot.slane %v494_v48, 4  ;;  %v1625_v2 = vrot.slane %v1623_v56, 4  ;;  %v4984_v48 = vld [vmem:[%s4783_s7 + $0x40] sm:$0xf]  ;;  %v4572_v56 = vld [vmem:[%s5875_s1 + $0x30] sm:$0xff]  }
  0x35   : > { %v474_v27 = vrot.slane %v473_v10, 4  ;;  %v487_v53 = vor.u32 %v486_v3, %v483_v38  ;;  %v1634_v18 = vrot.slane %v1632_v1, 5  ;;  %v508_v30 = vshll.u32 %v4953_v5, 16 }
  0x36   : > { %4106 = vmatpush3.bf16.msra.mxu1 %v4562_v46  ;;  %v1615_v45 = vor.u32 %v1614_v29, %v1610_v19  ;;  %v1611_v50 = vsel %vm4828_vm2, %v1606_v44, %v1610_v19  ;;  %v497_v11 = vor.u32 %v496_v62, %v492_v47  ;;  %v4969_v29 = vld [vmem:[%s4783_s7 + $0x38] sm:$0x1]  ;;  %v1644_v40 = vrot.slane %v1642_v21, 5  ;;  %v3676_v44 = vld [vmem:[%s4783_s7 + $0x3c] sm:$0xf] }
  0x37   : > { %4107 = vmatprep.subr.bf16.mxu1 %v4564_v59  ;;  %v479_v43 = vsel %vm4828_vm2, %v474_v27, %v478_v0  ;;  %4234 = vmatpush3.bf16.msra.mxu0 %v4563_v60  ;;  %v1626_v0 = vshll.u32 %v3673_v22, 16  ;;  %v488_v8 = vrot.slane %v487_v53, 4  ;;  %v4568_v60 = vld [vmem:[%s5875_s1 + $0x20] sm:$0xff]   ;;  %v505_v22 = vshrl.u32 %v4953_v5, 16 }
  0x38   : > { %v3544_v46 = vcombine.low %v469_v35, %v479_v43  ;;  %v1616_v51 = vrot.slane %v1615_v45, 4  ;;  %4235 = vmatprep.subr.bf16.mxu0 %v4565_v32  ;;  %v498_v27 = vrot.slane %v497_v11, 4  ;;  %v514_v35 = vshll.u32 %v4959_v9, 16  ;;  %v5005_v11 = vld [vmem:[%s4783_s7 + $0x40] sm:$0xf] }
  0x39   : > { %v1628_v15 = vrot.slane %v1626_v0, 5  ;;  %v493_v19 = vsel %vm4828_vm2, %v488_v8, %v492_v47  ;;  %v518_v43 = vshrl.u32 %v4959_v9, 16  ;;  %v524_v53 = vshll.u32 %v4969_v29, 16  ;;  %v4993_v0 = vld [vmem:[%s4783_s7 + $0x44] sm:$0x1]  ;;  %v4571_v8 = vld [vmem:[%s5875_s1 + $0x168] sm:$0xff]  }
  0x3a   : > { %4108 = vmatpush3.bf16.msra.mxu1 %v4564_v59  ;;  %4091 = vmatprep.mubr.bf16.mxu1 %v3544_v46  ;;  %v1621_v6 = vsel %vm4828_vm2, %v1616_v51, %v1620_v37  ;;  %v1636_v59 = vshrl.u32 %v4927_v31, 16  ;;  %v4570_v37 = vld [vmem:[%s5875_s1 + $0x28] sm:$0xff]   ;;  %v503_v45 = vsel %vm4828_vm2, %v498_v27, %v502_v63  ;;  %v510_v46 = vrot.slane %v508_v30, 5  ;;  %v5008_v21 = vld [vmem:[%s4783_s7 + $0x44] sm:$0x1] }
  0x3b   : > { %4109 = vmatprep.subr.bf16.mxu1 %v4566_v42  ;;  %v3706_v10 = vcombine.low %v1611_v50, %v1621_v6  ;;  %v1629_v28 = vor.u32 %v1628_v15, %v1625_v2  ;;  %4236 = vmatpush3.bf16.msra.mxu0 %v4565_v32  ;;  %v4569_v32 = vld [vmem:[%s5875_s1 + $0x160] sm:$0xff]   ;;  %v516_v47 = vrot.slane %v514_v35, 5  ;;  %v3545_v49 = vcombine.low %v493_v19, %v503_v45  ;;  %v5021_v45 = vld [vmem:[%s4783_s7 + $0x4c] sm:$0xf] }
  0x3c   : > { %v1638_v20 = vrot.slane %v1636_v59, 4  ;;  %4237 = vmatprep.subr.bf16.mxu0 %v4567_v58  ;;  %v520_v51 = vrot.slane %v518_v43, 4  ;;  %v1647_v1 = vshrl.u32 %v3676_v44, 16  ;;  %v1650_v6 = vshll.u32 %v3676_v44, 16  ;;  %5884 = vst [vmem:[#allocation2_spill] sm:$0xff] %v5008_v21 }
  0x3d   : > { %4219 = vmatprep.mubr.bf16.mxu0 %v3706_v10  ;;  %v1630_v3 = vrot.slane %v1629_v28, 4  ;;  %4092 = vmatmul.mubr.bf16.gmra.mrb[4].mxu1 %v3545_v49  ;;  %v5002_v10 = vld [vmem:[%s4783_s7 + $0x3c] sm:$0xf]  ;;  %v1660_v30 = vshrl.u32 %v4984_v48, 16  ;;  %v1666_v35 = vshll.u32 %v4993_v0, 16 }
  0x3e   : > { %4110 = vmatpush3.bf16.msra.mxu1 %v4566_v42  ;;  %v1639_v38 = vor.u32 %v1638_v20, %v1634_v18  ;;  %v507_v42 = vrot.slane %v505_v22, 4  ;;  %v521_v59 = vor.u32 %v520_v51, %v516_v47  ;;  %v1649_v19 = vrot.slane %v1647_v1, 4  ;;  %v4574_v22 = vld [vmem:[%s5875_s1 + $0x38] sm:$0xff]  }
  0x3f   : > { %4111 = vmatprep.subr.bf16.mxu1 %v4568_v60  ;;  %v1635_v62 = vsel %vm4828_vm2, %v1630_v3, %v1634_v18  ;;  %4238 = vmatpush3.bf16.msra.mxu0 %v4567_v58  ;;  %v1656_v58 = vshll.u32 %v4984_v48, 16  ;;  %v1652_v20 = vrot.slane %v1650_v6, 5  ;;  %v529_v43 = vshrl.u32 %v5002_v10, 16 }
  0x40   : > { %v1640_v50 = vrot.slane %v1639_v38, 4  ;;  %v511_v63 = vor.u32 %v510_v46, %v507_v42  ;;  %4239 = vmatprep.subr.bf16.mxu0 %v4569_v32  ;;  %v522_v27 = vrot.slane %v521_v59, 4  ;;  %v3679_v38 = vld [vmem:[%s4783_s7 + $0x48] sm:$0xf]  ;;  %v532_v44 = vshll.u32 %v5002_v10, 16 }
  0x41   : > { %v1658_v28 = vrot.slane %v1656_v58, 5  ;;  %v1653_v42 = vor.u32 %v1652_v20, %v1649_v19  ;;  %v1662_v46 = vrot.slane %v1660_v30, 4  ;;  %v1668_v49 = vrot.slane %v1666_v35, 5 }
  0x42   : > { %4112 = vmatpush3.bf16.msra.mxu1 %v4568_v60  ;;  %v1645_v2 = vsel %vm4828_vm2, %v1640_v50, %v1644_v40  ;;  %v526_v60 = vrot.slane %v524_v53, 5  ;;  %v512_v18 = vrot.slane %v511_v63, 4  ;;  %v538_v50 = vshll.u32 %v5005_v11, 16 }
  0x43   : > { %4113 = vmatprep.subr.bf16.mxu1 %v4570_v37  ;;  %v3707_v15 = vcombine.low %v1635_v62, %v1645_v2  ;;  %4240 = vmatpush3.bf16.msra.mxu0 %v4569_v32  ;;  %v1654_v51 = vrot.slane %v1653_v42, 4  ;;  %v534_v53 = vrot.slane %v532_v44, 5  ;;  %v4573_v62 = vld [vmem:[%s5875_s1 + $0x170] sm:$0xff]   ;;  %v1663_v63 = vor.u32 %v1662_v46, %v1658_v28  ;;  %v5047_v42 = vld [vmem:[%s4783_s7 + $0x48] sm:$0xf] }
  0x44   : > { %v517_v40 = vsel %vm4828_vm2, %v512_v18, %v516_v47  ;;  %v527_v3 = vsel %vm4828_vm2, %v522_v27, %v526_v60  ;;  %v531_v47 = vrot.slane %v529_v43, 4  ;;  %4241 = vmatprep.subr.bf16.mxu0 %v4571_v8  ;;  %v540_v1 = vrot.slane %v538_v50, 5  ;;  %v5034_v60 = vld [vmem:[%s4783_s7 + $0x50] sm:$0x1]  ;;  %v5039_v18 = vld [vmem:[%s5875_s1 + $0x80] sm:$0xff]  }
  0x45   : > { %4220 = vmatmul.mubr.bf16.gmra.mrb[4].mxu0 %v3707_v15  ;;  %v542_v6 = vshrl.u32 %v5005_v11, 16  ;;  %v548_v2 = vshll.u32 %v5008_v21, 16  ;;  %v1659_v32 = vsel %vm4828_vm2, %v1654_v51, %v1658_v28  ;;  %v1671_v58 = vshrl.u32 %v3679_v38, 16  ;;  %v4575_v28 = vld [vmem:[%s5875_s1 + $0x178] sm:$0xff]   ;;  %v5053_v46 = vld [vmem:[%s4783_s7 + $0x4c] sm:$0xf] }
  0x46   : > { %4114 = vmatpush3.bf16.msra.mxu1 %v4570_v37  ;;  %v3546_v37 = vcombine.low %v517_v40, %v527_v3  ;;  %v535_v59 = vor.u32 %v534_v53, %v531_v47  ;;  %v1674_v15 = vshll.u32 %v3679_v38, 16  ;;  %v1664_v19 = vrot.slane %v1663_v63, 4  ;;  %v5058_v53 = vld [vmem:[%s4783_s7 + $0x50] sm:$0x1]  ;;  %v3682_v63 = vld [vmem:[%s4783_s7 + $0x54] sm:$0xf] }
  0x47   : > { %4115 = vmatprep.subr.bf16.mxu1 %v4572_v56  ;;  %v544_v20 = vrot.slane %v542_v6, 4  ;;  %v1680_v27 = vshll.u32 %v5021_v45, 16  ;;  %4242 = vmatpush3.bf16.msra.mxu0 %v4571_v8  ;;  %v1673_v35 = vrot.slane %v1671_v58, 4  ;;  %v1684_v40 = vshrl.u32 %v5021_v45, 16  ;;  %5885 = vst [vmem:[#allocation3_spill] sm:$0xff] %v5058_v53 }
  0x48   : > { %4095 = vmatprep.mubr.bf16.mxu1 %v3546_v37  ;;  %v536_v30 = vrot.slane %v535_v59, 4  ;;  %v1676_v38 = vrot.slane %v1674_v15, 5  ;;  %4243 = vmatprep.subr.bf16.mxu0 %v4573_v62  ;;  %v1669_v43 = vsel %vm4828_vm2, %v1664_v19, %v1668_v49  ;;  %v1690_v8 = vshll.u32 %v5034_v60, 16  ;;  %v5069_v15 = vld [vmem:[%s5875_s1 + $0x180] sm:$0xff]  }
  0x49   : > { %v545_v44 = vor.u32 %v544_v20, %v540_v1  ;;  %v1682_v3 = vrot.slane %v1680_v27, 5  ;;  %v3708_v50 = vcombine.low %v1659_v32, %v1669_v43  ;;  %v1686_v47 = vrot.slane %v1684_v40, 4 }
  0x4a   : > { %4116 = vmatpush3.bf16.msra.mxu1 %v4572_v56  ;;  %v550_v56 = vrot.slane %v548_v2, 5  ;;  %v541_v37 = vsel %vm4828_vm2, %v536_v30, %v540_v1  ;;  %v1677_v51 = vor.u32 %v1676_v38, %v1673_v35  ;;  %v1692_v49 = vrot.slane %v1690_v8, 5  ;;  %v5075_v30 = vld [vmem:[%s4783_s7 + $0x58] sm:$0xf]  ;;  %v5083_v8 = vld [vmem:[%s4783_s7 + $0x54] sm:$0xf] }
  0x4b   : > { %4117 = vmatprep.subr.bf16.mxu1 %v4574_v22  ;;  %v546_v6 = vrot.slane %v545_v44, 4  ;;  %v553_v2 = vshrl.u32 %v5047_v42, 16  ;;  %v556_v59 = vshll.u32 %v5047_v42, 16  ;;  %4244 = vmatpush3.bf16.msra.mxu0 %v4573_v62  ;;  %v1687_v1 = vor.u32 %v1686_v47, %v1682_v3  ;;  %v5080_v44 = vld [vmem:[%s4783_s7 + $0x5c] sm:$0x1] }
  0x4c   : > { %4223 = vmatprep.mubr.bf16.mxu0 %v3708_v50  ;;  %v562_v32 = vshll.u32 %v5053_v46, 16  ;;  %v566_v58 = vshrl.u32 %v5053_v46, 16  ;;  %4245 = vmatprep.subr.bf16.mxu0 %v4575_v28  ;;  %v572_v27 = vshll.u32 %v5058_v53, 16  ;;  %v5110_v53 = vld [vmem:[%s4783_s7 + $0x68] sm:$0x1] }
  0x4d   : > { %v551_v19 = vsel %vm4828_vm2, %v546_v6, %v550_v56  ;;  %v555_v62 = vrot.slane %v553_v2, 4  ;;  %v558_v20 = vrot.slane %v556_v59, 5  ;;  %v1688_v40 = vrot.slane %v1687_v1, 4  ;;  %v5086_v6 = vld [vmem:[%s4783_s7 + $0x58] sm:$0xf] }
  0x4e   : > { %4118 = vmatpush3.bf16.msra.mxu1 %v4574_v22  ;;  %v1678_v22 = vrot.slane %v1677_v51, 4  ;;  %v3547_v35 = vcombine.low %v541_v37, %v551_v19  ;;  %v564_v43 = vrot.slane %v562_v32, 5  ;;  %v568_v51 = vrot.slane %v566_v58, 4 }
  0x4f   : > { %4135 = vmatprep.subr.bf16.mxu1 %v5039_v18  ;;  %v559_v50 = vor.u32 %v558_v20, %v555_v62  ;;  %v574_v47 = vrot.slane %v572_v27, 5  ;;  %v1695_v56 = vshrl.u32 %v3682_v63, 16  ;;  %4246 = vmatpush3.bf16.msra.mxu0 %v4575_v28  ;;  %v1693_v37 = vsel %vm4828_vm2, %v1688_v40, %v1692_v49  ;;  %v5095_v20 = vld [vmem:[%s4783_s7 + $0x5c] sm:$0x1] }
  0x50   : > { %v1683_v38 = vsel %vm4828_vm2, %v1678_v22, %v1682_v3  ;;  %4096 = vmatmul.mubr.bf16.gmra.mrb[8].mxu1 %v3547_v35  ;;  %v1698_v3 = vshll.u32 %v3682_v63, 16  ;;  %v1704_v2 = vshll.u32 %v5075_v30, 16  ;;  %v1708_v59 = vshrl.u32 %v5075_v30, 16  ;;  %4263 = vmatprep.subr.bf16.mxu0 %v5069_v15  ;;  %v3685_v63 = vld [vmem:[%s4783_s7 + $0x60] sm:$0xf] }
  0x51   : > { %v3709_v22 = vcombine.low %v1683_v38, %v1693_v37  ;;  %v560_v1 = vrot.slane %v559_v50, 4  ;;  %v569_v32 = vor.u32 %v568_v51, %v564_v43  ;;  %v1697_v58 = vrot.slane %v1695_v56, 4 }
  0x52   : > { %v1700_v28 = vrot.slane %v1698_v3, 5  ;;  %v1706_v19 = vrot.slane %v1704_v2, 5  ;;  %v1710_v62 = vrot.slane %v1708_v59, 4  ;;  %v1714_v49 = vshll.u32 %v5080_v44, 16  ;;  %v5104_v3 = vld [vmem:[%s4783_s7 + $0x64] sm:$0xf] }
  0x53   : > { %4224 = vmatmul.mubr.bf16.gmra.mrb[8].mxu0 %v3709_v22  ;;  %v565_v27 = vsel %vm4828_vm2, %v560_v1, %v564_v43  ;;  %v570_v35 = vrot.slane %v569_v32, 4  ;;  %v577_v38 = vshrl.u32 %v5083_v8, 16  ;;  %v580_v40 = vshll.u32 %v5083_v8, 16 }
  0x54   : > { %v1701_v50 = vor.u32 %v1700_v28, %v1697_v58  ;;  %v1711_v51 = vor.u32 %v1710_v62, %v1706_v19  ;;  %v1716_v56 = vrot.slane %v1714_v49, 5  ;;  %v586_v37 = vshll.u32 %v5086_v6, 16  ;;  %v3720_v58 = vld [vmem:[%s4783_s7 + $0xc] sm:$0xe] }
  0x55   : > { %v575_v2 = vsel %vm4828_vm2, %v570_v35, %v574_v47  ;;  %v579_v59 = vrot.slane %v577_v38, 4  ;;  %v582_v22 = vrot.slane %v580_v40, 5  ;;  %v590_v43 = vshrl.u32 %v5086_v6, 16 }
  0x56   : > { %v3548_v1 = vcombine.low %v565_v27, %v575_v2  ;;  %v1702_v32 = vrot.slane %v1701_v50, 4  ;;  %v1712_v26 = vrot.slane %v1711_v51, 4  ;;  %v588_v39 = vrot.slane %v586_v37, 5 }
  0x57   : > { %v583_v28 = vor.u32 %v582_v22, %v579_v59  ;;  %v592_v62 = vrot.slane %v590_v43, 4  ;;  %v596_v49 = vshll.u32 %v5095_v20, 16  ;;  %v1719_v21 = vshrl.u32 %v3685_v63, 16 }
  0x58   : > { %4099 = vmatprep.mubr.bf16.mxu1 %v3548_v1  ;;  %v1707_v47 = vsel %vm4828_vm2, %v1702_v32, %v1706_v19  ;;  %v1717_v35 = vsel %vm4828_vm2, %v1712_v26, %v1716_v56  ;;  %v1722_v38 = vshll.u32 %v3685_v63, 16  ;;  %v1728_v27 = vshll.u32 %v5104_v3, 16 }
  0x59   : > { %v3710_v40 = vcombine.low %v1707_v47, %v1717_v35  ;;  %v584_v50 = vrot.slane %v583_v28, 4  ;;  %v593_v51 = vor.u32 %v592_v62, %v588_v39  ;;  %v598_v37 = vrot.slane %v596_v49, 5  ;;  %v3721_v49 = vld [vmem:[%s4783_s7 + $0x18] sm:$0xe]  ;;  %v3722_v47 = vld [vmem:[%s4783_s7 + $0x24] sm:$0xe] }
  0x5a   : > { %v1721_v2 = vrot.slane %v1719_v21, 4  ;;  %v1724_v59 = vrot.slane %v1722_v38, 5  ;;  %v1730_v22 = vrot.slane %v1728_v27, 5  ;;  %v1732_v43 = vshrl.u32 %v5104_v3, 16 }
  0x5b   : > { %4227 = vmatprep.mubr.bf16.mxu0 %v3710_v40  ;;  %v589_v19 = vsel %vm4828_vm2, %v584_v50, %v588_v39  ;;  %v594_v1 = vrot.slane %v593_v51, 4  ;;  %v1738_v26 = vshll.u32 %v5110_v53, 16  ;;  %v3728_v63 = vrot.slane %v3720_v58, 9 }
  0x5c   : > { %v1725_v56 = vor.u32 %v1724_v59, %v1721_v2  ;;  %v1734_v32 = vrot.slane %v1732_v43, 4  ;;  %v1986_v21 = vrot.slane %v4807_v23, 5  ;;  %v3558_v39 = vcombine.low %v4792_v12, %v4795_v13 }
  0x5d   : > { %v599_v62 = vsel %vm4828_vm2, %v594_v1, %v598_v37  ;;  %v1740_v27 = vrot.slane %v1738_v26, 5  ;;  %v2000_v37 = vrot.slane %v4896_v52, 5  ;;  %v5888_v12 = vrot.slane %v4852_v61, 5  ;;  %v5175_v61 = vld [vmem:[%s4783_s7 + $0x48] sm:$0xe] }
  0x5e   : > { %v3549_v35 = vcombine.low %v589_v19, %v599_v62  ;;  %v1726_v58 = vrot.slane %v1725_v56, 4  ;;  %v1735_v38 = vor.u32 %v1734_v32, %v1730_v22  ;;  %v1987_v40 = vsel %vm5125_vm5, %v3728_v63, %v1986_v21  ;;  %v3723_v63 = vld [vmem:[%s4783_s7 + $0x30] sm:$0xe] }
  0x5f   : > { %v1988_v50 = vrot.slane %v1986_v21, 4  ;;  %v1995_v13 = vrot.slane %v5888_v12, 4  ;;  %v1996_v2 = vrot.slane %v4864_v7, 5  ;;  %v5889_v59 = vrot.slane %v4810_v24, 5 }
  0x60   : > { %4100 = vmatmul.mubr.bf16.gmra.mrb[12].mxu1 %v3549_v35  ;;  %v1731_v23 = vsel %vm4828_vm2, %v1726_v58, %v1730_v22  ;;  %v1736_v51 = vrot.slane %v1735_v38, 4  ;;  %v3729_v22 = vrot.slane %v3721_v49, 9  ;;  %v3730_v26 = vrot.slane %v3722_v47, 9  ;;  %v3724_v49 = vld [vmem:[%s4783_s7 + $0x3c] sm:$0xe]  ;;  %v4580_v35 = vld [vmem:[%s5875_s1 + $0x88] sm:$0xff]  }
  0x61   : > { %4119 = vmatprep.mubr.bf16.mxu1 %v3558_v39  ;;  %v1990_v43 = vsel %vm5125_vm5, %v1988_v50, %v5889_v59  ;;  %v2002_v56 = vrot.slane %v2000_v37, 4  ;;  %v2003_v32 = vrot.slane %v4901_v57, 5  ;;  %v1019_v7 = vrot.slane %v4798_v14, 5 }
  0x62   : > { %v1741_v19 = vsel %vm4828_vm2, %v1736_v51, %v1740_v27  ;;  %v3752_v1 = vcombine.low %v1987_v40, %v1990_v43  ;;  %v1026_v24 = vrot.slane %v4844_v54, 5  ;;  %v3559_v21 = vcombine.low %v4821_v34, %v4834_v41  ;;  %v4586_v43 = vld [vmem:[%s5875_s1 + $0x98] sm:$0xff]  }
  0x63   : > { %v3711_v52 = vcombine.low %v1731_v23, %v1741_v19  ;;  %v1997_v62 = vsel %vm5125_vm5, %v1995_v13, %v1996_v2  ;;  %v3560_v39 = vcombine.low %v4873_v25, %v4881_v33  ;;  %v5890_v47 = vmov %v5888_v12  ;;  %v5185_v23 = vld [vmem:[%s4783_s7 + $0x54] sm:$0xe] }
  0x64   : > { %v1994_v57 = vsel %vm5125_vm5, %v3729_v22, %v5890_v47  ;;  %v3731_v34 = vrot.slane %v3723_v63, 9  ;;  %v2007_v41 = vrot.slane %v4927_v31, 5  ;;  %v2014_v58 = vrot.slane %v4984_v48, 5  ;;  %v4581_v48 = vld [vmem:[%s5875_s1 + $0x188] sm:$0xff]  }
  0x65   : > { %4228 = vmatmul.mubr.bf16.gmra.mrb[12].mxu0 %v3711_v52  ;;  %v2001_v25 = vsel %vm5125_vm5, %v3730_v26, %v2000_v37  ;;  %v2004_v33 = vsel %vm5125_vm5, %v2002_v56, %v2003_v32  ;;  %v2010_v38 = vrot.slane %v4946_v55, 5  ;;  %v3732_v27 = vrot.slane %v3724_v49, 9  ;;  %v5188_v55 = vld [vmem:[%s4783_s7 + $0x60] sm:$0xe]  ;;  %v5215_v56 = vld [vmem:[%s4783_s7 + $0x4] sm:$0xf] }
  0x66   : > { %4247 = vmatprep.mubr.bf16.mxu0 %v3752_v1  ;;  %v2017_v40 = vrot.slane %v4993_v0, 5  ;;  %v2021_v50 = vrot.slane %v5021_v45, 5  ;;  %v3753_v31 = vcombine.low %v1994_v57, %v1997_v62  ;;  %v3754_v51 = vcombine.low %v2001_v25, %v2004_v33  ;;  %v4590_v49 = vld [vmem:[%s5875_s1 + $0xa0] sm:$0xff]   ;;  %v5270_v45 = vld [vmem:[%s4783_s7 + $0x18] sm:$0xe] }
  0x67   : > { %v2009_v37 = vrot.slane %v2007_v41, 4  ;;  %v2016_v12 = vrot.slane %v2014_v58, 4  ;;  %v3561_v0 = vcombine.low %v4910_v4, %v4917_v16  ;;  %v2008_v13 = vsel %vm5125_vm5, %v3731_v34, %v2007_v41  ;;  %v5238_v41 = vld [vmem:[%s4783_s7 + $0x10] sm:$0xf] }
  0x68   : > { %4120 = vmatmul.mubr.bf16.vlgmr.msra.gmra.mrb[0].mxu1 %v3559_v21  ;;  %v3562_v2 = vcombine.low %v4953_v5, %v4959_v9  ;;  %v3733_v59 = vrot.slane %v5175_v61, 9  ;;  %v2023_v4 = vrot.slane %v2021_v50, 4  ;;  %v2024_v19 = vrot.slane %v5034_v60, 5  ;;  %v4585_v5 = vld [vmem:[%s5875_s1 + $0x190] sm:$0xff]   ;;  %v987_v21 = vld [vmem:[%s4783_s7] sm:$0xe] }
  0x69   : > { %4136 = vmatpush3.bf16.msra.mxu1 %v5039_v18  ;;  %4123 = vmatprep.mubr.bf16.mxu1 %v3560_v39  ;;  %v4584_v18 = vld [vmem:[%s5875_s1 + $0x90] sm:$0xff]   ;;  %v3734_v1 = vrot.slane %v5185_v23, 9  ;;  %v2028_v22 = vrot.slane %v5075_v30, 5  ;;  %v2031_v26 = vrot.slane %v5080_v44, 5  ;;  %v3735_v63 = vrot.slane %v5188_v55, 9 }
  0x6a   : > { %4137 = vmatprep.subr.bf16.mxu1 %v4580_v35  ;;  %v2035_v52 = vrot.slane %v5104_v3, 5  ;;  %v1016_v60 = vrot.slane %v5215_v56, 5  ;;  %v2011_v30 = vsel %vm5125_vm5, %v2009_v37, %v2010_v38  ;;  %v2015_v32 = vsel %vm5125_vm5, %v3732_v27, %v2014_v58  ;;  %v990_v61 = vld [vmem:[%s4783_s7 + $0x24] sm:$0xe]  ;;  %v992_v56 = vld [vmem:[%s4783_s7 + $0x3c] sm:$0xe] }
  0x6b   : > { %v2018_v44 = vsel %vm5125_vm5, %v2016_v12, %v2017_v40  ;;  %v3755_v62 = vcombine.low %v2008_v13, %v2011_v30  ;;  %v2030_v47 = vrot.slane %v2028_v22, 4  ;;  %v2038_v57 = vrot.slane %v5110_v53, 5  ;;  %v4592_v40 = vld [vmem:[%s5875_s1 + $0xa8] sm:$0xff]   ;;  %v4642_v30 = vld [vmem:[%s4783_s7 + $0x1c] sm:$0xf]  ;;  %v4597_v53 = vld [vmem:[%s5875_s1 + $0x1b0] sm:$0xff]  }
  0x6c   : > { %v3756_v39 = vcombine.low %v2015_v32, %v2018_v44  ;;  %v3574_v34 = vrot.slane %v987_v21, 9  ;;  %v1023_v58 = vrot.slane %v5238_v41, 5  ;;  %v1037_v25 = vrot.slane %v4917_v16, 5  ;;  %v994_v41 = vld [vmem:[%s4783_s7 + $0x54] sm:$0xe] }
  0x6d   : > { %4248 = vmatmul.mubr.bf16.vlgmr.msra.gmra.mrb[0].mxu0 %v3753_v31  ;;  %4138 = vmatpush3.bf16.msra.mxu1 %v4580_v35  ;;  %v5235_v35 = vrot.slane %v2035_v52, 4  ;;  %v1018_v33 = vrot.slane %v1016_v60, 4  ;;  %v1040_v38 = vrot.slane %v4920_v17, 5  ;;  %v3563_v27 = vcombine.low %v5002_v10, %v5005_v11 }
  0x6e   : > { %4264 = vmatpush3.bf16.msra.mxu0 %v5069_v15  ;;  %4251 = vmatprep.mubr.bf16.mxu0 %v3754_v51  ;;  %v4587_v15 = vld [vmem:[%s5875_s1 + $0x198] sm:$0xff]   ;;  %v3564_v31 = vcombine.low %v5047_v42, %v5053_v46  ;;  %v3577_v16 = vrot.slane %v990_v61, 9  ;;  %v1039_v23 = vrot.slane %v1037_v25, 4  ;;  %v2022_v17 = vsel %vm5125_vm5, %v3733_v59, %v2021_v50  ;;  %v4591_v51 = vld [vmem:[%s5875_s1 + $0x1a0] sm:$0xff]  }
  0x6f   : > { %4265 = vmatprep.subr.bf16.mxu0 %v4581_v48  ;;  %4139 = vmatprep.subr.bf16.mxu1 %v4584_v18  ;;  %v2025_v10 = vsel %vm5125_vm5, %v2023_v4, %v2024_v19  ;;  %v2029_v42 = vsel %vm5125_vm5, %v3734_v1, %v2028_v22  ;;  %v2032_v37 = vsel %vm5125_vm5, %v2030_v47, %v2031_v26  ;;  %v1044_v13 = vrot.slane %v4959_v9, 5  ;;  %v991_v4 = vld [vmem:[%s4783_s7 + $0x30] sm:$0xe]  ;;  %v4593_v1 = vld [vmem:[%s5875_s1 + $0x1a8] sm:$0xff]  }
  0x70   : > { %4124 = vmatmul.mubr.bf16.gmra.mrb[4].mxu1 %v3561_v0  ;;  %v5274_v50 = vsel %vm5125_vm5, %v3577_v16, %v1037_v25  ;;  %v5278_v12 = vsel %vm5125_vm5, %v1039_v23, %v1040_v38  ;;  %v3565_v59 = vcombine.low %v5083_v8, %v5086_v6  ;;  %v1047_v19 = vrot.slane %v4969_v29, 5  ;;  %v4596_v29 = vld [vmem:[%s5875_s1 + $0xb0] sm:$0xff]   ;;  %v5892_v38 = vld [vmem:[#allocation3_spill] sm:$0xff]  ;;  %v4599_v16 = vld [vmem:[%s5875_s1 + $0x1b8] sm:$0xff]  }
  0x71   : > { %4140 = vmatpush3.bf16.msra.mxu1 %v4584_v18  ;;  %4127 = vmatprep.mubr.bf16.mxu1 %v3562_v2  ;;  %v3601_v18 = vcombine.low %v5274_v50, %v5278_v12  ;;  %v3757_v2 = vcombine.low %v2022_v17, %v2025_v10  ;;  %v3758_v9 = vcombine.low %v2029_v42, %v2032_v37  ;;  %v3578_v8 = vrot.slane %v991_v4, 9  ;;  %v4612_v50 = vld [vmem:[%s4783_s7 + $0x48] sm:$0xff]   ;;  %v4613_v12 = vld [vmem:[%s5875_s1 + $0xe0] sm:$0xff]  }
  0x72   : > { %4266 = vmatpush3.bf16.msra.mxu0 %v4581_v48  ;;  %4141 = vmatprep.subr.bf16.mxu1 %v4586_v43  ;;  %v5254_v48 = vld [vmem:[%s4783_s7 + $0xc] sm:$0xe]  ;;  %v1017_v22 = vsel %vm5125_vm5, %v3574_v34, %v1016_v60  ;;  %v1020_v26 = vsel %vm5125_vm5, %v1018_v33, %v1019_v7  ;;  %v1030_v32 = vrot.slane %v4642_v30, 5  ;;  %v1051_v44 = vrot.slane %v5005_v11, 5  ;;  %v5891_v60 = vld [vmem:[#allocation2_spill] sm:$0xff]  ;;  %v4598_v7 = vld [vmem:[%s5875_s1 + $0xb8] sm:$0xff]  }
  0x73   : > { %4267 = vmatprep.subr.bf16.mxu0 %v4585_v5  ;;  %v3575_v0 = vrot.slane %v5254_v48, 9  ;;  %v1054_v21 = vrot.slane %v5891_v60, 5  ;;  %v2036_v11 = vsel %vm5125_vm5, %v3735_v63, %v2035_v52  ;;  %v2039_v3 = vsel %vm5125_vm5, %v5235_v35, %v2038_v57  ;;  %v993_v35 = vld [vmem:[%s4783_s7 + $0x48] sm:$0xe] }
  0x74   : > { %v1053_v25 = vrot.slane %v1051_v44, 4  ;;  %v3598_v55 = vcombine.low %v1017_v22, %v1020_v26  ;;  %v1032_v52 = vrot.slane %v1030_v32, 4  ;;  %v1058_v61 = vrot.slane %v5053_v46, 5  ;;  %v5405_v26 = vld [vmem:[%s4783_s7 + $0x20] sm:$0x1] }
  0x75   : > { %4252 = vmatmul.mubr.bf16.gmra.mrb[4].mxu0 %v3755_v62  ;;  %4142 = vmatpush3.bf16.msra.mxu1 %v4586_v43  ;;  %v1025_v43 = vrot.slane %v1023_v58, 4  ;;  %v3576_v62 = vrot.slane %v5270_v45, 9  ;;  %v1024_v46 = vsel %vm5125_vm5, %v3575_v0, %v1023_v58  ;;  %v1065_v10 = vrot.slane %v5086_v6, 5  ;;  %v4601_v6 = vld [vmem:[%s5875_s1 + $0xc0] sm:$0xff]  }
  0x76   : > { %4268 = vmatpush3.bf16.msra.mxu0 %v4585_v5  ;;  %4255 = vmatprep.mubr.bf16.mxu0 %v3756_v39  ;;  %v1046_v5 = vrot.slane %v1044_v13, 4  ;;  %v3579_v39 = vrot.slane %v992_v56, 9  ;;  %v5340_v33 = vsel %vm5125_vm5, %v1053_v25, %v1054_v21  ;;  %v1060_v48 = vrot.slane %v1058_v61, 4  ;;  %v4605_v56 = vld [vmem:[%s5875_s1 + $0x1c8] sm:$0xff]  }
  0x77   : > { %4269 = vmatprep.subr.bf16.mxu0 %v4587_v15  ;;  %4143 = vmatprep.subr.bf16.mxu1 %v4590_v49  ;;  %v1027_v23 = vsel %vm5125_vm5, %v1025_v43, %v1026_v24  ;;  %v1031_v17 = vsel %vm5125_vm5, %v3576_v62, %v1030_v32  ;;  %v1068_v58 = vrot.slane %v5095_v20, 5  ;;  %v3581_v37 = vrot.slane %v994_v41, 9  ;;  %v4604_v43 = vld [vmem:[%s5875_s1 + $0xc8] sm:$0xff]   ;;  %v3821_v62 = vld [vmem:[%s4783_s7 + $0x24] sm:$0xf] }
  0x78   : > { %4128 = vmatmul.mubr.bf16.gmra.mrb[8].mxu1 %v3563_v27  ;;  %v5315_v14 = vsel %vm5125_vm5, %v1046_v5, %v1047_v19  ;;  %v5336_v63 = vsel %vm5125_vm5, %v3579_v39, %v1051_v44  ;;  %v1061_v27 = vrot.slane %v5892_v38, 5  ;;  %v1067_v45 = vrot.slane %v1065_v10, 4  ;;  %v4603_v19 = vld [vmem:[%s5875_s1 + $0x1c0] sm:$0xff]   ;;  %v4607_v44 = vld [vmem:[%s5875_s1 + $0xd0] sm:$0xff]   ;;  %v5426_v25 = vld [vmem:[%s4783_s7 + $0x28] sm:$0xf] }
  0x79   : > { %4144 = vmatpush3.bf16.msra.mxu1 %v4590_v49  ;;  %4131 = vmatprep.mubr.bf16.mxu1 %v3564_v31  ;;  %v4643_v49 = vld [vmem:[%s4783_s7 + $0x20] sm:$0x1]  ;;  %v3603_v57 = vcombine.low %v5336_v63, %v5340_v33  ;;  %v3580_v31 = vrot.slane %v993_v35, 9  ;;  %v3599_v0 = vcombine.low %v1024_v46, %v1027_v23  ;;  %v4602_v5 = vld [vmem:[%s4783_s7 + $0x24] sm:$0xff]   ;;  %v4609_v39 = vld [vmem:[%s5875_s1 + $0x1d0] sm:$0xff]  }
  0x7a   : > { %4270 = vmatpush3.bf16.msra.mxu0 %v4587_v15  ;;  %4145 = vmatprep.subr.bf16.mxu1 %v4592_v40  ;;  %v5311_v15 = vsel %vm5125_vm5, %v3578_v8, %v1044_v13  ;;  %v1033_v47 = vrot.slane %v4643_v49, 5  ;;  %v5375_v24 = vsel %vm5125_vm5, %v1060_v48, %v1061_v27  ;;  %v5384_v13 = vsel %vm5125_vm5, %v3581_v37, %v1065_v10  ;;  %v4608_v35 = vld [vmem:[%s4783_s7 + $0x3c] sm:$0xff]   ;;  %v5445_v46 = vld [vmem:[%s4783_s7 + $0x34] sm:$0xf]  ;;  %v5468_v37 = vld [vmem:[%s4783_s7 + $0x38] sm:$0x1] }
  0x7b   : > { %4271 = vmatprep.subr.bf16.mxu0 %v4591_v51  ;;  %v3602_v34 = vcombine.low %v5311_v15, %v5315_v14  ;;  %v5371_v54 = vsel %vm5125_vm5, %v3580_v31, %v1058_v61  ;;  %v4611_v38 = vld [vmem:[%s5875_s1 + $0x1d8] sm:$0xff]   ;;  %v2554_v27 = vshll.u32 %v5426_v25, 16  ;;  %v2578_v41 = vshll.u32 %v5445_v46, 16 }
  0x7c   : > { %v1034_v42 = vsel %vm5125_vm5, %v1032_v52, %v1033_v47  ;;  %v3604_v20 = vcombine.low %v5371_v54, %v5375_v24  ;;  %v2548_v52 = vshll.u32 %v3821_v62, 16  ;;  %v2582_v10 = vshrl.u32 %v5445_v46, 16  ;;  %v4617_v54 = vld [vmem:[%s5875_s1 + $0x1e8] sm:$0xff]   ;;  %v4619_v24 = vld [vmem:[%s5875_s1 + $0xf0] sm:$0xff]  }
  0x7d   : > { %4256 = vmatmul.mubr.bf16.gmra.mrb[8].mxu0 %v3757_v2  ;;  %4146 = vmatpush3.bf16.msra.mxu1 %v4592_v40  ;;  %v3759_v40 = vcombine.low %v2036_v11, %v2039_v3  ;;  %v3600_v2 = vcombine.low %v1031_v17, %v1034_v42  ;;  %v4610_v11 = vld [vmem:[%s5875_s1 + $0xd8] sm:$0xff]   ;;  %v5429_v3 = vld [vmem:[%s4783_s7 + $0x2c] sm:$0x1]  ;;  %v2970_v36 = vrot.slane %v5445_v46, 5 }
  0x7e   : > { %4272 = vmatpush3.bf16.msra.mxu0 %v4591_v51  ;;  %4259 = vmatprep.mubr.bf16.mxu0 %v3758_v9  ;;  %v4600_v51 = vld [vmem:[%s4783_s7 + $0x18] sm:$0xff]   ;;  %v2564_v48 = vshll.u32 %v5429_v3, 16  ;;  %v2966_v46 = vrot.slane %v5429_v3, 5 }
  0x7f   : > { %4273 = vmatprep.subr.bf16.mxu0 %v4593_v1  ;;  %4147 = vmatprep.subr.bf16.mxu1 %v4596_v29  ;;  %v5400_v9 = vld [vmem:[%s4783_s7 + $0x1c] sm:$0xf] }
  0x80   : > { %4132 = vmatmul.mubr.bf16.gmra.mrb[12].mxu1 %v3565_v59  ;;  %v5388_v59 = vsel %vm5125_vm5, %v1067_v45, %v1068_v58  ;;  %v2530_v30 = vshll.u32 %v5400_v9, 16  ;;  %v2534_v32 = vshrl.u32 %v5400_v9, 16  ;;  %v4615_v58 = vld [vmem:[%s5875_s1 + $0x1e0] sm:$0xff]  }
  0x81   : > { %4148 = vmatpush3.bf16.msra.mxu1 %v4596_v29  ;;  %4151 = vmatprep.mubr.bf16.mxu1 %v3598_v55  ;;  %v3605_v4 = vcombine.low %v5384_v13, %v5388_v59  ;;  %v4606_v29 = vld [vmem:[%s4783_s7 + $0x30] sm:$0xff]   ;;  %v2545_v55 = vshrl.u32 %v3821_v62, 16  ;;  %v5512_v62 = vrot.slane %v2564_v48, 5 }
  0x82   : > { %4274 = vmatpush3.bf16.msra.mxu0 %v4593_v1  ;;  %4149 = vmatprep.subr.bf16.mxu1 %v4598_v7  ;;  %v3818_v1 = vld [vmem:[%s4783_s7 + $0x18] sm:$0xf]  ;;  %v5423_v49 = vrot.slane %v2530_v30, 5  ;;  %v2536_v47 = vrot.slane %v2534_v32, 4 }
  0x83   : > { %4275 = vmatprep.subr.bf16.mxu0 %v4597_v53  ;;  %v2521_v22 = vshrl.u32 %v3818_v1, 16  ;;  %v2524_v8 = vshll.u32 %v3818_v1, 16  ;;  %v2547_v14 = vrot.slane %v2545_v55, 4  ;;  %v4618_v1 = vld [vmem:[%s4783_s7 + $0x60] sm:$0xff]   ;;  %v4622_v55 = vld [vmem:[%s5875_s1 + $0xf8] sm:$0xff]  }
  0x85   : > { %4260 = vmatmul.mubr.bf16.gmra.mrb[12].mxu0 %v3759_v40  ;;  %4150 = vmatpush3.bf16.msra.mxu1 %v4598_v7  ;;  %v2523_v60 = vrot.slane %v2521_v22, 4  ;;  %v2526_v21 = vrot.slane %v2524_v8, 5  ;;  %v2540_v7 = vshll.u32 %v5405_v26, 16  ;;  %v2558_v40 = vshrl.u32 %v5426_v25, 16 }
  0x86   : > { %4276 = vmatpush3.bf16.msra.mxu0 %v4597_v53  ;;  %4279 = vmatprep.mubr.bf16.mxu0 %v4600_v51  ;;  %v3824_v53 = vld [vmem:[%s4783_s7 + $0x30] sm:$0xf]  ;;  %v5465_v51 = vrot.slane %v2554_v27, 5  ;;  %v5483_v8 = vrot.slane %v2578_v41, 5  ;;  %v5530_v27 = vld [vmem:[%s4783_s7 + $0x44] sm:$0x1] }
  0x87   : > { %4277 = vmatprep.subr.bf16.mxu0 %v4599_v16  ;;  %4167 = vmatprep.subr.bf16.mxu1 %v4601_v6  ;;  %v2527_v61 = vor.u32 %v2526_v21, %v2523_v60  ;;  %v2569_v31 = vshrl.u32 %v3824_v53, 16  ;;  %v5452_v15 = vrot.slane %v2540_v7, 5  ;;  %v2572_v17 = vshll.u32 %v3824_v53, 16 }
  0x88   : > { %4152 = vmatmul.mubr.bf16.vlgmr.msra.gmra.mrb[0].mxu1 %v3599_v0  ;;  %v2560_v42 = vrot.slane %v2558_v40, 4  ;;  %v3827_v0 = vld [vmem:[%s4783_s7 + $0x3c] sm:$0xf] }
  0x89   : > { %4168 = vmatpush3.bf16.msra.mxu1 %v4601_v6  ;;  %4155 = vmatprep.mubr.bf16.mxu1 %v3600_v2  ;;  %v5458_v23 = vrot.slane %v2527_v61, 4  ;;  %v5472_v45 = vrot.slane %v2569_v31, 4  ;;  %v2574_v22 = vrot.slane %v2572_v17, 5  ;;  %v2593_v32 = vshrl.u32 %v3827_v0, 16  ;;  %v4620_v31 = vld [vmem:[%s4783_s7 + $0x6c] sm:$0xff]  }
  0x8a   : > { %4278 = vmatpush3.bf16.msra.mxu0 %v4599_v16  ;;  %4169 = vmatprep.subr.bf16.mxu1 %v4604_v43  ;;  %v4616_v16 = vld [vmem:[%s5875_s1 + $0xe8] sm:$0xff]   ;;  %v2561_v30 = vor.u32 %v2560_v42, %v5465_v51  ;;  %v2596_v63 = vshll.u32 %v3827_v0, 16 }
  0x8b   : > { %4295 = vmatprep.subr.bf16.mxu0 %v4603_v19  ;;  %v2575_v53 = vor.u32 %v2574_v22, %v5472_v45  ;;  %v2595_v40 = vrot.slane %v2593_v32, 4  ;;  %v4625_v45 = vld [vmem:[%s4783_s7 + $0x18] sm:$0xff]   ;;  %v5568_v32 = vld [vmem:[%s4783_s7 + $0x64] sm:$0xf] }
  0x8c   : > { %v5523_v61 = vrot.slane %v2561_v30, 4  ;;  %v3836_v30 = vld [vmem:[%s4783_s7 + $0x60] sm:$0xf] }
  0x8d   : > { %4280 = vmatmul.mubr.bf16.vlgmr.msra.gmra.mrb[0].mxu0 %v4602_v5  ;;  %4170 = vmatpush3.bf16.msra.mxu1 %v4604_v43  ;;  %v5476_v43 = vld [vmem:[%s4783_s7 + $0x40] sm:$0xf]  ;;  %v2584_v5 = vrot.slane %v2582_v10, 4  ;;  %v2576_v41 = vrot.slane %v2575_v53, 4  ;;  %v2612_v10 = vshll.u32 %v5530_v27, 16 }
  0x8e   : > { %4296 = vmatpush3.bf16.msra.mxu0 %v4603_v19  ;;  %4283 = vmatprep.mubr.bf16.mxu0 %v4606_v29  ;;  %v4614_v19 = vld [vmem:[%s4783_s7 + $0x54] sm:$0xff]   ;;  %v2588_v29 = vshll.u32 %v5468_v37, 16  ;;  %v2602_v33 = vshll.u32 %v5476_v43, 16  ;;  %v5596_v53 = vld [vmem:[%s4783_s7 + $0x5c] sm:$0x1] }
  0x8f   : > { %4297 = vmatprep.subr.bf16.mxu0 %v4605_v56  ;;  %4171 = vmatprep.subr.bf16.mxu1 %v4607_v44 }
  0x90   : > { %4156 = vmatmul.mubr.bf16.gmra.mrb[4].mxu1 %v3601_v18  ;;  %v2537_v18 = vor.u32 %v2536_v47, %v5423_v49 }
  0x91   : > { %4172 = vmatpush3.bf16.msra.mxu1 %v4607_v44  ;;  %4159 = vmatprep.mubr.bf16.mxu1 %v3602_v34  ;;  %v2550_v34 = vrot.slane %v2548_v52, 5  ;;  %v5494_v44 = vld [vmem:[%s4783_s7 + $0x4c] sm:$0xf] }
  0x92   : > { %4298 = vmatpush3.bf16.msra.mxu0 %v4605_v56  ;;  %4173 = vmatprep.subr.bf16.mxu1 %v4610_v11  ;;  %v5470_v6 = vrot.slane %v2537_v18, 4  ;;  %v3830_v56 = vld [vmem:[%s4783_s7 + $0x48] sm:$0xf]  ;;  %v2626_v7 = vshll.u32 %v5494_v44, 16  ;;  %v2630_v47 = vshrl.u32 %v5494_v44, 16  ;;  %v4624_v52 = vld [vmem:[%s4783_s7 + $0xc] sm:$0xff]  }
  0x93   : > { %4299 = vmatprep.subr.bf16.mxu0 %v4609_v39  ;;  %v2551_v2 = vor.u32 %v2550_v34, %v2547_v14 }
  0x94   : > { %v2543_v60 = vsel %vm4828_vm2, %v5470_v6, %v5452_v15  ;;  %v5536_v15 = vld [vmem:[%s4783_s7 + $0x50] sm:$0x1]  ;;  %v5541_v48 = vrot.slane %v2626_v7, 5  ;;  %v5551_v6 = vld [vmem:[%s4783_s7 + $0x58] sm:$0xf] }
  0x95   : > { %4284 = vmatmul.mubr.bf16.gmra.mrb[4].mxu0 %v4608_v35  ;;  %4174 = vmatpush3.bf16.msra.mxu1 %v4610_v11  ;;  %v5510_v21 = vrot.slane %v2551_v2, 4  ;;  %v2620_v11 = vshll.u32 %v3830_v56, 16  ;;  %v2585_v35 = vor.u32 %v2584_v5, %v5483_v8  ;;  %v2636_v42 = vshll.u32 %v5536_v15, 16 }
  0x96   : > { %4300 = vmatpush3.bf16.msra.mxu0 %v4609_v39  ;;  %4287 = vmatprep.mubr.bf16.mxu0 %v4612_v50  ;;  %v2617_v39 = vshrl.u32 %v3830_v56, 16  ;;  %v2598_v50 = vrot.slane %v2596_v63, 5  ;;  %v2567_v2 = vsel %vm4828_vm2, %v5523_v61, %v5512_v62  ;;  %v2581_v63 = vsel %vm4828_vm2, %v2576_v41, %v5483_v8  ;;  %v5593_v61 = vld [vmem:[%s5875_s1 + $0x210] sm:$0xff]  }
  0x97   : > { %4301 = vmatprep.subr.bf16.mxu0 %v4611_v38  ;;  %4175 = vmatprep.subr.bf16.mxu1 %v4613_v12  ;;  %v2622_v34 = vrot.slane %v2620_v11, 5  ;;  %v2586_v13 = vrot.slane %v2585_v35, 4  ;;  %v2557_v0 = vsel %vm4828_vm2, %v5510_v21, %v5465_v51  ;;  %v4628_v51 = vld [vmem:[%s4783_s7 + $0x24] sm:$0xff]   ;;  %v2654_v56 = vshrl.u32 %v5551_v6, 16 }
  0x98   : > { %4160 = vmatmul.mubr.bf16.gmra.mrb[8].mxu1 %v3603_v57  ;;  %v2606_v57 = vshrl.u32 %v5476_v43, 16  ;;  %v2619_v14 = vrot.slane %v2617_v39, 4  ;;  %v2599_v59 = vor.u32 %v2598_v50, %v2595_v40  ;;  %v5586_v8 = vrot.slane %v2636_v42, 5  ;;  %v3839_v50 = vld [vmem:[%s4783_s7 + $0x6c] sm:$0xf] }
  0x99   : > { %4176 = vmatpush3.bf16.msra.mxu1 %v4613_v12  ;;  %4163 = vmatprep.mubr.bf16.mxu1 %v3604_v20  ;;  %v2533_v20 = vsel %vm4828_vm2, %v5458_v23, %v5423_v49  ;;  %v4621_v49 = vld [vmem:[%s5875_s1 + $0x1f0] sm:$0xff]   ;;  %v5532_v12 = vrot.slane %v2602_v33, 5  ;;  %v4623_v23 = vld [vmem:[%s5875_s1 + $0x1f8] sm:$0xff]   ;;  %v5574_v33 = vrot.slane %v2612_v10, 5  ;;  %v2665_v21 = vshrl.u32 %v3836_v30, 16 }
  0x9a   : > { %4302 = vmatpush3.bf16.msra.mxu0 %v4611_v38  ;;  %4177 = vmatprep.subr.bf16.mxu1 %v4616_v16  ;;  %v5527_v38 = vrot.slane %v2588_v29, 5  ;;  %v2608_v18 = vrot.slane %v2606_v57, 4  ;;  %v3858_v17 = vcombine.low %v2533_v20, %v2543_v60  ;;  %v2650_v57 = vshll.u32 %v5551_v6, 16 }
  0x9b   : > { %4303 = vmatprep.subr.bf16.mxu0 %v4615_v58  ;;  %v2600_v20 = vrot.slane %v2599_v59, 4  ;;  %v2668_v62 = vshll.u32 %v3836_v30, 16  ;;  %v2674_v39 = vshll.u32 %v5568_v32, 16  ;;  %v2678_v11 = vshrl.u32 %v5568_v32, 16 }
  0x9c   : > { %v5598_v35 = vrot.slane %v2650_v57, 5  ;;  %v2689_v59 = vshrl.u32 %v3839_v50, 16 }
  0x9d   : > { %4288 = vmatmul.mubr.bf16.gmra.mrb[8].mxu0 %v4614_v19  ;;  %4178 = vmatpush3.bf16.msra.mxu1 %v4616_v16  ;;  %v2632_v16 = vrot.slane %v2630_v47, 4  ;;  %v4626_v19 = vld [vmem:[%s5875_s1 + $0x200] sm:$0xff]   ;;  %v2605_v41 = vsel %vm4828_vm2, %v2600_v20, %v5532_v12 }
  0x9e   : > { %4304 = vmatpush3.bf16.msra.mxu0 %v4615_v58  ;;  %4291 = vmatprep.mubr.bf16.mxu0 %v4618_v1  ;;  %v3833_v58 = vld [vmem:[%s4783_s7 + $0x54] sm:$0xf]  ;;  %v2623_v1 = vor.u32 %v2622_v34, %v2619_v14  ;;  %v2670_v14 = vrot.slane %v2668_v62, 5  ;;  %v5605_v34 = vrot.slane %v2674_v39, 5 }
  0x9f   : > { %4305 = vmatprep.subr.bf16.mxu0 %v4617_v54  ;;  %4179 = vmatprep.subr.bf16.mxu1 %v4619_v24  ;;  %v2633_v22 = vor.u32 %v2632_v16, %v5541_v48  ;;  %v2641_v5 = vshrl.u32 %v3833_v58, 16  ;;  %v2644_v29 = vshll.u32 %v3833_v58, 16  ;;  %v2680_v16 = vrot.slane %v2678_v11, 4  ;;  %v5615_v58 = vld [vmem:[%s4783_s7 + $0x68] sm:$0x1] }
  0xa0   : > { %4164 = vmatmul.mubr.bf16.gmra.mrb[12].mxu1 %v3605_v4  ;;  %v2609_v4 = vor.u32 %v2608_v18, %v5532_v12  ;;  %v2624_v7 = vrot.slane %v2623_v1, 4  ;;  %v5603_v18 = vld [vmem:[%s4783_s7 + $0x70] sm:$0xf]  ;;  %v5624_v12 = vld [vmem:[%s5875_s1 + $0x218] sm:$0xff]   ;;  %v2660_v1 = vshll.u32 %v5596_v53, 16 }
  0xa1   : > { %4180 = vmatpush3.bf16.msra.mxu1 %v4619_v24  ;;  %4183 = vmatprep.mubr.bf16.mxu1 %v4624_v52  ;;  %v2591_v24 = vsel %vm4828_vm2, %v2586_v13, %v5527_v38  ;;  %v2634_v47 = vrot.slane %v2633_v22, 4  ;;  %v3859_v52 = vcombine.low %v2557_v0, %v2567_v2  ;;  %v2656_v38 = vrot.slane %v2654_v56, 4  ;;  %v4632_v13 = vld [vmem:[%s4783_s7 + $0x3c] sm:$0xff]   ;;  %v3878_v11 = vld [vmem:[%s4783_s7 + $0x48] sm:$0xe] }
  0xa2   : > { %4306 = vmatpush3.bf16.msra.mxu0 %v4617_v54  ;;  %4181 = vmatprep.subr.bf16.mxu1 %v4622_v55  ;;  %v5581_v54 = vld [vmem:[%s5875_s1 + $0x208] sm:$0xff]   ;;  %v2610_v60 = vrot.slane %v2609_v4, 4  ;;  %v3860_v40 = vcombine.low %v2581_v63, %v2591_v24  ;;  %v2692_v4 = vshll.u32 %v3839_v50, 16  ;;  %v2698_v42 = vshll.u32 %v5603_v18, 16 }
  0xa3   : > { %4307 = vmatprep.subr.bf16.mxu0 %v4621_v49  ;;  %v2629_v0 = vsel %vm4828_vm2, %v2624_v7, %v5541_v48  ;;  %v2657_v2 = vor.u32 %v2656_v38, %v5598_v35  ;;  %v2662_v20 = vrot.slane %v2660_v1, 5  ;;  %v4633_v7 = vld [vmem:[%s4783_s7 + $0x48] sm:$0xff]  }
  0xa4   : > { %v2694_v63 = vrot.slane %v2692_v4, 5  ;;  %v4635_v50 = vld [vmem:[%s5875_s1 + $0x228] sm:$0xff]  }
  0xa5   : > { %4292 = vmatmul.mubr.bf16.gmra.mrb[12].mxu0 %v4620_v31  ;;  %4182 = vmatpush3.bf16.msra.mxu1 %v4622_v55  ;;  %v2646_v55 = vrot.slane %v2644_v29, 5  ;;  %v2667_v31 = vrot.slane %v2665_v21, 4  ;;  %v2684_v29 = vshll.u32 %v5615_v58, 16  ;;  %v2658_v24 = vrot.slane %v2657_v2, 4  ;;  %v4634_v21 = vld [vmem:[%s5875_s1 + $0x220] sm:$0xff]  }
  0xa6   : > { %4308 = vmatpush3.bf16.msra.mxu0 %v4621_v49  ;;  %4311 = vmatprep.mubr.bf16.mxu0 %v3858_v17  ;;  %v2643_v49 = vrot.slane %v2641_v5, 4  ;;  %v4629_v17 = vld [vmem:[%s4783_s7 + $0x30] sm:$0xff]   ;;  %v2681_v5 = vor.u32 %v2680_v16, %v5605_v34  ;;  %v3880_v2 = vld [vmem:[%s4783_s7 + $0x60] sm:$0xe] }
  0xa7   : > { %4309 = vmatprep.subr.bf16.mxu0 %v4623_v23  ;;  %4359 = vmatprep.subr.bf16.mxu1 %v4626_v19  ;;  %v2671_v22 = vor.u32 %v2670_v14, %v2667_v31  ;;  %v3886_v31 = vrot.slane %v3878_v11, 9 }
  0xa8   : > { %4184 = vmatmul.mubr.bf16.vlgmr.msra.gmra.mrb[0].mxu1 %v4625_v45  ;;  %v2647_v10 = vor.u32 %v2646_v55, %v2643_v49  ;;  %v2702_v45 = vshrl.u32 %v5603_v18, 16  ;;  %v2682_v39 = vrot.slane %v2681_v5, 4  ;;  %v4636_v49 = vld [vmem:[%s4783_s7 + $0x54] sm:$0xff]  }
  0xa9   : > { %4367 = vmatpush3.bf16.msra.mxu1 %v4626_v19  ;;  %4187 = vmatprep.mubr.bf16.mxu1 %v4628_v51  ;;  %v2691_v51 = vrot.slane %v2689_v59, 4  ;;  %v2672_v62 = vrot.slane %v2671_v22, 4 }
  0xaa   : > { %4310 = vmatpush3.bf16.msra.mxu0 %v4623_v23  ;;  %4360 = vmatprep.subr.bf16.mxu1 %v5581_v54  ;;  %v2615_v23 = vsel %vm4828_vm2, %v2610_v60, %v5574_v33  ;;  %v2648_v30 = vrot.slane %v2647_v10, 4  ;;  %v5639_v33 = vrot.slane %v2698_v42, 5  ;;  %v2704_v57 = vrot.slane %v2702_v45, 4  ;;  %v5644_v60 = vld [vmem:[%s4783_s7 + $0x74] sm:$0x1] }
  0xab   : > { %4327 = vmatprep.subr.bf16.mxu0 %v4626_v19  ;;  %v3861_v48 = vcombine.low %v2605_v41, %v2615_v23  ;;  %v2695_v55 = vor.u32 %v2694_v63, %v2691_v51  ;;  %v2708_v38 = vshll.u32 %v5644_v60, 16  ;;  %v2677_v16 = vsel %vm4828_vm2, %v2672_v62, %v5605_v34  ;;  %v4639_v51 = vld [vmem:[%s5875_s1 + $0x238] sm:$0xff]  }
  0xac   : > { %v2959_v10 = vrot.slane %v5405_v26, 5  ;;  %v3879_v26 = vld [vmem:[%s4783_s7 + $0x54] sm:$0xe]  ;;  %v2998_v45 = vrot.slane %v5568_v32, 5  ;;  %v2963_v63 = vrot.slane %v5426_v25, 5  ;;  %v3008_v3 = vrot.slane %v5644_v60, 5 }
  0xad   : > { %4312 = vmatmul.mubr.bf16.vlgmr.msra.gmra.mrb[0].mxu0 %v3859_v52  ;;  %4368 = vmatpush3.bf16.msra.mxu1 %v5581_v54  ;;  %v2705_v52 = vor.u32 %v2704_v57, %v5639_v33  ;;  %v2710_v4 = vrot.slane %v2708_v38, 5  ;;  %v3888_v57 = vrot.slane %v3880_v2, 9 }
  0xae   : > { %4328 = vmatpush3.bf16.msra.mxu0 %v4626_v19  ;;  %4315 = vmatprep.mubr.bf16.mxu0 %v3860_v40  ;;  %v2639_v19 = vsel %vm4828_vm2, %v2634_v47, %v5586_v8  ;;  %v2984_v8 = vrot.slane %v5494_v44, 5  ;;  %v2956_v47 = vrot.slane %v5400_v9, 5  ;;  %v2653_v44 = vsel %vm4828_vm2, %v2648_v30, %v5598_v35  ;;  %v3874_v40 = vld [vmem:[%s4783_s7 + $0x18] sm:$0xe]  ;;  %v3875_v30 = vld [vmem:[%s4783_s7 + $0x24] sm:$0xe] }
  0xaf   : > { %4329 = vmatprep.subr.bf16.mxu0 %v5581_v54  ;;  %4361 = vmatprep.subr.bf16.mxu1 %v5593_v61  ;;  %v3862_v56 = vcombine.low %v2629_v0, %v2639_v19  ;;  %v2663_v9 = vsel %vm4828_vm2, %v2658_v24, %v2662_v20  ;;  %v2987_v35 = vrot.slane %v5536_v15, 5  ;;  %v3882_v41 = vrot.slane %v3874_v40, 9  ;;  %v4638_v0 = vld [vmem:[%s5875_s1 + $0x230] sm:$0xff]   ;;  %v4637_v19 = vld [vmem:[%s4783_s7 + $0x60] sm:$0xff]  }
  0xb0   : > { %4188 = vmatmul.mubr.bf16.gmra.mrb[4].mxu1 %v4629_v17  ;;  %v2986_v14 = vrot.slane %v2984_v8, 4  ;;  %v2991_v17 = vrot.slane %v5551_v6, 5  ;;  %v2958_v23 = vrot.slane %v2956_v47, 4  ;;  %v3863_v15 = vcombine.low %v2653_v44, %v2663_v9 }
  0xb1   : > { %4369 = vmatpush3.bf16.msra.mxu1 %v5593_v61  ;;  %4191 = vmatprep.mubr.bf16.mxu1 %v4632_v13  ;;  %v2696_v13 = vrot.slane %v2695_v55, 4  ;;  %v2706_v59 = vrot.slane %v2705_v52, 4  ;;  %v2985_v42 = vsel %vm5125_vm5, %v3886_v31, %v2984_v8  ;;  %v2957_v22 = vsel %vm5125_vm5, %v3882_v41, %v2956_v47  ;;  %v3876_v8 = vld [vmem:[%s4783_s7 + $0x30] sm:$0xe] }
  0xb2   : > { %4330 = vmatpush3.bf16.msra.mxu0 %v5581_v54  ;;  %4362 = vmatprep.subr.bf16.mxu1 %v5624_v12  ;;  %v2686_v54 = vrot.slane %v2684_v29, 5  ;;  %v2988_v6 = vsel %vm5125_vm5, %v2986_v14, %v2987_v35  ;;  %v2993_v1 = vrot.slane %v2991_v17, 4  ;;  %v2960_v5 = vsel %vm5125_vm5, %v2958_v23, %v2959_v10  ;;  %v3877_v14 = vld [vmem:[%s4783_s7 + $0x3c] sm:$0xe] }
  0xb3   : > { %4331 = vmatprep.subr.bf16.mxu0 %v5593_v61  ;;  %v2701_v32 = vsel %vm4828_vm2, %v2696_v13, %v5639_v33  ;;  %v2711_v29 = vsel %vm4828_vm2, %v2706_v59, %v2710_v4  ;;  %v3001_v24 = vrot.slane %v5615_v58, 5  ;;  %v3883_v33 = vrot.slane %v3875_v30, 9 }
  0xb4   : > { %v3906_v62 = vcombine.low %v2957_v22, %v2960_v5  ;;  %v3005_v58 = vrot.slane %v5603_v18, 5  ;;  %v3884_v47 = vrot.slane %v3876_v8, 9  ;;  %v2972_v44 = vrot.slane %v2970_v36, 4 }
  0xb5   : > { %4316 = vmatmul.mubr.bf16.gmra.mrb[4].mxu0 %v3861_v48  ;;  %4370 = vmatpush3.bf16.msra.mxu1 %v5624_v12  ;;  %v3910_v48 = vcombine.low %v2985_v42, %v2988_v6  ;;  %v2964_v40 = vsel %vm5125_vm5, %v3883_v33, %v2963_v63  ;;  %v2980_v41 = vrot.slane %v5530_v27, 5 }
  0xb6   : > { %4332 = vmatpush3.bf16.msra.mxu0 %v5593_v61  ;;  %4319 = vmatprep.mubr.bf16.mxu0 %v3862_v56  ;;  %v2687_v61 = vsel %vm4828_vm2, %v2682_v39, %v2686_v54  ;;  %v3000_v56 = vrot.slane %v2998_v45, 4  ;;  %v2965_v39 = vrot.slane %v2963_v63, 4  ;;  %v2999_v54 = vsel %vm5125_vm5, %v3888_v57, %v2998_v45 }
  0xb7   : > { %4333 = vmatprep.subr.bf16.mxu0 %v5624_v12  ;;  %4363 = vmatprep.subr.bf16.mxu1 %v4634_v21  ;;  %v3864_v34 = vcombine.low %v2677_v16, %v2687_v61  ;;  %v3007_v38 = vrot.slane %v3005_v58, 4 }
  0xb8   : > { %4192 = vmatmul.mubr.bf16.gmra.mrb[8].mxu1 %v4633_v7  ;;  %v3002_v11 = vsel %vm5125_vm5, %v3000_v56, %v3001_v24  ;;  %v3881_v7 = vld [vmem:[%s4783_s7 + $0x6c] sm:$0xe]  ;;  %v2967_v9 = vsel %vm5125_vm5, %v2965_v39, %v2966_v46  ;;  %s3515_s7 = sshll.u32 %s4666_s18, 3 }
  0xb9   : > { %4371 = vmatpush3.bf16.msra.mxu1 %v4634_v21  ;;  %4195 = vmatprep.mubr.bf16.mxu1 %v4636_v49  ;;  %v2973_v49 = vrot.slane %v5468_v37, 5  ;;  %v3912_v18 = vcombine.low %v2999_v54, %v3002_v11  ;;  %v3889_v52 = vrot.slane %v3881_v7, 9  ;;  %v2971_v37 = vsel %vm5125_vm5, %v3884_v47, %v2970_v36  ;;  %p335_p6 = scmp.lt.s32.totalorder %s3515_s7, 15  ;;  %v5777_v54 = vld [vmem:[%s5877_s3] ss:$0 sm:$0xff] }
  0xba   : > { %4334 = vmatpush3.bf16.msra.mxu0 %v5624_v12  ;;  %4364 = vmatprep.subr.bf16.mxu1 %v4635_v50  ;;  %v2994_v12 = vrot.slane %v5596_v53, 5  ;;  %v3887_v53 = vrot.slane %v3879_v26, 9  ;;  %v3907_v60 = vcombine.low %v2964_v40, %v2967_v9  ;;  %v3009_v16 = vsel %vm5125_vm5, %v3007_v38, %v3008_v3 }
  0xbb   : > { %4335 = vmatprep.subr.bf16.mxu0 %v4634_v21  ;;  %v2974_v31 = vsel %vm5125_vm5, %v2972_v44, %v2973_v49  ;;  %v3006_v35 = vsel %vm5125_vm5, %v3889_v52, %v3005_v58  ;;  %s5906_s7 = smov (!%p335_p6, %s3515_s7), 15 }
  0xbc   : > { %v2995_v20 = vsel %vm5125_vm5, %v2993_v1, %v2994_v12  ;;  %v2992_v25 = vsel %vm5125_vm5, %v3887_v53, %v2991_v17  ;;  %v3908_v61 = vcombine.low %v2971_v37, %v2974_v31  ;;  %v3913_v23 = vcombine.low %v3006_v35, %v3009_v16  ;;  %s3516_s13 = sshll.u32 %s5906_s7, 1 }
  0xbd   : > { %4320 = vmatmul.mubr.bf16.gmra.mrb[8].mxu0 %v3863_v15  ;;  %4372 = vmatpush3.bf16.msra.mxu1 %v4635_v50  ;;  %v3911_v55 = vcombine.low %v2992_v25, %v2995_v20  ;;  %s5753_s18 = sadd.s32 %s3517_s14, %s3516_s13 }
  0xbe   : > { %4336 = vmatpush3.bf16.msra.mxu0 %v4634_v21  ;;  %4323 = vmatprep.mubr.bf16.mxu0 %v3864_v34  ;;  %v3865_v21 = vcombine.low %v2701_v32, %v2711_v29  ;;  %s3518_s15 = sshll.u32 %s5753_s18, 3 }
  0xbf   : > { %4337 = vmatprep.subr.bf16.mxu0 %v4635_v50  ;;  %4365 = vmatprep.subr.bf16.mxu1 %v4638_v0  ;;  %s5772_s26 = scalar_lea.vmem %s5878_s4, %s3518_s15  ;;  %s5795_s6 = scalar_lea.vmem %s5879_s5, %s3518_s15 }
  0xc0   : > { %4196 = vmatmul.mubr.bf16.gmra.mrb[12].mxu1 %v4637_v19  ;;  %v3274_v40 = vld [vmem:[%s5772_s26 + $0x40] sm:$0xff] }
  0xc1   : > { %4373 = vmatpush3.bf16.msra.mxu1 %v4638_v0  ;;  %4351 = vmatprep.mubr.bf16.mxu1 %v3910_v48 }
  0xc2   : > { %4338 = vmatpush3.bf16.msra.mxu0 %v4635_v50  ;;  %4366 = vmatprep.subr.bf16.mxu1 %v4639_v51  ;;  %v2977_v50 = vrot.slane %v5476_v43, 5  ;;  %v3885_v43 = vrot.slane %v3877_v14, 9  ;;  %v3277_v14 = vld [vmem:[%s5772_s26 + $0x58] sm:$0xff] }
  0xc3   : > { %4339 = vmatprep.subr.bf16.mxu0 %v4638_v0 }
  0xc4   : > { %v2979_v17 = vrot.slane %v2977_v50, 4  ;;  %v2978_v10 = vsel %vm5125_vm5, %v3885_v43, %v2977_v50 }
  0xc5   : > { %4324 = vmatmul.mubr.bf16.gmra.mrb[12].mxu0 %v3865_v21  ;;  %4374 = vmatpush3.bf16.msra.mxu1 %v4639_v51 }
  0xc6   : > { %4340 = vmatpush3.bf16.msra.mxu0 %v4638_v0  ;;  %4343 = vmatprep.mubr.bf16.mxu0 %v3906_v62  ;;  %v2981_v15 = vsel %vm5125_vm5, %v2979_v17, %v2980_v41  ;;  %v5763_v62 = vld [vmem:[%s5876_s2] ss:$0 sm:$0xff]  ;;  %v3275_v17 = vld [vmem:[%s5772_s26 + $0x48] sm:$0xff] }
  0xc7   : > { %4341 = vmatprep.subr.bf16.mxu0 %v4639_v51  ;;  %v3909_v13 = vcombine.low %v2978_v10, %v2981_v15 }
  0xc8   : > { %4352 = vmatmul.mubr.bf16.vlgmr.msra.gmra.mrb[16].mxu1 %v3911_v55  ;;  %v3276_v55 = vld [vmem:[%s5772_s26 + $0x50] sm:$0xff] }
  0xc9   : > { %4355 = vmatprep.mubr.bf16.mxu1 %v3912_v18 }
  0xca   : > { %4342 = vmatpush3.bf16.msra.mxu0 %v4639_v51 }
  0xcd   : > { %4344 = vmatmul.mubr.bf16.vlgmr.msra.gmra.mrb[0].mxu0 %v3907_v60 }
  0xce   : > { %4347 = vmatprep.mubr.bf16.mxu0 %v3908_v61 }
  0xd0   : > { %4356 = vmatmul.mubr.bf16.gmra.mrb[20].mxu1 %v3913_v23 }
  0xd5   : > { %4348 = vmatmul.mubr.bf16.gmra.mrb[4].mxu0 %v3909_v13 }
 0x17b   : > { %v4185_v59 = vpop.f32.mrb[0].mxu1 }
 0x17c   : > { %v1447_v4 = vpop.f32.mrb[1].mxu1 }
 0x17d   : > { %v5739_v34 = vpop.f32.mrb[2].mxu1 }
 0x17e   : > { %v5741_v42 = vpop.f32.mrb[3].mxu1 }
 0x183   : > { %v5743_v27 = vpop.f32.mrb[4].mxu1 }
 0x184   : > { %v5745_v6 = vpop.f32.mrb[5].mxu1 }
 0x185   : > { %v5747_v26 = vpop.f32.mrb[6].mxu1 }
 0x186   : > { %v5749_v45 = vpop.f32.mrb[7].mxu1 }
 0x18b   : > { %v4193_v28 = vpop.f32.mrb[8].mxu1 }
 0x18c   : > { %v1479_v0 = vpop.f32.mrb[9].mxu1 }
 0x18d   : > { %v4194_v2 = vpop.f32.mrb[10].mxu1 }
 0x18e   : > { %v1482_v1 = vpop.f32.mrb[11].mxu1 }
 0x190   : > { %v4321_v12 = vpop.f32.mrb[8].mxu0 }
 0x191   : > { %v4383_v19 = vadd.f32 %v4321_v12, %v4193_v28  ;;  %v2875_v22 = vpop.f32.mrb[9].mxu0 }
 0x192   : > { %v4385_v5 = vadd.f32 %v2875_v22, %v1479_v0  ;;  %v4322_v32 = vpop.f32.mrb[10].mxu0  ;;  %v3266_v22 = vld [vmem:[%s5772_s26] sm:$0xff] }
 0x193   : > { %v4387_v29 = vadd.f32 %v4322_v32, %v4194_v2  ;;  %v2878_v48 = vpop.f32.mrb[11].mxu0  ;;  %v4197_v30 = vpop.f32.mrb[12].mxu1 }
 0x194   : > { %v4389_v53 = vadd.f32 %v2878_v48, %v1482_v1  ;;  %v1495_v51 = vpop.f32.mrb[13].mxu1 }
 0x195   : > { %v4198_v63 = vpop.f32.mrb[14].mxu1 }
 0x196   : > { %v1498_v57 = vpop.f32.mrb[15].mxu1 }
 0x198   : > { %v4325_v56 = vpop.f32.mrb[12].mxu0 }
 0x199   : > { %v4391_v24 = vadd.f32 %v4325_v56, %v4197_v30  ;;  %v2891_v36 = vpop.f32.mrb[13].mxu0  ;;  %v3269_v30 = vld [vmem:[%s5772_s26 + $0x18] sm:$0xff] }
 0x19a   : > { %v5756_v33 = vadd.f32 %v2891_v36, %v1495_v51  ;;  %v4326_v20 = vpop.f32.mrb[14].mxu0  ;;  %v3267_v36 = vld [vmem:[%s5772_s26 + $0x8] sm:$0xff] }
 0x19b   : > { %v5758_v8 = vadd.f32 %v4326_v20, %v4198_v63  ;;  %v2894_v21 = vpop.f32.mrb[15].mxu0  ;;  %v4353_v25 = vpop.f32.mrb[16].mxu1 }
 0x19c   : > { %v5765_v58 = vadd.f32 %v2894_v21, %v1498_v57  ;;  %v4384_v39 = vadd.f32 %v4383_v19, %v4353_v25  ;;  %v3173_v46 = vpop.f32.mrb[17].mxu1 }
 0x19d   : > { %v4386_v11 = vadd.f32 %v4385_v5, %v3173_v46  ;;  %v4354_v7 = vpop.f32.mrb[18].mxu1 }
 0x19e   : > { %v3237_v47 = vmul.f32 %v4384_v39, %v5763_v62  ;;  %v4388_v44 = vadd.f32 %v4387_v29, %v4354_v7  ;;  %v3176_v49 = vpop.f32.mrb[19].mxu1 }
 0x19f   : > { %v3235_v18 = vmul.f32 %v4386_v11, %v5763_v62  ;;  %v4390_v52 = vadd.f32 %v4389_v53, %v3176_v49  ;;  %v3280_v49 = vld [vmem:[%s5772_s26 + $0x70] sm:$0xff] }
 0x1a0   : > { %v4345_v38 = vpop.f32.mrb[0].mxu0  ;;  %v3260_v3 = vadd.f32 %v5777_v54, %v3237_v47  ;;  %v3238_v9 = vmul.f32 %v4388_v44, %v5763_v62 }
 0x1a1   : > { %v4375_v50 = vadd.f32 %v4345_v38, %v4185_v59  ;;  %v3141_v37 = vpop.f32.mrb[1].mxu0  ;;  %v3258_v31 = vadd.f32 %v5777_v54, %v3235_v18  ;;  %v3236_v60 = vmul.f32 %v4390_v52, %v5763_v62 }
 0x1a2   : > { %v3292_v35 = vadd.f32 %v3276_v55, %v3260_v3  ;;  %v4376_v16 = vadd.f32 %v3141_v37, %v1447_v4  ;;  %v4346_v61 = vpop.f32.mrb[2].mxu0  ;;  %v3261_v43 = vadd.f32 %v5777_v54, %v3238_v9  ;;  %v3268_v4 = vld [vmem:[%s5772_s26 + $0x10] sm:$0xff] }
 0x1a3   : > { %v3229_v41 = vmul.f32 %v4375_v50, %v5763_v62  ;;  %v3290_v23 = vadd.f32 %v3274_v40, %v3258_v31  ;;  %v4377_v10 = vadd.f32 %v4346_v61, %v5739_v34  ;;  %v3144_v15 = vpop.f32.mrb[3].mxu0  ;;  %v3259_v13 = vadd.f32 %v5777_v54, %v3236_v60  ;;  %v4357_v59 = vpop.f32.mrb[20].mxu1  ;;  %v3278_v40 = vld [vmem:[%s5772_s26 + $0x60] sm:$0xff]  ;;  %v3272_v60 = vld [vmem:[%s5772_s26 + $0x30] sm:$0xff] }
 0x1a4   : > { %v3308_v28 = vmax.f32 %v3292_v35, 0.0  ;;  %v3227_v0 = vmul.f32 %v4376_v16, %v5763_v62  ;;  %v3293_v2 = vadd.f32 %v3277_v14, %v3261_v43  ;;  %v4378_v1 = vadd.f32 %v3144_v15, %v5741_v42  ;;  %v3189_v12 = vpop.f32.mrb[21].mxu1  ;;  %v3270_v43 = vld [vmem:[%s5772_s26 + $0x20] sm:$0xff] }
 0x1a5   : > { %v3252_v19 = vadd.f32 %v5777_v54, %v3229_v41  ;;  %v3306_v34 = vmax.f32 %v3290_v23, 0.0  ;;  %v3230_v5 = vmul.f32 %v4377_v10, %v5763_v62  ;;  %v3291_v32 = vadd.f32 %v3275_v17, %v3259_v13  ;;  %v4358_v29 = vpop.f32.mrb[22].mxu1  ;;  %v3273_v13 = vld [vmem:[%s5772_s26 + $0x38] sm:$0xff] }
 0x1a6   : > { %3324 = vst [vmem:[%s5795_s6 + $0x50] sm:$0xff] %v3308_v28  ;;  %v3250_v48 = vadd.f32 %v5777_v54, %v3227_v0  ;;  %v3309_v53 = vmax.f32 %v3293_v2, 0.0  ;;  %v3228_v51 = vmul.f32 %v4378_v1, %v5763_v62  ;;  %v4392_v42 = vadd.f32 %v4391_v24, %v4357_v59  ;;  %v3192_v63 = vpop.f32.mrb[23].mxu1 }
 0x1a7   : > { %v3284_v57 = vadd.f32 %v3268_v4, %v3252_v19  ;;  %3322 = vst [vmem:[%s5795_s6 + $0x40] sm:$0xff] %v3306_v34  ;;  %v3253_v56 = vadd.f32 %v5777_v54, %v3230_v5  ;;  %v3307_v20 = vmax.f32 %v3291_v32, 0.0  ;;  %v4394_v21 = vadd.f32 %v5756_v33, %v3189_v12  ;;  %v3271_v19 = vld [vmem:[%s5772_s26 + $0x28] sm:$0xff] }
 0x1a8   : > { %v3282_v25 = vadd.f32 %v3266_v22, %v3250_v48  ;;  %3325 = vst [vmem:[%s5795_s6 + $0x58] sm:$0xff] %v3309_v53  ;;  %v3251_v39 = vadd.f32 %v5777_v54, %v3228_v51  ;;  %v4349_v46 = vpop.f32.mrb[4].mxu0  ;;  %v3241_v24 = vmul.f32 %v4392_v42, %v5763_v62  ;;  %v4396_v11 = vadd.f32 %v5758_v8, %v4358_v29  ;;  %v3279_v32 = vld [vmem:[%s5772_s26 + $0x68] sm:$0xff] }
 0x1a9   : > { %v3300_v7 = vmax.f32 %v3284_v57, 0.0  ;;  %v3285_v47 = vadd.f32 %v3269_v30, %v3253_v56  ;;  %3323 = vst [vmem:[%s5795_s6 + $0x48] sm:$0xff] %v3307_v20  ;;  %v4379_v44 = vadd.f32 %v4349_v46, %v5743_v27  ;;  %v3157_v55 = vpop.f32.mrb[5].mxu0  ;;  %v3239_v33 = vmul.f32 %v4394_v21, %v5763_v62 }
 0x1aa   : > { %v3298_v18 = vmax.f32 %v3282_v25, 0.0  ;;  %v3283_v52 = vadd.f32 %v3267_v36, %v3251_v39  ;;  %v3264_v38 = vadd.f32 %v5777_v54, %v3241_v24  ;;  %v4380_v3 = vadd.f32 %v3157_v55, %v5745_v6  ;;  %v4350_v8 = vpop.f32.mrb[6].mxu0 }
 0x1ab   : > { %3316 = vst [vmem:[%s5795_s6 + $0x10] sm:$0xff] %v3300_v7  ;;  %v3301_v9 = vmax.f32 %v3285_v47, 0.0  ;;  %v3233_v27 = vmul.f32 %v4379_v44, %v5763_v62  ;;  %v3262_v50 = vadd.f32 %v5777_v54, %v3239_v33  ;;  %v4381_v37 = vadd.f32 %v4350_v8, %v5747_v26  ;;  %v3160_v31 = vpop.f32.mrb[7].mxu0  ;;  %v3281_v26 = vld [vmem:[%s5772_s26 + $0x78] sm:$0xff] }
 0x1ac   : > { %3314 = vst [vmem:[%s5795_s6] sm:$0xff] %v3298_v18  ;;  %v3299_v14 = vmax.f32 %v3283_v52, 0.0  ;;  %v3296_v35 = vadd.f32 %v3280_v49, %v3264_v38  ;;  %v3231_v6 = vmul.f32 %v4380_v3, %v5763_v62  ;;  %v3242_v16 = vmul.f32 %v4396_v11, %v5763_v62 }
 0x1ad   : > { %3317 = vst [vmem:[%s5795_s6 + $0x18] sm:$0xff] %v3301_v9  ;;  %v3256_v61 = vadd.f32 %v5777_v54, %v3233_v27  ;;  %v3294_v17 = vadd.f32 %v3278_v40, %v3262_v50  ;;  %v3234_v41 = vmul.f32 %v4381_v37, %v5763_v62  ;;  %v4382_v23 = vadd.f32 %v3160_v31, %v5749_v45 }
 0x1ae   : > { %3315 = vst [vmem:[%s5795_s6 + $0x8] sm:$0xff] %v3299_v14  ;;  %v3312_v10 = vmax.f32 %v3296_v35, 0.0  ;;  %v3254_v15 = vadd.f32 %v5777_v54, %v3231_v6  ;;  %v3265_v59 = vadd.f32 %v5777_v54, %v3242_v16  ;;  %v4398_v4 = vadd.f32 %v5765_v58, %v3192_v63 }
 0x1af   : > { %v3288_v28 = vadd.f32 %v3272_v60, %v3256_v61  ;;  %v3310_v0 = vmax.f32 %v3294_v17, 0.0  ;;  %v3257_v2 = vadd.f32 %v5777_v54, %v3234_v41  ;;  %v3232_v1 = vmul.f32 %v4382_v23, %v5763_v62 }
 0x1b0   : > { %3328 = vst [vmem:[%s5795_s6 + $0x70] sm:$0xff] %v3312_v10  ;;  %v3286_v45 = vadd.f32 %v3270_v43, %v3254_v15  ;;  %v3297_v12 = vadd.f32 %v3281_v26, %v3265_v59  ;;  %v3240_v22 = vmul.f32 %v4398_v4, %v5763_v62 }
 0x1b1   : > { %v3304_v34 = vmax.f32 %v3288_v28, 0.0  ;;  %3326 = vst [vmem:[%s5795_s6 + $0x60] sm:$0xff] %v3310_v0  ;;  %v3289_v58 = vadd.f32 %v3273_v13, %v3257_v2  ;;  %v3255_v5 = vadd.f32 %v5777_v54, %v3232_v1 }
 0x1b2   : > { %v3302_v29 = vmax.f32 %v3286_v45, 0.0  ;;  %v3313_v48 = vmax.f32 %v3297_v12, 0.0  ;;  %v3263_v30 = vadd.f32 %v5777_v54, %v3240_v22 }
 0x1b3   : > { %3320 = vst [vmem:[%s5795_s6 + $0x30] sm:$0xff] %v3304_v34  ;;  %v3305_v53 = vmax.f32 %v3289_v58, 0.0  ;;  %v3287_v51 = vadd.f32 %v3271_v19, %v3255_v5 }
 0x1b4   : > { %3318 = vst [vmem:[%s5795_s6 + $0x20] sm:$0xff] %v3302_v29  ;;  %3329 = vst [vmem:[%s5795_s6 + $0x78] sm:$0xff] %v3313_v48  ;;  %v3295_v42 = vadd.f32 %v3279_v32, %v3263_v30 }
 0x1b5   : > { %3321 = vst [vmem:[%s5795_s6 + $0x38] sm:$0xff] %v3305_v53  ;;  %v3303_v62 = vmax.f32 %v3287_v51, 0.0 }
 0x1b6   : > { %v3311_v63 = vmax.f32 %v3295_v42, 0.0 }
 0x1b7   : > { %3319 = vst [vmem:[%s5795_s6 + $0x28] sm:$0xff] %v3303_v62 }
 0x1b8   : > { %3327 = vst [vmem:[%s5795_s6 + $0x68] sm:$0xff] %v3311_v63 }
 0x1b9 PF: > { %s15_s22 = sadd.s32 1, %s4682_s22   ;;  %s5893_s18 = smov %s4674_s20 }
 0x1ba   : > { %p12_p7 = scmp.ge.s32.totalorder %s15_s22, 6   ;;  %s5894_s19 = smov %s4678_s21 }
 0x1bb   : > { %s5895_s20 = smov %s5898_s23  ;;  %s5896_s21 = smov %s5902_s24 }
 0x1bc   :  { %14 = sbr.rel (!%p12_p7) target bundleno = 3 (0x3), region = 93 }

</bundles_post_ra>
